<compile_context>
chip_gen: v7x
topology: tpu7x:2x2x1
jax: 0.10.0
libtpu: 0.0.40
codegen_flags: <defaults>
</compile_context>

<pallas_src>
import functools

import jax
import jax.numpy as jnp
from jax import lax
from jax.experimental import pallas as pl
from jax.experimental.pallas import tpu as pltpu


# ---------------------------------------------------------------------------
# Fused kernel factory: num_convs x (3x3 conv + bias + ReLU) followed by
# MaxPool2d(2, 2), all on one image per grid step.
# ---------------------------------------------------------------------------
def _make_fused_vgg_block_kernel(num_convs, cins, cout, H, W, compute_dtype):
    """kernel(x_ref, w0, b0, ..., w{n-1}, b{n-1}, o_ref, buf_ref)."""
    Ho, Wo = H // 2, W // 2

    def kernel(*refs):
        x_ref = refs[0]
        wb_refs = refs[1:1 + 2 * num_convs]
        o_ref = refs[1 + 2 * num_convs]
        buf_ref = refs[2 + 2 * num_convs]            # (H+2, W+2, cmax) f32 VMEM
        cmax = buf_ref.shape[-1]

        # Zero only the 1-pixel halo strips; the interior is fully overwritten
        # below and channels above a layer's cin are never read.
        zrow = jnp.zeros((1, W + 2, cmax), jnp.float32)
        zcol = jnp.zeros((H + 2, 1, cmax), jnp.float32)
        buf_ref[0:1, :, :] = zrow
        buf_ref[H + 1:H + 2, :, :] = zrow
        buf_ref[:, 0:1, :] = zcol
        buf_ref[:, W + 1:W + 2, :] = zcol

        # Load the image into the scratch interior (halo stays zero).
        buf_ref[1:H + 1, 1:W + 1, 0:cins[0]] = x_ref[0].astype(jnp.float32)

        act = None
        for l in range(num_convs):
            w_ref = wb_refs[2 * l]                   # (9, cin_l, cout)
            b_ref = wb_refs[2 * l + 1]               # (1, cout), f32
            cin = cins[l]

            # 9 lane-aligned (H*W, cin) @ (cin, cout) MXU matmuls, f32 accum.
            # TODO(synk): when cin % 128 == 0 (real VGG layers), switch back to
            # the folded (H*W, 3*cin) per-kh form to cut MXU pushes 3x.
            acc = jnp.zeros((H * W, cout), jnp.float32)
            for kh in range(3):
                for kw in range(3):
                    lhs = buf_ref[kh:kh + H, kw:kw + W, 0:cin]
                    lhs = lhs.reshape(H * W, cin).astype(compute_dtype)
                    acc = acc + jnp.dot(lhs, w_ref[kh * 3 + kw],
                                        preferred_element_type=jnp.float32)

            # Bias + ReLU on the VPU in f32 (kept f32 even on the bf16 path).
            act = jnp.maximum(acc + b_ref[...], 0.0)

            if l + 1 < num_convs:
                # Intermediate activations never leave VMEM.
                buf_ref[1:H + 1, 1:W + 1, 0:cout] = act.reshape(H, W, cout)

        # Fused MaxPool2d(2, 2), floor semantics, straight from the last
        # layer's in-register activation: contiguous reshapes + binary VPU max,
        # no strided sublane loads, no extra VMEM round-trip.
        a = act.reshape(H, W, cout)
        if (H != 2 * Ho) or (W != 2 * Wo):
            a = a[:2 * Ho, :2 * Wo, :]               # floor crop for odd H/W
        h2 = a.reshape(2 * Ho * Wo, 2, cout)         # adjacent column pairs
        hmax = jnp.maximum(h2[:, 0, :], h2[:, 1, :])
        v = hmax.reshape(Ho, 2, Wo, cout)            # adjacent row pairs
        pooled = jnp.maximum(v[:, 0], v[:, 1])       # (Ho, Wo, cout)

        # Lane-dense store: (Ho, Wo*cout) slab (wrapper un-flattens).
        o_ref[0] = pooled.reshape(Ho, Wo * cout).astype(o_ref.dtype)

    return kernel


def _round_up(x, m):
    return (x + m - 1) // m * m


def _padded_bytes(shape, itemsize):
    """Rough VMEM footprint of one buffer with (8, 128) layout padding."""
    s = [int(d) for d in shape]
    if len(s) >= 1:
        s[-1] = _round_up(s[-1], 128)
    if len(s) >= 2:
        s[-2] = _round_up(s[-2], 8)
    n = 1
    for d in s:
        n *= d
    return n * itemsize


def vgg_block_pallas(x_nhwc, params, compute_dtype=jnp.float32):
    """x_nhwc: (N, H, W, Cin). params: tuple of (w_hwio (3,3,ci,co), b (co,))."""
    N, H, W, cin0 = x_nhwc.shape
    num_convs = len(params)
    cout = int(params[0][0].shape[-1])
    cins = tuple(int(w.shape[2]) for w, _ in params)
    assert cins[0] == cin0
    for w, _ in params:
        assert w.shape[0] == 3 and w.shape[1] == 3 and int(w.shape[-1]) == cout
    Ho, Wo = H // 2, W // 2
    cmax = max(cin0, cout)

    # Host-side weight prep: (3, 3, ci, co) -> (9, ci, co), pre-cast to the MXU
    # operand dtype; bias stays f32 for the VPU epilogue.
    flat_inputs = [x_nhwc]
    in_specs = [pl.BlockSpec((1, H, W, cin0), lambda n: (n, 0, 0, 0))]
    for w, b in params:
        ci = int(w.shape[2])
        flat_inputs.append(w.reshape(9, ci, cout).astype(compute_dtype))
        flat_inputs.append(b.reshape(1, cout).astype(jnp.float32))
        in_specs.append(pl.BlockSpec((9, ci, cout), lambda n: (0, 0, 0)))
        in_specs.append(pl.BlockSpec((1, cout), lambda n: (0, 0)))

    kernel = _make_fused_vgg_block_kernel(num_convs, cins, cout, H, W,
                                          compute_dtype)

    # VMEM budget derived from actual (layout-padded) block shapes + headroom,
    # capped at 48 MiB so the same code stays safe on v7x (64 MiB physical).
    itemsize = x_nhwc.dtype.itemsize
    cd_size = jnp.dtype(compute_dtype).itemsize
    need = _padded_bytes((H + 2, W + 2, cmax), 4)
    need += 2 * _padded_bytes((1, H, W, cin0), itemsize)
    need += 2 * _padded_bytes((1, Ho, Wo * cout), itemsize)
    for ci in cins:
        need += 2 * (_padded_bytes((9, ci, cout), cd_size)
                     + _padded_bytes((1, cout), 4))
    vmem_limit = min(max(int(1.5 * need) + (2 << 20), 8 << 20), 48 << 20)

    # TODO(synk): for real VGG resolutions (e.g. 224x224x64) add a row-strip
    # grid axis (8-16 output rows per step, halo rows per fused conv) and pad
    # cin/cout to multiples of 128 inside the kernel so the working set fits
    # v7x's 64 MiB VMEM and both v7x TensorCores get work at batch=1; the
    # whole-image block is used here because the target shapes are tiny.
    return pl.pallas_call(
        kernel,
        out_shape=jax.ShapeDtypeStruct((N, Ho, Wo * cout), x_nhwc.dtype),
        grid=(N,),
        in_specs=in_specs,
        out_specs=pl.BlockSpec((1, Ho, Wo * cout), lambda n: (n, 0, 0)),
        scratch_shapes=[pltpu.VMEM((H + 2, W + 2, cmax), jnp.float32)],
        compiler_params=pltpu.CompilerParams(
            dimension_semantics=("parallel",),
            vmem_limit_bytes=vmem_limit),
    )(*flat_inputs)


# ---------------------------------------------------------------------------
# VggBlock forward (NCHW in, NCHW out) + PyTorch-style parameter init.
# ---------------------------------------------------------------------------
def make_vgg_block_params(key, in_channels, out_channels, num_convs):
    """PyTorch-style uniform init; weights stored HWIO for the NHWC kernel."""
    params = []
    cin = in_channels
    for _ in range(num_convs):
        key, kw, kb = jax.random.split(key, 3)
        fan_in = cin * 3 * 3
        bound = 1.0 / jnp.sqrt(jnp.float32(fan_in))
        w = jax.random.uniform(kw, (3, 3, cin, out_channels), jnp.float32,
                               -bound, bound)
        b = jax.random.uniform(kb, (out_channels,), jnp.float32, -bound, bound)
        params.append((w, b))
        cin = out_channels
    return params


@functools.partial(jax.jit, static_argnames=("compute_dtype",))
def vgg_block_forward(x_nchw, params, compute_dtype=jnp.float32):
    x = jnp.transpose(x_nchw, (0, 2, 3, 1))            # NCHW -> NHWC
    N, H, W, _ = x.shape
    cout = int(params[0][0].shape[-1])
    y = vgg_block_pallas(x, tuple(params), compute_dtype)   # (N, Ho, Wo*cout)
    y = y.reshape(N, H // 2, W // 2, cout)              # un-flatten lane slab
    return jnp.transpose(y, (0, 3, 1, 2))               # NHWC -> NCHW


# Pure-JAX reference for validation.
def vgg_block_reference(x_nchw, params):
    x = x_nchw
    for w_hwio, b in params:
        w_oihw = jnp.transpose(w_hwio, (3, 2, 0, 1))
        x = lax.conv_general_dilated(
            x, w_oihw, window_strides=(1, 1), padding="SAME",
            dimension_numbers=("NCHW", "OIHW", "NCHW"))
        x = jnp.maximum(x + b[None, :, None, None], 0.0)
    x = lax.reduce_window(x, -jnp.inf, lax.max,
                          (1, 1, 2, 2), (1, 1, 2, 2), "VALID")
    return x


if __name__ == "__main__":
    key = jax.random.PRNGKey(0)
    key, kx, kp = jax.random.split(key, 3)

    N, C_IN, HW = 2, 4, 16
    NUM_CONVS, C_OUT = 2, 8

    x = jax.random.normal(kx, (N, C_IN, HW, HW), dtype=jnp.float32)  # NCHW
    params = make_vgg_block_params(kp, C_IN, C_OUT, NUM_CONVS)
    params = tuple((jax.device_put(w), jax.device_put(b)) for w, b in params)

    out = vgg_block_forward(x, params)
    out = jax.block_until_ready(out)
    assert out.shape == (N, C_OUT, HW // 2, HW // 2), out.shape

    ref = jax.block_until_ready(vgg_block_reference(x, params))
    assert jnp.allclose(out, ref, rtol=1e-4, atol=1e-4), (
        float(jnp.max(jnp.abs(out - ref))))

    print("KERNEL_OK")
</pallas_src>

<mosaic_0001>
module attributes {stable_mosaic.version = 11 : i64} {
  func.func @kernel(%arg0: i32, %arg1: memref<1x16x16x4xf32, #tpu.memory_space<vmem>>, %arg2: memref<9x4x8xf32, #tpu.memory_space<vmem>>, %arg3: memref<1x8xf32, #tpu.memory_space<vmem>>, %arg4: memref<9x8x8xf32, #tpu.memory_space<vmem>>, %arg5: memref<1x8xf32, #tpu.memory_space<vmem>>, %arg6: memref<1x8x64xf32, #tpu.memory_space<vmem>>, %arg7: memref<18x18x8xf32, #tpu.memory_space<vmem>>) attributes {dimension_semantics = [#tpu.dimension_semantics<parallel>], iteration_bounds = array<i64: 2>, scalar_prefetch = 0 : i64, scratch_operands = 1 : i64, tpu.core_type = #tpu.core_type<tc>, window_params = [{transform_indices = @transform_0, window_bounds = array<i64: 1, 16, 16, 4>}, {pipeline_mode = #tpu.pipeline_mode<synchronous>, transform_indices = @transform_1, window_bounds = array<i64: 9, 4, 8>}, {pipeline_mode = #tpu.pipeline_mode<synchronous>, transform_indices = @transform_2, window_bounds = array<i64: 1, 8>}, {pipeline_mode = #tpu.pipeline_mode<synchronous>, transform_indices = @transform_3, window_bounds = array<i64: 9, 8, 8>}, {pipeline_mode = #tpu.pipeline_mode<synchronous>, transform_indices = @transform_4, window_bounds = array<i64: 1, 8>}, {transform_indices = @transform_5, window_bounds = array<i64: 1, 8, 64>}]} {
    %cst = arith.constant 0.000000e+00 : f32
    %0 = vector.broadcast %cst : f32 to vector<1x18x8xf32>
    %cst_0 = arith.constant 0.000000e+00 : f32
    %1 = vector.broadcast %cst_0 : f32 to vector<18x1x8xf32>
    %c0 = arith.constant 0 : index
    %c0_1 = arith.constant 0 : index
    %c0_2 = arith.constant 0 : index
    %2 = vector.load %arg7[%c0, %c0_1, %c0_2] : memref<18x18x8xf32, #tpu.memory_space<vmem>>, vector<1x18x8xf32>
    tpu.vector_store %arg7[%c0, %c0_1, %c0_2], %0 {strides = array<i32>} : memref<18x18x8xf32, #tpu.memory_space<vmem>>, vector<1x18x8xf32>,
    %c17 = arith.constant 17 : index
    %c0_3 = arith.constant 0 : index
    %c0_4 = arith.constant 0 : index
    %3 = vector.load %arg7[%c17, %c0_3, %c0_4] : memref<18x18x8xf32, #tpu.memory_space<vmem>>, vector<1x18x8xf32>
    tpu.vector_store %arg7[%c17, %c0_3, %c0_4], %0 {strides = array<i32>} : memref<18x18x8xf32, #tpu.memory_space<vmem>>, vector<1x18x8xf32>,
    %c0_5 = arith.constant 0 : index
    %c0_6 = arith.constant 0 : index
    %c0_7 = arith.constant 0 : index
    %4 = vector.load %arg7[%c0_5, %c0_6, %c0_7] : memref<18x18x8xf32, #tpu.memory_space<vmem>>, vector<18x1x8xf32>
    tpu.vector_store %arg7[%c0_5, %c0_6, %c0_7], %1 {strides = array<i32>} : memref<18x18x8xf32, #tpu.memory_space<vmem>>, vector<18x1x8xf32>,
    %c0_8 = arith.constant 0 : index
    %c17_9 = arith.constant 17 : index
    %c0_10 = arith.constant 0 : index
    %5 = vector.load %arg7[%c0_8, %c17_9, %c0_10] : memref<18x18x8xf32, #tpu.memory_space<vmem>>, vector<18x1x8xf32>
    tpu.vector_store %arg7[%c0_8, %c17_9, %c0_10], %1 {strides = array<i32>} : memref<18x18x8xf32, #tpu.memory_space<vmem>>, vector<18x1x8xf32>,
    %c0_11 = arith.constant 0 : index
    %c0_12 = arith.constant 0 : index
    %c0_13 = arith.constant 0 : index
    %c0_14 = arith.constant 0 : index
    %6 = vector.load %arg1[%c0_11, %c0_12, %c0_13, %c0_14] : memref<1x16x16x4xf32, #tpu.memory_space<vmem>>, vector<1x16x16x4xf32>
    %7 = vector.shape_cast %6 : vector<1x16x16x4xf32> to vector<16x16x4xf32>
    %c1 = arith.constant 1 : index
    %c1_15 = arith.constant 1 : index
    %c0_16 = arith.constant 0 : index
    %8 = vector.load %arg7[%c1, %c1_15, %c0_16] : memref<18x18x8xf32, #tpu.memory_space<vmem>>, vector<16x16x4xf32>
    tpu.vector_store %arg7[%c1, %c1_15, %c0_16], %7 {strides = array<i32>} : memref<18x18x8xf32, #tpu.memory_space<vmem>>, vector<16x16x4xf32>,
    %cst_17 = arith.constant 0.000000e+00 : f32
    %9 = vector.broadcast %cst_17 : f32 to vector<256x8xf32>
    %c0_18 = arith.constant 0 : index
    %c0_19 = arith.constant 0 : index
    %c0_20 = arith.constant 0 : index
    %10 = vector.load %arg7[%c0_18, %c0_19, %c0_20] : memref<18x18x8xf32, #tpu.memory_space<vmem>>, vector<16x16x4xf32>
    %11 = vector.shape_cast %10 : vector<16x16x4xf32> to vector<256x4xf32>
    %c0_21 = arith.constant 0 : index
    %c0_22 = arith.constant 0 : index
    %c0_23 = arith.constant 0 : index
    %12 = vector.load %arg2[%c0_21, %c0_22, %c0_23] : memref<9x4x8xf32, #tpu.memory_space<vmem>>, vector<1x4x8xf32>
    %13 = vector.shape_cast %12 : vector<1x4x8xf32> to vector<4x8xf32>
    %cst_24 = arith.constant dense<0.000000e+00> : vector<256x8xf32>
    %14 = tpu.matmul %11, %13, %cst_24 {dimension_numbers = #tpu.dot_dimension_numbers<[1], [0], [0], [1], [0, 0, 1, 1], [], []>} : vector<256x4xf32>, vector<4x8xf32>, vector<256x8xf32> -> vector<256x8xf32>
    %15 = arith.addf %9, %14 : vector<256x8xf32>
    %c0_25 = arith.constant 0 : index
    %c1_26 = arith.constant 1 : index
    %c0_27 = arith.constant 0 : index
    %16 = vector.load %arg7[%c0_25, %c1_26, %c0_27] : memref<18x18x8xf32, #tpu.memory_space<vmem>>, vector<16x16x4xf32>
    %17 = vector.shape_cast %16 : vector<16x16x4xf32> to vector<256x4xf32>
    %c1_28 = arith.constant 1 : index
    %c0_29 = arith.constant 0 : index
    %c0_30 = arith.constant 0 : index
    %18 = vector.load %arg2[%c1_28, %c0_29, %c0_30] : memref<9x4x8xf32, #tpu.memory_space<vmem>>, vector<1x4x8xf32>
    %19 = vector.shape_cast %18 : vector<1x4x8xf32> to vector<4x8xf32>
    %cst_31 = arith.constant dense<0.000000e+00> : vector<256x8xf32>
    %20 = tpu.matmul %17, %19, %cst_31 {dimension_numbers = #tpu.dot_dimension_numbers<[1], [0], [0], [1], [0, 0, 1, 1], [], []>} : vector<256x4xf32>, vector<4x8xf32>, vector<256x8xf32> -> vector<256x8xf32>
    %21 = arith.addf %15, %20 : vector<256x8xf32>
    %c0_32 = arith.constant 0 : index
    %c2 = arith.constant 2 : index
    %c0_33 = arith.constant 0 : index
    %22 = vector.load %arg7[%c0_32, %c2, %c0_33] : memref<18x18x8xf32, #tpu.memory_space<vmem>>, vector<16x16x4xf32>
    %23 = vector.shape_cast %22 : vector<16x16x4xf32> to vector<256x4xf32>
    %c2_34 = arith.constant 2 : index
    %c0_35 = arith.constant 0 : index
    %c0_36 = arith.constant 0 : index
    %24 = vector.load %arg2[%c2_34, %c0_35, %c0_36] : memref<9x4x8xf32, #tpu.memory_space<vmem>>, vector<1x4x8xf32>
    %25 = vector.shape_cast %24 : vector<1x4x8xf32> to vector<4x8xf32>
    %cst_37 = arith.constant dense<0.000000e+00> : vector<256x8xf32>
    %26 = tpu.matmul %23, %25, %cst_37 {dimension_numbers = #tpu.dot_dimension_numbers<[1], [0], [0], [1], [0, 0, 1, 1], [], []>} : vector<256x4xf32>, vector<4x8xf32>, vector<256x8xf32> -> vector<256x8xf32>
    %27 = arith.addf %21, %26 : vector<256x8xf32>
    %c1_38 = arith.constant 1 : index
    %c0_39 = arith.constant 0 : index
    %c0_40 = arith.constant 0 : index
    %28 = vector.load %arg7[%c1_38, %c0_39, %c0_40] : memref<18x18x8xf32, #tpu.memory_space<vmem>>, vector<16x16x4xf32>
    %29 = vector.shape_cast %28 : vector<16x16x4xf32> to vector<256x4xf32>
    %c3 = arith.constant 3 : index
    %c0_41 = arith.constant 0 : index
    %c0_42 = arith.constant 0 : index
    %30 = vector.load %arg2[%c3, %c0_41, %c0_42] : memref<9x4x8xf32, #tpu.memory_space<vmem>>, vector<1x4x8xf32>
    %31 = vector.shape_cast %30 : vector<1x4x8xf32> to vector<4x8xf32>
    %cst_43 = arith.constant dense<0.000000e+00> : vector<256x8xf32>
    %32 = tpu.matmul %29, %31, %cst_43 {dimension_numbers = #tpu.dot_dimension_numbers<[1], [0], [0], [1], [0, 0, 1, 1], [], []>} : vector<256x4xf32>, vector<4x8xf32>, vector<256x8xf32> -> vector<256x8xf32>
    %33 = arith.addf %27, %32 : vector<256x8xf32>
    %c1_44 = arith.constant 1 : index
    %c1_45 = arith.constant 1 : index
    %c0_46 = arith.constant 0 : index
    %34 = vector.load %arg7[%c1_44, %c1_45, %c0_46] : memref<18x18x8xf32, #tpu.memory_space<vmem>>, vector<16x16x4xf32>
    %35 = vector.shape_cast %34 : vector<16x16x4xf32> to vector<256x4xf32>
    %c4 = arith.constant 4 : index
    %c0_47 = arith.constant 0 : index
    %c0_48 = arith.constant 0 : index
    %36 = vector.load %arg2[%c4, %c0_47, %c0_48] : memref<9x4x8xf32, #tpu.memory_space<vmem>>, vector<1x4x8xf32>
    %37 = vector.shape_cast %36 : vector<1x4x8xf32> to vector<4x8xf32>
    %cst_49 = arith.constant dense<0.000000e+00> : vector<256x8xf32>
    %38 = tpu.matmul %35, %37, %cst_49 {dimension_numbers = #tpu.dot_dimension_numbers<[1], [0], [0], [1], [0, 0, 1, 1], [], []>} : vector<256x4xf32>, vector<4x8xf32>, vector<256x8xf32> -> vector<256x8xf32>
    %39 = arith.addf %33, %38 : vector<256x8xf32>
    %c1_50 = arith.constant 1 : index
    %c2_51 = arith.constant 2 : index
    %c0_52 = arith.constant 0 : index
    %40 = vector.load %arg7[%c1_50, %c2_51, %c0_52] : memref<18x18x8xf32, #tpu.memory_space<vmem>>, vector<16x16x4xf32>
    %41 = vector.shape_cast %40 : vector<16x16x4xf32> to vector<256x4xf32>
    %c5 = arith.constant 5 : index
    %c0_53 = arith.constant 0 : index
    %c0_54 = arith.constant 0 : index
    %42 = vector.load %arg2[%c5, %c0_53, %c0_54] : memref<9x4x8xf32, #tpu.memory_space<vmem>>, vector<1x4x8xf32>
    %43 = vector.shape_cast %42 : vector<1x4x8xf32> to vector<4x8xf32>
    %cst_55 = arith.constant dense<0.000000e+00> : vector<256x8xf32>
    %44 = tpu.matmul %41, %43, %cst_55 {dimension_numbers = #tpu.dot_dimension_numbers<[1], [0], [0], [1], [0, 0, 1, 1], [], []>} : vector<256x4xf32>, vector<4x8xf32>, vector<256x8xf32> -> vector<256x8xf32>
    %45 = arith.addf %39, %44 : vector<256x8xf32>
    %c2_56 = arith.constant 2 : index
    %c0_57 = arith.constant 0 : index
    %c0_58 = arith.constant 0 : index
    %46 = vector.load %arg7[%c2_56, %c0_57, %c0_58] : memref<18x18x8xf32, #tpu.memory_space<vmem>>, vector<16x16x4xf32>
    %47 = vector.shape_cast %46 : vector<16x16x4xf32> to vector<256x4xf32>
    %c6 = arith.constant 6 : index
    %c0_59 = arith.constant 0 : index
    %c0_60 = arith.constant 0 : index
    %48 = vector.load %arg2[%c6, %c0_59, %c0_60] : memref<9x4x8xf32, #tpu.memory_space<vmem>>, vector<1x4x8xf32>
    %49 = vector.shape_cast %48 : vector<1x4x8xf32> to vector<4x8xf32>
    %cst_61 = arith.constant dense<0.000000e+00> : vector<256x8xf32>
    %50 = tpu.matmul %47, %49, %cst_61 {dimension_numbers = #tpu.dot_dimension_numbers<[1], [0], [0], [1], [0, 0, 1, 1], [], []>} : vector<256x4xf32>, vector<4x8xf32>, vector<256x8xf32> -> vector<256x8xf32>
    %51 = arith.addf %45, %50 : vector<256x8xf32>
    %c2_62 = arith.constant 2 : index
    %c1_63 = arith.constant 1 : index
    %c0_64 = arith.constant 0 : index
    %52 = vector.load %arg7[%c2_62, %c1_63, %c0_64] : memref<18x18x8xf32, #tpu.memory_space<vmem>>, vector<16x16x4xf32>
    %53 = vector.shape_cast %52 : vector<16x16x4xf32> to vector<256x4xf32>
    %c7 = arith.constant 7 : index
    %c0_65 = arith.constant 0 : index
    %c0_66 = arith.constant 0 : index
    %54 = vector.load %arg2[%c7, %c0_65, %c0_66] : memref<9x4x8xf32, #tpu.memory_space<vmem>>, vector<1x4x8xf32>
    %55 = vector.shape_cast %54 : vector<1x4x8xf32> to vector<4x8xf32>
    %cst_67 = arith.constant dense<0.000000e+00> : vector<256x8xf32>
    %56 = tpu.matmul %53, %55, %cst_67 {dimension_numbers = #tpu.dot_dimension_numbers<[1], [0], [0], [1], [0, 0, 1, 1], [], []>} : vector<256x4xf32>, vector<4x8xf32>, vector<256x8xf32> -> vector<256x8xf32>
    %57 = arith.addf %51, %56 : vector<256x8xf32>
    %c2_68 = arith.constant 2 : index
    %c2_69 = arith.constant 2 : index
    %c0_70 = arith.constant 0 : index
    %58 = vector.load %arg7[%c2_68, %c2_69, %c0_70] : memref<18x18x8xf32, #tpu.memory_space<vmem>>, vector<16x16x4xf32>
    %59 = vector.shape_cast %58 : vector<16x16x4xf32> to vector<256x4xf32>
    %c8 = arith.constant 8 : index
    %c0_71 = arith.constant 0 : index
    %c0_72 = arith.constant 0 : index
    %60 = vector.load %arg2[%c8, %c0_71, %c0_72] : memref<9x4x8xf32, #tpu.memory_space<vmem>>, vector<1x4x8xf32>
    %61 = vector.shape_cast %60 : vector<1x4x8xf32> to vector<4x8xf32>
    %cst_73 = arith.constant dense<0.000000e+00> : vector<256x8xf32>
    %62 = tpu.matmul %59, %61, %cst_73 {dimension_numbers = #tpu.dot_dimension_numbers<[1], [0], [0], [1], [0, 0, 1, 1], [], []>} : vector<256x4xf32>, vector<4x8xf32>, vector<256x8xf32> -> vector<256x8xf32>
    %63 = arith.addf %57, %62 : vector<256x8xf32>
    %c0_74 = arith.constant 0 : index
    %c0_75 = arith.constant 0 : index
    %64 = vector.load %arg3[%c0_74, %c0_75] : memref<1x8xf32, #tpu.memory_space<vmem>>, vector<1x8xf32>
    %65 = vector.broadcast %64 : vector<1x8xf32> to vector<256x8xf32>
    %66 = arith.addf %63, %65 : vector<256x8xf32>
    %cst_76 = arith.constant 0.000000e+00 : f32
    %67 = vector.broadcast %cst_76 : f32 to vector<256x8xf32>
    %68 = arith.maximumf %66, %67 : vector<256x8xf32>
    %69 = vector.shape_cast %68 : vector<256x8xf32> to vector<16x16x8xf32>
    %c1_77 = arith.constant 1 : index
    %c1_78 = arith.constant 1 : index
    %c0_79 = arith.constant 0 : index
    %70 = vector.load %arg7[%c1_77, %c1_78, %c0_79] : memref<18x18x8xf32, #tpu.memory_space<vmem>>, vector<16x16x8xf32>
    tpu.vector_store %arg7[%c1_77, %c1_78, %c0_79], %69 {strides = array<i32>} : memref<18x18x8xf32, #tpu.memory_space<vmem>>, vector<16x16x8xf32>,
    %cst_80 = arith.constant 0.000000e+00 : f32
    %71 = vector.broadcast %cst_80 : f32 to vector<256x8xf32>
    %c0_81 = arith.constant 0 : index
    %c0_82 = arith.constant 0 : index
    %c0_83 = arith.constant 0 : index
    %72 = vector.load %arg7[%c0_81, %c0_82, %c0_83] : memref<18x18x8xf32, #tpu.memory_space<vmem>>, vector<16x16x8xf32>
    %73 = vector.shape_cast %72 : vector<16x16x8xf32> to vector<256x8xf32>
    %c0_84 = arith.constant 0 : index
    %c0_85 = arith.constant 0 : index
    %c0_86 = arith.constant 0 : index
    %74 = vector.load %arg4[%c0_84, %c0_85, %c0_86] : memref<9x8x8xf32, #tpu.memory_space<vmem>>, vector<1x8x8xf32>
    %75 = vector.shape_cast %74 : vector<1x8x8xf32> to vector<8x8xf32>
    %cst_87 = arith.constant dense<0.000000e+00> : vector<256x8xf32>
    %76 = tpu.matmul %73, %75, %cst_87 {dimension_numbers = #tpu.dot_dimension_numbers<[1], [0], [0], [1], [0, 0, 1, 1], [], []>} : vector<256x8xf32>, vector<8x8xf32>, vector<256x8xf32> -> vector<256x8xf32>
    %77 = arith.addf %71, %76 : vector<256x8xf32>
    %c0_88 = arith.constant 0 : index
    %c1_89 = arith.constant 1 : index
    %c0_90 = arith.constant 0 : index
    %78 = vector.load %arg7[%c0_88, %c1_89, %c0_90] : memref<18x18x8xf32, #tpu.memory_space<vmem>>, vector<16x16x8xf32>
    %79 = vector.shape_cast %78 : vector<16x16x8xf32> to vector<256x8xf32>
    %c1_91 = arith.constant 1 : index
    %c0_92 = arith.constant 0 : index
    %c0_93 = arith.constant 0 : index
    %80 = vector.load %arg4[%c1_91, %c0_92, %c0_93] : memref<9x8x8xf32, #tpu.memory_space<vmem>>, vector<1x8x8xf32>
    %81 = vector.shape_cast %80 : vector<1x8x8xf32> to vector<8x8xf32>
    %cst_94 = arith.constant dense<0.000000e+00> : vector<256x8xf32>
    %82 = tpu.matmul %79, %81, %cst_94 {dimension_numbers = #tpu.dot_dimension_numbers<[1], [0], [0], [1], [0, 0, 1, 1], [], []>} : vector<256x8xf32>, vector<8x8xf32>, vector<256x8xf32> -> vector<256x8xf32>
    %83 = arith.addf %77, %82 : vector<256x8xf32>
    %c0_95 = arith.constant 0 : index
    %c2_96 = arith.constant 2 : index
    %c0_97 = arith.constant 0 : index
    %84 = vector.load %arg7[%c0_95, %c2_96, %c0_97] : memref<18x18x8xf32, #tpu.memory_space<vmem>>, vector<16x16x8xf32>
    %85 = vector.shape_cast %84 : vector<16x16x8xf32> to vector<256x8xf32>
    %c2_98 = arith.constant 2 : index
    %c0_99 = arith.constant 0 : index
    %c0_100 = arith.constant 0 : index
    %86 = vector.load %arg4[%c2_98, %c0_99, %c0_100] : memref<9x8x8xf32, #tpu.memory_space<vmem>>, vector<1x8x8xf32>
    %87 = vector.shape_cast %86 : vector<1x8x8xf32> to vector<8x8xf32>
    %cst_101 = arith.constant dense<0.000000e+00> : vector<256x8xf32>
    %88 = tpu.matmul %85, %87, %cst_101 {dimension_numbers = #tpu.dot_dimension_numbers<[1], [0], [0], [1], [0, 0, 1, 1], [], []>} : vector<256x8xf32>, vector<8x8xf32>, vector<256x8xf32> -> vector<256x8xf32>
    %89 = arith.addf %83, %88 : vector<256x8xf32>
    %c1_102 = arith.constant 1 : index
    %c0_103 = arith.constant 0 : index
    %c0_104 = arith.constant 0 : index
    %90 = vector.load %arg7[%c1_102, %c0_103, %c0_104] : memref<18x18x8xf32, #tpu.memory_space<vmem>>, vector<16x16x8xf32>
    %91 = vector.shape_cast %90 : vector<16x16x8xf32> to vector<256x8xf32>
    %c3_105 = arith.constant 3 : index
    %c0_106 = arith.constant 0 : index
    %c0_107 = arith.constant 0 : index
    %92 = vector.load %arg4[%c3_105, %c0_106, %c0_107] : memref<9x8x8xf32, #tpu.memory_space<vmem>>, vector<1x8x8xf32>
    %93 = vector.shape_cast %92 : vector<1x8x8xf32> to vector<8x8xf32>
    %cst_108 = arith.constant dense<0.000000e+00> : vector<256x8xf32>
    %94 = tpu.matmul %91, %93, %cst_108 {dimension_numbers = #tpu.dot_dimension_numbers<[1], [0], [0], [1], [0, 0, 1, 1], [], []>} : vector<256x8xf32>, vector<8x8xf32>, vector<256x8xf32> -> vector<256x8xf32>
    %95 = arith.addf %89, %94 : vector<256x8xf32>
    %c1_109 = arith.constant 1 : index
    %c1_110 = arith.constant 1 : index
    %c0_111 = arith.constant 0 : index
    %96 = vector.load %arg7[%c1_109, %c1_110, %c0_111] : memref<18x18x8xf32, #tpu.memory_space<vmem>>, vector<16x16x8xf32>
    %97 = vector.shape_cast %96 : vector<16x16x8xf32> to vector<256x8xf32>
    %c4_112 = arith.constant 4 : index
    %c0_113 = arith.constant 0 : index
    %c0_114 = arith.constant 0 : index
    %98 = vector.load %arg4[%c4_112, %c0_113, %c0_114] : memref<9x8x8xf32, #tpu.memory_space<vmem>>, vector<1x8x8xf32>
    %99 = vector.shape_cast %98 : vector<1x8x8xf32> to vector<8x8xf32>
    %cst_115 = arith.constant dense<0.000000e+00> : vector<256x8xf32>
    %100 = tpu.matmul %97, %99, %cst_115 {dimension_numbers = #tpu.dot_dimension_numbers<[1], [0], [0], [1], [0, 0, 1, 1], [], []>} : vector<256x8xf32>, vector<8x8xf32>, vector<256x8xf32> -> vector<256x8xf32>
    %101 = arith.addf %95, %100 : vector<256x8xf32>
    %c1_116 = arith.constant 1 : index
    %c2_117 = arith.constant 2 : index
    %c0_118 = arith.constant 0 : index
    %102 = vector.load %arg7[%c1_116, %c2_117, %c0_118] : memref<18x18x8xf32, #tpu.memory_space<vmem>>, vector<16x16x8xf32>
    %103 = vector.shape_cast %102 : vector<16x16x8xf32> to vector<256x8xf32>
    %c5_119 = arith.constant 5 : index
    %c0_120 = arith.constant 0 : index
    %c0_121 = arith.constant 0 : index
    %104 = vector.load %arg4[%c5_119, %c0_120, %c0_121] : memref<9x8x8xf32, #tpu.memory_space<vmem>>, vector<1x8x8xf32>
    %105 = vector.shape_cast %104 : vector<1x8x8xf32> to vector<8x8xf32>
    %cst_122 = arith.constant dense<0.000000e+00> : vector<256x8xf32>
    %106 = tpu.matmul %103, %105, %cst_122 {dimension_numbers = #tpu.dot_dimension_numbers<[1], [0], [0], [1], [0, 0, 1, 1], [], []>} : vector<256x8xf32>, vector<8x8xf32>, vector<256x8xf32> -> vector<256x8xf32>
    %107 = arith.addf %101, %106 : vector<256x8xf32>
    %c2_123 = arith.constant 2 : index
    %c0_124 = arith.constant 0 : index
    %c0_125 = arith.constant 0 : index
    %108 = vector.load %arg7[%c2_123, %c0_124, %c0_125] : memref<18x18x8xf32, #tpu.memory_space<vmem>>, vector<16x16x8xf32>
    %109 = vector.shape_cast %108 : vector<16x16x8xf32> to vector<256x8xf32>
    %c6_126 = arith.constant 6 : index
    %c0_127 = arith.constant 0 : index
    %c0_128 = arith.constant 0 : index
    %110 = vector.load %arg4[%c6_126, %c0_127, %c0_128] : memref<9x8x8xf32, #tpu.memory_space<vmem>>, vector<1x8x8xf32>
    %111 = vector.shape_cast %110 : vector<1x8x8xf32> to vector<8x8xf32>
    %cst_129 = arith.constant dense<0.000000e+00> : vector<256x8xf32>
    %112 = tpu.matmul %109, %111, %cst_129 {dimension_numbers = #tpu.dot_dimension_numbers<[1], [0], [0], [1], [0, 0, 1, 1], [], []>} : vector<256x8xf32>, vector<8x8xf32>, vector<256x8xf32> -> vector<256x8xf32>
    %113 = arith.addf %107, %112 : vector<256x8xf32>
    %c2_130 = arith.constant 2 : index
    %c1_131 = arith.constant 1 : index
    %c0_132 = arith.constant 0 : index
    %114 = vector.load %arg7[%c2_130, %c1_131, %c0_132] : memref<18x18x8xf32, #tpu.memory_space<vmem>>, vector<16x16x8xf32>
    %115 = vector.shape_cast %114 : vector<16x16x8xf32> to vector<256x8xf32>
    %c7_133 = arith.constant 7 : index
    %c0_134 = arith.constant 0 : index
    %c0_135 = arith.constant 0 : index
    %116 = vector.load %arg4[%c7_133, %c0_134, %c0_135] : memref<9x8x8xf32, #tpu.memory_space<vmem>>, vector<1x8x8xf32>
    %117 = vector.shape_cast %116 : vector<1x8x8xf32> to vector<8x8xf32>
    %cst_136 = arith.constant dense<0.000000e+00> : vector<256x8xf32>
    %118 = tpu.matmul %115, %117, %cst_136 {dimension_numbers = #tpu.dot_dimension_numbers<[1], [0], [0], [1], [0, 0, 1, 1], [], []>} : vector<256x8xf32>, vector<8x8xf32>, vector<256x8xf32> -> vector<256x8xf32>
    %119 = arith.addf %113, %118 : vector<256x8xf32>
    %c2_137 = arith.constant 2 : index
    %c2_138 = arith.constant 2 : index
    %c0_139 = arith.constant 0 : index
    %120 = vector.load %arg7[%c2_137, %c2_138, %c0_139] : memref<18x18x8xf32, #tpu.memory_space<vmem>>, vector<16x16x8xf32>
    %121 = vector.shape_cast %120 : vector<16x16x8xf32> to vector<256x8xf32>
    %c8_140 = arith.constant 8 : index
    %c0_141 = arith.constant 0 : index
    %c0_142 = arith.constant 0 : index
    %122 = vector.load %arg4[%c8_140, %c0_141, %c0_142] : memref<9x8x8xf32, #tpu.memory_space<vmem>>, vector<1x8x8xf32>
    %123 = vector.shape_cast %122 : vector<1x8x8xf32> to vector<8x8xf32>
    %cst_143 = arith.constant dense<0.000000e+00> : vector<256x8xf32>
    %124 = tpu.matmul %121, %123, %cst_143 {dimension_numbers = #tpu.dot_dimension_numbers<[1], [0], [0], [1], [0, 0, 1, 1], [], []>} : vector<256x8xf32>, vector<8x8xf32>, vector<256x8xf32> -> vector<256x8xf32>
    %125 = arith.addf %119, %124 : vector<256x8xf32>
    %c0_144 = arith.constant 0 : index
    %c0_145 = arith.constant 0 : index
    %126 = vector.load %arg5[%c0_144, %c0_145] : memref<1x8xf32, #tpu.memory_space<vmem>>, vector<1x8xf32>
    %127 = vector.broadcast %126 : vector<1x8xf32> to vector<256x8xf32>
    %128 = arith.addf %125, %127 : vector<256x8xf32>
    %cst_146 = arith.constant 0.000000e+00 : f32
    %129 = vector.broadcast %cst_146 : f32 to vector<256x8xf32>
    %130 = arith.maximumf %128, %129 : vector<256x8xf32>
    %131 = vector.shape_cast %130 : vector<256x8xf32> to vector<16x16x8xf32>
    %132 = vector.shape_cast %131 : vector<16x16x8xf32> to vector<128x2x8xf32>
    %133 = vector.extract_strided_slice %132 {offsets = [0, 0, 0], sizes = [128, 1, 8], strides = [1, 1, 1]} : vector<128x2x8xf32> to vector<128x1x8xf32>
    %134 = vector.shape_cast %133 : vector<128x1x8xf32> to vector<128x8xf32>
    %135 = vector.extract_strided_slice %132 {offsets = [0, 1, 0], sizes = [128, 1, 8], strides = [1, 1, 1]} : vector<128x2x8xf32> to vector<128x1x8xf32>
    %136 = vector.shape_cast %135 : vector<128x1x8xf32> to vector<128x8xf32>
    %137 = arith.maximumf %134, %136 : vector<128x8xf32>
    %138 = vector.shape_cast %137 : vector<128x8xf32> to vector<8x2x8x8xf32>
    %139 = vector.extract_strided_slice %138 {offsets = [0, 0, 0, 0], sizes = [8, 1, 8, 8], strides = [1, 1, 1, 1]} : vector<8x2x8x8xf32> to vector<8x1x8x8xf32>
    %140 = vector.shape_cast %139 : vector<8x1x8x8xf32> to vector<8x8x8xf32>
    %141 = vector.extract_strided_slice %138 {offsets = [0, 1, 0, 0], sizes = [8, 1, 8, 8], strides = [1, 1, 1, 1]} : vector<8x2x8x8xf32> to vector<8x1x8x8xf32>
    %142 = vector.shape_cast %141 : vector<8x1x8x8xf32> to vector<8x8x8xf32>
    %143 = arith.maximumf %140, %142 : vector<8x8x8xf32>
    %144 = vector.shape_cast %143 : vector<8x8x8xf32> to vector<8x64xf32>
    %c0_147 = arith.constant 0 : index
    %c0_148 = arith.constant 0 : index
    %c0_149 = arith.constant 0 : index
    %145 = vector.load %arg6[%c0_147, %c0_148, %c0_149] : memref<1x8x64xf32, #tpu.memory_space<vmem>>, vector<1x8x64xf32>
    %146 = vector.shape_cast %145 : vector<1x8x64xf32> to vector<8x64xf32>
    %147 = vector.shape_cast %144 : vector<8x64xf32> to vector<1x8x64xf32>
    tpu.vector_store %arg6[%c0_147, %c0_148, %c0_149], %147 {strides = array<i32>} : memref<1x8x64xf32, #tpu.memory_space<vmem>>, vector<1x8x64xf32>,
    return
  }
  func.func @transform_0(%arg0: i32) -> (i32, i32, i32, i32) {
    %c0_i32 = arith.constant 0 : i32
    %c0_i32_0 = arith.constant 0 : i32
    %c0_i32_1 = arith.constant 0 : i32
    %c0_i32_2 = arith.constant 0 : i32
    return %arg0, %c0_i32, %c0_i32_0, %c0_i32_1 : i32, i32, i32, i32
  }
  func.func @transform_1(%arg0: i32) -> (i32, i32, i32) {
    %c0_i32 = arith.constant 0 : i32
    %c0_i32_0 = arith.constant 0 : i32
    %c0_i32_1 = arith.constant 0 : i32
    %c0_i32_2 = arith.constant 0 : i32
    return %c0_i32, %c0_i32_0, %c0_i32_1 : i32, i32, i32
  }
  func.func @transform_2(%arg0: i32) -> (i32, i32) {
    %c0_i32 = arith.constant 0 : i32
    %c0_i32_0 = arith.constant 0 : i32
    %c0_i32_1 = arith.constant 0 : i32
    return %c0_i32, %c0_i32_0 : i32, i32
  }
  func.func @transform_3(%arg0: i32) -> (i32, i32, i32) {
    %c0_i32 = arith.constant 0 : i32
    %c0_i32_0 = arith.constant 0 : i32
    %c0_i32_1 = arith.constant 0 : i32
    %c0_i32_2 = arith.constant 0 : i32
    return %c0_i32, %c0_i32_0, %c0_i32_1 : i32, i32, i32
  }
  func.func @transform_4(%arg0: i32) -> (i32, i32) {
    %c0_i32 = arith.constant 0 : i32
    %c0_i32_0 = arith.constant 0 : i32
    %c0_i32_1 = arith.constant 0 : i32
    return %c0_i32, %c0_i32_0 : i32, i32
  }
  func.func @transform_5(%arg0: i32) -> (i32, i32, i32) {
    %c0_i32 = arith.constant 0 : i32
    %c0_i32_0 = arith.constant 0 : i32
    %c0_i32_1 = arith.constant 0 : i32
    return %arg0, %c0_i32, %c0_i32_0 : i32, i32, i32
  }
}

</mosaic_0001>

<bundles_post_ra>
// kernel: vgg_block_forward.1
= control target key start
LH: loop header
LB: loop body
LE: loop exit
PB: predicated region body
PF: predicated region fallthrough
CT: control target
= control target key end

     0   :  { %s12205_s18 = smov 0   ;;  %s14737_s0 = inlined_call_operand.vmem [shape: f32[2,16,16,4], index: 0, kind: input, shape index: {}]   ;;  %s14738_s1 = inlined_call_operand.vmem [shape: f32[9,4,8], index: 1, kind: input, shape index: {}]   ;;  %s14739_s2 = inlined_call_operand.vmem [shape: f32[1,8], index: 2, kind: input, shape index: {}]   ;;  %s14740_s3 = inlined_call_operand.vmem [shape: f32[9,8,8], index: 3, kind: input, shape index: {}]   ;;  %s14741_s4 = inlined_call_operand.vmem [shape: f32[1,8], index: 4, kind: input, shape index: {}]   ;;  %s14742_s5 = inlined_call_operand.vmem [shape: f32[2,8,64], index: 5, kind: output, shape index: {}]  }
   0x1 LB: > { %s9382_s19 = sadd.s32 4294967295, %s12163_s18   ;;  %p9386_p0 = scmp.ge.s32.totalorder %s12163_s18, 1  ;;  %s12163_s18 = sphi %s12205_s18, %s15_s18  }
   0x2   : > { %p187_p1 = scmp.lt.s32.totalorder %s12163_s18, 3 }
   0x4   : > { %p188_p2 = pnand %p9386_p0, %p187_p1 }
   0x6   : > { %191 = sbr.rel (%p188_p2) target bundleno = 1819 (0x71b), region = 40 }
   0xd   : > { %v9390_v0 = vld [vmem:[%s14738_s1 + $0x4] sm:$0xf]  ;;  %vm498_vm0 = vcmask 1043456   ;;  %vm223_vm1 = vcmask 64512   ;;  %v12165_v1 = vmov 0.0   ;;  %vm226_vm2 = vcmask 58368  }
   0xe   : > { %10726 = vmatprep.subr.msk.mxu0 %vm498_vm0, %v9390_v0  ;;  %224 = vst.msk [vmem:[#allocation2] sm:$0xff] %vm223_vm1, %v12165_v1  ;;  %225 = vst.msk [vmem:[#allocation2 + $0x8] sm:$0xff] %vm223_vm1, %v12165_v1  ;;  %v12224_v2 = vld [vmem:[%s14738_s1] sm:$0xf]  ;;  %p12228_p3 = scmp.lt.s32.totalorder %s9382_s19, 1  ;;  %vm232_vm3 = vcmask 57344  }
   0xf   : > { %229 = vst.msk [vmem:[#allocation2 + $0x198] sm:$0xff] %vm223_vm1, %v12165_v1  ;;  %230 = vst.msk [vmem:[#allocation2 + $0x1a0] sm:$0xff] %vm223_vm1, %v12165_v1  ;;  %10727 = vmatpush3.msk.msra.mxu0 %vm498_vm0, %v9390_v0  ;;  %vm302_vm4 = vcmask 31744   ;;  %v12289_v6 = vld [vmem:[%s14738_s1 + $0x8] sm:$0xf]  ;;  %vm8723_vm5 = vcmask 1041409  }
  0x10   : > { %227 = vst.msk [vmem:[#allocation2 + $0x10] sm:$0x3] %vm226_vm2, %v12165_v1  ;;  %231 = vst.msk [vmem:[#allocation2 + $0x1a8] sm:$0x3] %vm226_vm2, %v12165_v1  ;;  %10776 = vmatprep.subr.msk.mxu0 %vm498_vm0, %v12224_v2  ;;  %s15084_s19 = smov (!%p12228_p3, %s9382_s19), 1  ;;  %vm8725_vm6 = vcmask 1043459  }
  0x11   : > { %233 = vst.msk [vmem:[#allocation2] sm:$0x1] %vm232_vm3, %v12165_v1  ;;  %234 = vst.msk [vmem:[#allocation2 + $0x18] sm:$0x1] %vm232_vm3, %v12165_v1  ;;  %s10131_s25 = sshll.u32 %s15084_s19, 8  ;;  %vm8727_vm7 = vcmask 1045509  }
  0x12   : > { %235 = vst.msk [vmem:[#allocation2 + $0x30] sm:$0x1] %vm232_vm3, %v12165_v1  ;;  %236 = vst.msk [vmem:[#allocation2 + $0x48] sm:$0x1] %vm232_vm3, %v12165_v1  ;;  %s12281_s28 = scalar_lea.vmem %s14737_s0, %s10131_s25  ;;  %vm8729_vm8 = vcmask 1047559   ;;  %s12168_s21 = smov 32  }
  0x13   : > { %237 = vst.msk [vmem:[#allocation2 + $0x60] sm:$0x1] %vm232_vm3, %v12165_v1  ;;  %238 = vst.msk [vmem:[#allocation2 + $0x78] sm:$0x1] %vm232_vm3, %v12165_v1  ;;  %v269_v3 = vld [vmem:[%s12281_s28] sm:$0xff]  ;;  %v270_v4 = vld [vmem:[%s12281_s28 + $0x8] sm:$0xff] }
  0x14   : > { %239 = vst.msk [vmem:[#allocation2 + $0x90] sm:$0x1] %vm232_vm3, %v12165_v1  ;;  %240 = vst.msk [vmem:[#allocation2 + $0xa8] sm:$0x1] %vm232_vm3, %v12165_v1  ;;  %v271_v5 = vld [vmem:[%s12281_s28 + $0x10] sm:$0xff]  ;;  %v272_v8 = vld [vmem:[%s12281_s28 + $0x18] sm:$0xff] }
  0x15   : > { %241 = vst.msk [vmem:[#allocation2 + $0xc0] sm:$0x1] %vm232_vm3, %v12165_v1  ;;  %242 = vst.msk [vmem:[#allocation2 + $0xd8] sm:$0x1] %vm232_vm3, %v12165_v1  ;;  %v368_v7 = vld [vmem:[#allocation2 + $0x1] sm:$0xff]  ;;  %v275_v12 = vld [vmem:[%s12281_s28 + $0x30] sm:$0xff] }
  0x16   : > { %243 = vst.msk [vmem:[#allocation2 + $0xf0] sm:$0x1] %vm232_vm3, %v12165_v1  ;;  %244 = vst.msk [vmem:[#allocation2 + $0x108] sm:$0x1] %vm232_vm3, %v12165_v1  ;;  %v273_v9 = vld [vmem:[%s12281_s28 + $0x20] sm:$0xff]  ;;  %10728 = vmatprep.mubr.msk.f32.mxu0 %vm302_vm4, %v368_v7  ;;  %v274_v11 = vld [vmem:[%s12281_s28 + $0x28] sm:$0xff] }
  0x17   : > { %245 = vst.msk [vmem:[#allocation2 + $0x120] sm:$0x1] %vm232_vm3, %v12165_v1  ;;  %246 = vst.msk [vmem:[#allocation2 + $0x138] sm:$0x1] %vm232_vm3, %v12165_v1  ;;  %v369_v10 = vld [vmem:[#allocation2 + $0x9] sm:$0xff]  ;;  %v276_v13 = vld [vmem:[%s12281_s28 + $0x38] sm:$0xff] }
  0x18   : > { %247 = vst.msk [vmem:[#allocation2 + $0x150] sm:$0x1] %vm232_vm3, %v12165_v1  ;;  %248 = vst.msk [vmem:[#allocation2 + $0x168] sm:$0x1] %vm232_vm3, %v12165_v1  ;;  %10729 = vmatmul.mubr.msk.f32.vlgmr.msra.gmra.mrb[0].mxu0 %vm302_vm4, %v369_v10  ;;  %v277_v14 = vld [vmem:[%s12281_s28 + $0x40] sm:$0xff]  ;;  %v278_v15 = vld [vmem:[%s12281_s28 + $0x48] sm:$0xff] }
  0x19   : > { %249 = vst.msk [vmem:[#allocation2 + $0x180] sm:$0x1] %vm232_vm3, %v12165_v1  ;;  %250 = vst.msk [vmem:[#allocation2 + $0x198] sm:$0x1] %vm232_vm3, %v12165_v1  ;;  %10777 = vmatpush3.msk.msra.mxu0 %vm498_vm0, %v12224_v2  ;;  %v279_v16 = vld [vmem:[%s12281_s28 + $0x50] sm:$0xff]  ;;  %v280_v17 = vld [vmem:[%s12281_s28 + $0x58] sm:$0xff] }
  0x1a   : > { %252 = vst.msk [vmem:[#allocation2 + $0x29] sm:$0x1] %vm232_vm3, %v12165_v1  ;;  %253 = vst.msk [vmem:[#allocation2 + $0x41] sm:$0x1] %vm232_vm3, %v12165_v1  ;;  %v281_v18 = vld [vmem:[%s12281_s28 + $0x60] sm:$0xff]  ;;  %v282_v19 = vld [vmem:[%s12281_s28 + $0x68] sm:$0xff]  ;;  %10826 = vmatprep.subr.msk.mxu0 %vm498_vm0, %v12289_v6 }
  0x1b   : > { %254 = vst.msk [vmem:[#allocation2 + $0x59] sm:$0x1] %vm232_vm3, %v12165_v1  ;;  %255 = vst.msk [vmem:[#allocation2 + $0x71] sm:$0x1] %vm232_vm3, %v12165_v1  ;;  %v283_v20 = vld [vmem:[%s12281_s28 + $0x70] sm:$0xff]  ;;  %v284_v21 = vld [vmem:[%s12281_s28 + $0x78] sm:$0xff] }
  0x1c   : > { %256 = vst.msk [vmem:[#allocation2 + $0x89] sm:$0x1] %vm232_vm3, %v12165_v1  ;;  %257 = vst.msk [vmem:[#allocation2 + $0xa1] sm:$0x1] %vm232_vm3, %v12165_v1  ;;  %v285_v22 = vld [vmem:[%s12281_s28 + $0x80] sm:$0xff]  ;;  %v286_v23 = vld [vmem:[%s12281_s28 + $0x88] sm:$0xff] }
  0x1d   : > { %258 = vst.msk [vmem:[#allocation2 + $0xb9] sm:$0x1] %vm232_vm3, %v12165_v1  ;;  %259 = vst.msk [vmem:[#allocation2 + $0xd1] sm:$0x1] %vm232_vm3, %v12165_v1  ;;  %v287_v24 = vld [vmem:[%s12281_s28 + $0x90] sm:$0xff]  ;;  %v288_v25 = vld [vmem:[%s12281_s28 + $0x98] sm:$0xff] }
  0x1e   : > { %260 = vst.msk [vmem:[#allocation2 + $0xe9] sm:$0x1] %vm232_vm3, %v12165_v1  ;;  %261 = vst.msk [vmem:[#allocation2 + $0x101] sm:$0x1] %vm232_vm3, %v12165_v1  ;;  %v289_v26 = vld [vmem:[%s12281_s28 + $0xa0] sm:$0xff]  ;;  %v290_v27 = vld [vmem:[%s12281_s28 + $0xa8] sm:$0xff] }
  0x1f   : > { %262 = vst.msk [vmem:[#allocation2 + $0x119] sm:$0x1] %vm232_vm3, %v12165_v1  ;;  %263 = vst.msk [vmem:[#allocation2 + $0x131] sm:$0x1] %vm232_vm3, %v12165_v1  ;;  %v291_v31 = vld [vmem:[%s12281_s28 + $0xb0] sm:$0xff]  ;;  %v292_v32 = vld [vmem:[%s12281_s28 + $0xb8] sm:$0xff] }
  0x20   : > { %264 = vst.msk [vmem:[#allocation2 + $0x149] sm:$0x1] %vm232_vm3, %v12165_v1  ;;  %265 = vst.msk [vmem:[#allocation2 + $0x161] sm:$0x1] %vm232_vm3, %v12165_v1  ;;  %v293_v37 = vld [vmem:[%s12281_s28 + $0xc0] sm:$0xff]  ;;  %v294_v38 = vld [vmem:[%s12281_s28 + $0xc8] sm:$0xff] }
  0x21   : > { %266 = vst.msk [vmem:[#allocation2 + $0x179] sm:$0x1] %vm232_vm3, %v12165_v1  ;;  %267 = vst.msk [vmem:[#allocation2 + $0x191] sm:$0x1] %vm232_vm3, %v12165_v1  ;;  %v295_v39 = vld [vmem:[%s12281_s28 + $0xd0] sm:$0xff]  ;;  %v296_v40 = vld [vmem:[%s12281_s28 + $0xd8] sm:$0xff] }
  0x22   : > { %251 = vst.msk [vmem:[#allocation2 + $0x11] sm:$0x1] %vm232_vm3, %v12165_v1  ;;  %268 = vst.msk [vmem:[#allocation2 + $0x1a9] sm:$0x1] %vm232_vm3, %v12165_v1  ;;  %v297_v41 = vld [vmem:[%s12281_s28 + $0xe0] sm:$0xff]  ;;  %v298_v42 = vld [vmem:[%s12281_s28 + $0xe8] sm:$0xff] }
  0x23   : > { %303 = vst.msk [vmem:[#allocation2 + $0x19] sm:$0xff] %vm302_vm4, %v269_v3  ;;  %304 = vst.msk [vmem:[#allocation2 + $0x21] sm:$0xff] %vm302_vm4, %v270_v4  ;;  %v335_v2 = vld [vmem:[#allocation2] sm:$0xff]  ;;  %v336_v3 = vld [vmem:[#allocation2 + $0x8] sm:$0xff]  ;;  %s12169_s22 = smov 8   ;;  %s12170_s23 = smov 24  }
  0x24   : > { %305 = vst.msk [vmem:[#allocation2 + $0x31] sm:$0xff] %vm302_vm4, %v271_v5  ;;  %306 = vst.msk [vmem:[#allocation2 + $0x39] sm:$0xff] %vm302_vm4, %v272_v8  ;;  %v12480_v5 = vld [vmem:[%s14738_s1 + $0xc] sm:$0xf]  ;;  %s12171_s24 = smov 16   ;;  %s12172_s25 = smov 40  }
  0x25   : > { %307 = vst.msk [vmem:[#allocation2 + $0x49] sm:$0xff] %vm302_vm4, %v273_v9  ;;  %308 = vst.msk [vmem:[#allocation2 + $0x51] sm:$0xff] %vm302_vm4, %v274_v11  ;;  %s12173_s26 = smov 48   ;;  %s12174_s27 = smov 56   ;;  %vm9315_vm9 = vcmask 130048   ;;  %vm9317_vm10 = vcmask 195584  }
  0x26   : > { %309 = vst.msk [vmem:[#allocation2 + $0x61] sm:$0xff] %vm302_vm4, %v275_v12  ;;  %310 = vst.msk [vmem:[#allocation2 + $0x69] sm:$0xff] %vm302_vm4, %v276_v13  ;;  %vm9319_vm11 = vcmask 261120   ;;  %vm9321_vm12 = vcmask 326656   ;;  %vm9323_vm13 = vcmask 392192   ;;  %vm9325_vm14 = vcmask 457728  }
  0x27   : > { %311 = vst.msk [vmem:[#allocation2 + $0x79] sm:$0xff] %vm302_vm4, %v277_v14  ;;  %312 = vst.msk [vmem:[#allocation2 + $0x81] sm:$0xff] %vm302_vm4, %v278_v15  ;;  %vm9327_vm15 = vcmask 523264  }
  0x28   : > { %313 = vst.msk [vmem:[#allocation2 + $0x91] sm:$0xff] %vm302_vm4, %v279_v16  ;;  %314 = vst.msk [vmem:[#allocation2 + $0x99] sm:$0xff] %vm302_vm4, %v280_v17 }
  0x29   : > { %315 = vst.msk [vmem:[#allocation2 + $0xa9] sm:$0xff] %vm302_vm4, %v281_v18  ;;  %316 = vst.msk [vmem:[#allocation2 + $0xb1] sm:$0xff] %vm302_vm4, %v282_v19 }
  0x2a   : > { %317 = vst.msk [vmem:[#allocation2 + $0xc1] sm:$0xff] %vm302_vm4, %v283_v20  ;;  %318 = vst.msk [vmem:[#allocation2 + $0xc9] sm:$0xff] %vm302_vm4, %v284_v21  ;;  %v12335_v28 = vld [vmem:[#allocation2 + $0x19] sm:$0xff]  ;;  %v12337_v29 = vld [vmem:[#allocation2 + $0x21] sm:$0xff] }
  0x2b   : > { %319 = vst.msk [vmem:[#allocation2 + $0xd9] sm:$0xff] %vm302_vm4, %v285_v22  ;;  %320 = vst.msk [vmem:[#allocation2 + $0xe1] sm:$0xff] %vm302_vm4, %v286_v23  ;;  %v12339_v30 = vld [vmem:[#allocation2 + $0x31] sm:$0xff]  ;;  %10731 = vmatprep.mubr.msk.f32.mxu0 %vm302_vm4, %v12335_v28  ;;  %v12353_v33 = vld [vmem:[#allocation2 + $0x39] sm:$0xff] }
  0x2c   : > { %321 = vst.msk [vmem:[#allocation2 + $0xf1] sm:$0xff] %vm302_vm4, %v287_v24  ;;  %322 = vst.msk [vmem:[#allocation2 + $0xf9] sm:$0xff] %vm302_vm4, %v288_v25  ;;  %10732 = vmatmul.mubr.msk.f32.gmra.mrb[2].mxu0 %vm302_vm4, %v12337_v29  ;;  %v12356_v34 = vld [vmem:[#allocation2 + $0x49] sm:$0xff]  ;;  %v12362_v35 = vld [vmem:[#allocation2 + $0x51] sm:$0xff] }
  0x2d   : > { %323 = vst.msk [vmem:[#allocation2 + $0x109] sm:$0xff] %vm302_vm4, %v289_v26  ;;  %324 = vst.msk [vmem:[#allocation2 + $0x111] sm:$0xff] %vm302_vm4, %v290_v27  ;;  %10734 = vmatprep.mubr.msk.f32.mxu0 %vm302_vm4, %v12339_v30  ;;  %v12364_v36 = vld [vmem:[#allocation2 + $0x61] sm:$0xff]  ;;  %v12381_v43 = vld [vmem:[#allocation2 + $0x69] sm:$0xff] }
  0x2e   : > { %325 = vst.msk [vmem:[#allocation2 + $0x121] sm:$0xff] %vm302_vm4, %v291_v31  ;;  %326 = vst.msk [vmem:[#allocation2 + $0x129] sm:$0xff] %vm302_vm4, %v292_v32  ;;  %v12384_v44 = vld [vmem:[#allocation2 + $0x79] sm:$0xff]  ;;  %v12390_v45 = vld [vmem:[#allocation2 + $0x81] sm:$0xff] }
  0x2f   : > { %327 = vst.msk [vmem:[#allocation2 + $0x139] sm:$0xff] %vm302_vm4, %v293_v37  ;;  %328 = vst.msk [vmem:[#allocation2 + $0x141] sm:$0xff] %vm302_vm4, %v294_v38  ;;  %v12392_v46 = vld [vmem:[#allocation2 + $0x91] sm:$0xff]  ;;  %v12398_v47 = vld [vmem:[#allocation2 + $0x99] sm:$0xff] }
  0x30   : > { %10735 = vmatmul.mubr.msk.f32.gmra.mrb[4].mxu0 %vm302_vm4, %v12353_v33  ;;  %329 = vst.msk [vmem:[#allocation2 + $0x151] sm:$0xff] %vm302_vm4, %v295_v39  ;;  %330 = vst.msk [vmem:[#allocation2 + $0x159] sm:$0xff] %vm302_vm4, %v296_v40  ;;  %v12400_v48 = vld [vmem:[#allocation2 + $0xa9] sm:$0xff]  ;;  %v12406_v49 = vld [vmem:[#allocation2 + $0xb1] sm:$0xff] }
  0x31   : > { %10737 = vmatprep.mubr.msk.f32.mxu0 %vm302_vm4, %v12356_v34  ;;  %331 = vst.msk [vmem:[#allocation2 + $0x169] sm:$0xff] %vm302_vm4, %v297_v41  ;;  %332 = vst.msk [vmem:[#allocation2 + $0x171] sm:$0xff] %vm302_vm4, %v298_v42  ;;  %v12408_v50 = vld [vmem:[#allocation2 + $0xc1] sm:$0xff]  ;;  %v12414_v51 = vld [vmem:[#allocation2 + $0xc9] sm:$0xff] }
  0x32   : > { %v12416_v52 = vld [vmem:[#allocation2 + $0xd9] sm:$0xff]  ;;  %v12422_v53 = vld [vmem:[#allocation2 + $0xe1] sm:$0xff]  ;;  %v12489_v8 = vld [vmem:[#allocation2 + $0x30] sm:$0xff] }
  0x33   : > { %v12424_v54 = vld [vmem:[#allocation2 + $0xf1] sm:$0xff]  ;;  %v12430_v55 = vld [vmem:[#allocation2 + $0xf9] sm:$0xff]  ;;  %v12499_v10 = vld [vmem:[#allocation2 + $0x48] sm:$0xff] }
  0x34   : > { %10738 = vmatmul.mubr.msk.f32.gmra.mrb[6].mxu0 %vm302_vm4, %v12362_v35  ;;  %v12432_v56 = vld [vmem:[#allocation2 + $0x109] sm:$0xff]  ;;  %v12438_v57 = vld [vmem:[#allocation2 + $0x111] sm:$0xff]  ;;  %v12487_v7 = vld [vmem:[#allocation2 + $0x20] sm:$0xff] }
  0x35   : > { %10740 = vmatprep.mubr.msk.f32.mxu0 %vm302_vm4, %v12364_v36  ;;  %v12440_v58 = vld [vmem:[#allocation2 + $0x121] sm:$0xff]  ;;  %v12446_v59 = vld [vmem:[#allocation2 + $0x129] sm:$0xff]  ;;  %v12475_v4 = vld [vmem:[#allocation2 + $0x18] sm:$0xff] }
  0x36   : > { %v12448_v60 = vld [vmem:[#allocation2 + $0x139] sm:$0xff]  ;;  %v12454_v61 = vld [vmem:[#allocation2 + $0x141] sm:$0xff]  ;;  %v12523_v15 = vld [vmem:[#allocation2 + $0x90] sm:$0xff] }
  0x37   : > { %v12456_v62 = vld [vmem:[#allocation2 + $0x151] sm:$0xff]  ;;  %v12462_v63 = vld [vmem:[#allocation2 + $0x159] sm:$0xff]  ;;  %v12513_v12 = vld [vmem:[#allocation2 + $0x68] sm:$0xff] }
  0x38   : > { %10741 = vmatmul.mubr.msk.f32.gmra.mrb[8].mxu0 %vm302_vm4, %v12381_v43  ;;  %14885 = vst [vmem:[#allocation3_spill] sm:$0xff] %v12462_v63  ;;  %v12464_v0 = vld [vmem:[#allocation2 + $0x169] sm:$0xff]  ;;  %v12470_v1 = vld [vmem:[#allocation2 + $0x171] sm:$0xff]  ;;  %v12507_v11 = vld [vmem:[#allocation2 + $0x60] sm:$0xff] }
  0x39   : > { %10743 = vmatprep.mubr.msk.f32.mxu0 %vm302_vm4, %v12384_v44  ;;  %14886 = vst [vmem:[#allocation4_spill] sm:$0xff] %v12464_v0  ;;  %14887 = vst [vmem:[#allocation5_spill] sm:$0xff] %v12470_v1  ;;  %v12497_v9 = vld [vmem:[#allocation2 + $0x38] sm:$0xff]  ;;  %v12521_v14 = vld [vmem:[#allocation2 + $0x80] sm:$0xff] }
  0x3a   : > { %v12515_v13 = vld [vmem:[#allocation2 + $0x78] sm:$0xff]  ;;  %v12531_v17 = vld [vmem:[#allocation2 + $0xa8] sm:$0xff]  ;;  %v12537_v18 = vld [vmem:[#allocation2 + $0xb0] sm:$0xff] }
  0x3b   : > { %v12529_v16 = vld [vmem:[#allocation2 + $0x98] sm:$0xff]  ;;  %v12539_v19 = vld [vmem:[#allocation2 + $0xc0] sm:$0xff]  ;;  %v12545_v20 = vld [vmem:[#allocation2 + $0xc8] sm:$0xff] }
  0x3c   : > { %10744 = vmatmul.mubr.msk.f32.gmra.mrb[10].mxu0 %vm302_vm4, %v12390_v45  ;;  %v12547_v21 = vld [vmem:[#allocation2 + $0xd8] sm:$0xff]  ;;  %v12553_v22 = vld [vmem:[#allocation2 + $0xe0] sm:$0xff]  ;;  %v12555_v23 = vld [vmem:[#allocation2 + $0xf0] sm:$0xff] }
  0x3d   : > { %10746 = vmatprep.mubr.msk.f32.mxu0 %vm302_vm4, %v12392_v46  ;;  %v12561_v24 = vld [vmem:[#allocation2 + $0xf8] sm:$0xff]  ;;  %v12563_v25 = vld [vmem:[#allocation2 + $0x108] sm:$0xff]  ;;  %v12569_v26 = vld [vmem:[#allocation2 + $0x110] sm:$0xff] }
  0x3e   : > { %v12571_v27 = vld [vmem:[#allocation2 + $0x120] sm:$0xff]  ;;  %v12577_v31 = vld [vmem:[#allocation2 + $0x128] sm:$0xff]  ;;  %v12579_v32 = vld [vmem:[#allocation2 + $0x138] sm:$0xff] }
  0x3f   : > { %v12585_v37 = vld [vmem:[#allocation2 + $0x140] sm:$0xff]  ;;  %v12587_v38 = vld [vmem:[#allocation2 + $0x150] sm:$0xff]  ;;  %v300_v40 = vld [vmem:[%s12281_s28 + $0xf8] sm:$0xff] }
  0x40   : > { %10747 = vmatmul.mubr.msk.f32.gmra.mrb[12].mxu0 %vm302_vm4, %v12398_v47  ;;  %v299_v39 = vld [vmem:[%s12281_s28 + $0xf0] sm:$0xff]  ;;  %334 = vst.msk [vmem:[#allocation2 + $0x189] sm:$0xff] %vm302_vm4, %v300_v40  ;;  %v12597_v41 = vld [vmem:[#allocation2 + $0x158] sm:$0xff]  ;;  %v12599_v42 = vld [vmem:[#allocation2 + $0x168] sm:$0xff]  ;;  %s9389_s28 = sshll.u32 %s15084_s19, 3 }
  0x41   : > { %10749 = vmatprep.mubr.msk.f32.mxu0 %vm302_vm4, %v12400_v48  ;;  %333 = vst.msk [vmem:[#allocation2 + $0x181] sm:$0xff] %vm302_vm4, %v299_v39  ;;  %v1052_v39 = vld [vmem:[#allocation2 + $0xa] sm:$0xff]  ;;  %v12610_v40 = vld [vmem:[#allocation2 + $0x1a] sm:$0xff]  ;;  %s222_s6 = scalar_lea.vmem %s14742_s5, %s9389_s28 }
  0x42   : > { %14888 = vst [vmem:[#allocation6_spill] sm:$0xff] %v12610_v40 }
  0x44   : > { %10750 = vmatmul.mubr.msk.f32.gmra.mrb[14].mxu0 %vm302_vm4, %v12406_v49 }
  0x45   : > { %10752 = vmatprep.mubr.msk.f32.mxu0 %vm302_vm4, %v12408_v50 }
  0x48   : > { %10753 = vmatmul.mubr.msk.f32.gmra.mrb[16].mxu0 %vm302_vm4, %v12414_v51 }
  0x49   : > { %10755 = vmatprep.mubr.msk.f32.mxu0 %vm302_vm4, %v12416_v52 }
  0x4c   : > { %10756 = vmatmul.mubr.msk.f32.gmra.mrb[18].mxu0 %vm302_vm4, %v12422_v53 }
  0x4d   : > { %10758 = vmatprep.mubr.msk.f32.mxu0 %vm302_vm4, %v12424_v54 }
  0x50   : > { %10759 = vmatmul.mubr.msk.f32.gmra.mrb[20].mxu0 %vm302_vm4, %v12430_v55 }
  0x51   : > { %10761 = vmatprep.mubr.msk.f32.mxu0 %vm302_vm4, %v12432_v56 }
  0x54   : > { %10762 = vmatmul.mubr.msk.f32.gmra.mrb[22].mxu0 %vm302_vm4, %v12438_v57 }
  0x55   : > { %10764 = vmatprep.mubr.msk.f32.mxu0 %vm302_vm4, %v12440_v58 }
  0x58   : > { %10765 = vmatmul.mubr.msk.f32.gmra.mrb[24].mxu0 %vm302_vm4, %v12446_v59 }
  0x59   : > { %10767 = vmatprep.mubr.msk.f32.mxu0 %vm302_vm4, %v12448_v60 }
  0x5c   : > { %10768 = vmatmul.mubr.msk.f32.gmra.mrb[26].mxu0 %vm302_vm4, %v12454_v61 }
  0x5d   : > { %10770 = vmatprep.mubr.msk.f32.mxu0 %vm302_vm4, %v12456_v62 }
  0x60   : > { %10771 = vmatmul.mubr.msk.f32.gmra.mrb[28].mxu0 %vm302_vm4, %v12462_v63  ;;  %v12624_v63 = vld [vmem:[#allocation2 + $0x32] sm:$0xff] }
  0x61   : > { %10773 = vmatprep.mubr.msk.f32.mxu0 %vm302_vm4, %v12464_v0  ;;  %v12622_v0 = vld [vmem:[#allocation2 + $0x22] sm:$0xff]  ;;  %14890 = vst [vmem:[#allocation8_spill] sm:$0xff] %v12624_v63 }
  0x62   : > { %14889 = vst [vmem:[#allocation7_spill] sm:$0xff] %v12622_v0 }
  0x64   : > { %10774 = vmatmul.mubr.msk.f32.gmra.mrb[30].mxu0 %vm302_vm4, %v12470_v1  ;;  %v12615_v1 = vld [vmem:[%s14738_s1 + $0x10] sm:$0xf] }
  0x65   : > { %10778 = vmatprep.mubr.msk.f32.mxu0 %vm302_vm4, %v335_v2  ;;  %v12605_v2 = vld [vmem:[#allocation2 + $0x170] sm:$0xff] }
  0x68   : > { %10779 = vmatmul.mubr.msk.f32.vlgmr.msra.gmra.mrb[0].mxu0 %vm302_vm4, %v336_v3  ;;  %v1051_v3 = vld [vmem:[#allocation2 + $0x2] sm:$0xff] }
  0x69   : > { %10827 = vmatpush3.msk.msra.mxu0 %vm498_vm0, %v12289_v6  ;;  %10781 = vmatprep.mubr.msk.f32.mxu0 %vm302_vm4, %v12475_v4  ;;  %v12505_v6 = vld [vmem:[#allocation2 + $0x50] sm:$0xff] }
  0x6a   : > { %10876 = vmatprep.subr.msk.mxu0 %vm498_vm0, %v12480_v5 }
  0x6c   : > { %10782 = vmatmul.mubr.msk.f32.gmra.mrb[2].mxu0 %vm302_vm4, %v12487_v7 }
  0x6d   : > { %10784 = vmatprep.mubr.msk.f32.mxu0 %vm302_vm4, %v12489_v8 }
  0x70   : > { %10785 = vmatmul.mubr.msk.f32.gmra.mrb[4].mxu0 %vm302_vm4, %v12497_v9 }
  0x71   : > { %10787 = vmatprep.mubr.msk.f32.mxu0 %vm302_vm4, %v12499_v10 }
  0x74   : > { %10788 = vmatmul.mubr.msk.f32.gmra.mrb[6].mxu0 %vm302_vm4, %v12505_v6 }
  0x75   : > { %10790 = vmatprep.mubr.msk.f32.mxu0 %vm302_vm4, %v12507_v11 }
  0x78   : > { %10791 = vmatmul.mubr.msk.f32.gmra.mrb[8].mxu0 %vm302_vm4, %v12513_v12 }
  0x79   : > { %10793 = vmatprep.mubr.msk.f32.mxu0 %vm302_vm4, %v12515_v13 }
  0x7c   : > { %10794 = vmatmul.mubr.msk.f32.gmra.mrb[10].mxu0 %vm302_vm4, %v12521_v14 }
  0x7d   : > { %10796 = vmatprep.mubr.msk.f32.mxu0 %vm302_vm4, %v12523_v15 }
  0x80   : > { %10797 = vmatmul.mubr.msk.f32.gmra.mrb[12].mxu0 %vm302_vm4, %v12529_v16 }
  0x81   : > { %10799 = vmatprep.mubr.msk.f32.mxu0 %vm302_vm4, %v12531_v17 }
  0x84   : > { %10800 = vmatmul.mubr.msk.f32.gmra.mrb[14].mxu0 %vm302_vm4, %v12537_v18 }
  0x85   : > { %10802 = vmatprep.mubr.msk.f32.mxu0 %vm302_vm4, %v12539_v19 }
  0x88   : > { %10803 = vmatmul.mubr.msk.f32.gmra.mrb[16].mxu0 %vm302_vm4, %v12545_v20 }
  0x89   : > { %10805 = vmatprep.mubr.msk.f32.mxu0 %vm302_vm4, %v12547_v21 }
  0x8c   : > { %10806 = vmatmul.mubr.msk.f32.gmra.mrb[18].mxu0 %vm302_vm4, %v12553_v22 }
  0x8d   : > { %10808 = vmatprep.mubr.msk.f32.mxu0 %vm302_vm4, %v12555_v23 }
  0x90   : > { %10809 = vmatmul.mubr.msk.f32.gmra.mrb[20].mxu0 %vm302_vm4, %v12561_v24 }
  0x91   : > { %10811 = vmatprep.mubr.msk.f32.mxu0 %vm302_vm4, %v12563_v25 }
  0x94   : > { %10812 = vmatmul.mubr.msk.f32.gmra.mrb[22].mxu0 %vm302_vm4, %v12569_v26 }
  0x95   : > { %10814 = vmatprep.mubr.msk.f32.mxu0 %vm302_vm4, %v12571_v27 }
  0x98   : > { %10815 = vmatmul.mubr.msk.f32.gmra.mrb[24].mxu0 %vm302_vm4, %v12577_v31 }
  0x99   : > { %10817 = vmatprep.mubr.msk.f32.mxu0 %vm302_vm4, %v12579_v32 }
  0x9c   : > { %10818 = vmatmul.mubr.msk.f32.gmra.mrb[26].mxu0 %vm302_vm4, %v12585_v37 }
  0x9d   : > { %10820 = vmatprep.mubr.msk.f32.mxu0 %vm302_vm4, %v12587_v38 }
  0xa0   : > { %10821 = vmatmul.mubr.msk.f32.gmra.mrb[28].mxu0 %vm302_vm4, %v12597_v41 }
  0xa1   : > { %10823 = vmatprep.mubr.msk.f32.mxu0 %vm302_vm4, %v12599_v42 }
  0xa4   : > { %10824 = vmatmul.mubr.msk.f32.gmra.mrb[30].mxu0 %vm302_vm4, %v12605_v2 }
  0xa5   : > { %10828 = vmatprep.mubr.msk.f32.mxu0 %vm302_vm4, %v1051_v3  ;;  %v12632_v3 = vld [vmem:[#allocation2 + $0x3a] sm:$0xff] }
  0xa6   : > { %14891 = vst [vmem:[#allocation9_spill] sm:$0xff] %v12632_v3 }
  0xa8   : > { %10829 = vmatmul.mubr.msk.f32.vlgmr.msra.gmra.mrb[0].mxu0 %vm302_vm4, %v1052_v39  ;;  %v12634_v39 = vld [vmem:[#allocation2 + $0x4a] sm:$0xff] }
  0xa9   : > { %10877 = vmatpush3.msk.msra.mxu0 %vm498_vm0, %v12480_v5  ;;  %10831 = vmatprep.mubr.msk.f32.mxu0 %vm302_vm4, %v12610_v40  ;;  %14892 = vst [vmem:[#allocation10_spill] sm:$0xff] %v12634_v39  ;;  %v12640_v5 = vld [vmem:[#allocation2 + $0x52] sm:$0xff]  ;;  %v12642_v40 = vld [vmem:[#allocation2 + $0x62] sm:$0xff] }
  0xaa   : > { %10926 = vmatprep.subr.msk.mxu0 %vm498_vm0, %v12615_v1  ;;  %14893 = vst [vmem:[#allocation11_spill] sm:$0xff] %v12640_v5  ;;  %14894 = vst [vmem:[#allocation12_spill] sm:$0xff] %v12642_v40 }
  0xac   : > { %10832 = vmatmul.mubr.msk.f32.gmra.mrb[2].mxu0 %vm302_vm4, %v12622_v0  ;;  %v12650_v0 = vld [vmem:[#allocation2 + $0x7a] sm:$0xff] }
  0xad   : > { %10834 = vmatprep.mubr.msk.f32.mxu0 %vm302_vm4, %v12624_v63  ;;  %v12648_v63 = vld [vmem:[#allocation2 + $0x6a] sm:$0xff]  ;;  %14896 = vst [vmem:[#allocation14_spill] sm:$0xff] %v12650_v0 }
  0xae   : > { %14895 = vst [vmem:[#allocation13_spill] sm:$0xff] %v12648_v63 }
  0xb0   : > { %10835 = vmatmul.mubr.msk.f32.gmra.mrb[4].mxu0 %vm302_vm4, %v12632_v3  ;;  %v12658_v3 = vld [vmem:[#allocation2 + $0x92] sm:$0xff] }
  0xb1   : > { %10837 = vmatprep.mubr.msk.f32.mxu0 %vm302_vm4, %v12634_v39  ;;  %v12656_v39 = vld [vmem:[#allocation2 + $0x82] sm:$0xff]  ;;  %14898 = vst [vmem:[#allocation16_spill] sm:$0xff] %v12658_v3 }
  0xb2   : > { %14897 = vst [vmem:[#allocation15_spill] sm:$0xff] %v12656_v39 }
  0xb4   : > { %10838 = vmatmul.mubr.msk.f32.gmra.mrb[6].mxu0 %vm302_vm4, %v12640_v5  ;;  %v12666_v5 = vld [vmem:[#allocation2 + $0xaa] sm:$0xff] }
  0xb5   : > { %10840 = vmatprep.mubr.msk.f32.mxu0 %vm302_vm4, %v12642_v40  ;;  %v12664_v40 = vld [vmem:[#allocation2 + $0x9a] sm:$0xff]  ;;  %14900 = vst [vmem:[#allocation18_spill] sm:$0xff] %v12666_v5 }
  0xb6   : > { %14899 = vst [vmem:[#allocation17_spill] sm:$0xff] %v12664_v40 }
  0xb8   : > { %10841 = vmatmul.mubr.msk.f32.gmra.mrb[8].mxu0 %vm302_vm4, %v12648_v63  ;;  %v12674_v63 = vld [vmem:[#allocation2 + $0xc2] sm:$0xff] }
  0xb9   : > { %10843 = vmatprep.mubr.msk.f32.mxu0 %vm302_vm4, %v12650_v0  ;;  %v12672_v0 = vld [vmem:[#allocation2 + $0xb2] sm:$0xff]  ;;  %14902 = vst [vmem:[#allocation20_spill] sm:$0xff] %v12674_v63 }
  0xba   : > { %14901 = vst [vmem:[#allocation19_spill] sm:$0xff] %v12672_v0 }
  0xbc   : > { %10844 = vmatmul.mubr.msk.f32.gmra.mrb[10].mxu0 %vm302_vm4, %v12656_v39  ;;  %v12682_v39 = vld [vmem:[#allocation2 + $0xda] sm:$0xff] }
  0xbd   : > { %10846 = vmatprep.mubr.msk.f32.mxu0 %vm302_vm4, %v12658_v3  ;;  %v12680_v3 = vld [vmem:[#allocation2 + $0xca] sm:$0xff]  ;;  %14904 = vst [vmem:[#allocation22_spill] sm:$0xff] %v12682_v39 }
  0xbe   : > { %14903 = vst [vmem:[#allocation21_spill] sm:$0xff] %v12680_v3 }
  0xc0   : > { %10847 = vmatmul.mubr.msk.f32.gmra.mrb[12].mxu0 %vm302_vm4, %v12664_v40  ;;  %v12690_v40 = vld [vmem:[#allocation2 + $0xf2] sm:$0xff] }
  0xc1   : > { %10849 = vmatprep.mubr.msk.f32.mxu0 %vm302_vm4, %v12666_v5  ;;  %v12688_v5 = vld [vmem:[#allocation2 + $0xe2] sm:$0xff]  ;;  %14906 = vst [vmem:[#allocation24_spill] sm:$0xff] %v12690_v40 }
  0xc2   : > { %14905 = vst [vmem:[#allocation23_spill] sm:$0xff] %v12688_v5 }
  0xc4   : > { %10850 = vmatmul.mubr.msk.f32.gmra.mrb[14].mxu0 %vm302_vm4, %v12672_v0  ;;  %v12698_v0 = vld [vmem:[#allocation2 + $0x10a] sm:$0xff] }
  0xc5   : > { %10852 = vmatprep.mubr.msk.f32.mxu0 %vm302_vm4, %v12674_v63  ;;  %v12696_v63 = vld [vmem:[#allocation2 + $0xfa] sm:$0xff]  ;;  %14908 = vst [vmem:[#allocation26_spill] sm:$0xff] %v12698_v0 }
  0xc6   : > { %14907 = vst [vmem:[#allocation25_spill] sm:$0xff] %v12696_v63 }
  0xc8   : > { %10853 = vmatmul.mubr.msk.f32.gmra.mrb[16].mxu0 %vm302_vm4, %v12680_v3  ;;  %v12706_v3 = vld [vmem:[#allocation2 + $0x122] sm:$0xff] }
  0xc9   : > { %10855 = vmatprep.mubr.msk.f32.mxu0 %vm302_vm4, %v12682_v39  ;;  %v12704_v39 = vld [vmem:[#allocation2 + $0x112] sm:$0xff]  ;;  %14910 = vst [vmem:[#allocation28_spill] sm:$0xff] %v12706_v3 }
  0xca   : > { %14909 = vst [vmem:[#allocation27_spill] sm:$0xff] %v12704_v39 }
  0xcc   : > { %10856 = vmatmul.mubr.msk.f32.gmra.mrb[18].mxu0 %vm302_vm4, %v12688_v5  ;;  %v12714_v5 = vld [vmem:[#allocation2 + $0x13a] sm:$0xff] }
  0xcd   : > { %10858 = vmatprep.mubr.msk.f32.mxu0 %vm302_vm4, %v12690_v40  ;;  %v12712_v40 = vld [vmem:[#allocation2 + $0x12a] sm:$0xff]  ;;  %14911 = vst [vmem:[#allocation29_spill] sm:$0xff] %v12714_v5 }
  0xd0   : > { %10859 = vmatmul.mubr.msk.f32.gmra.mrb[20].mxu0 %vm302_vm4, %v12696_v63  ;;  %v12722_v63 = vld [vmem:[#allocation2 + $0x152] sm:$0xff] }
  0xd1   : > { %10861 = vmatprep.mubr.msk.f32.mxu0 %vm302_vm4, %v12698_v0  ;;  %v12720_v0 = vld [vmem:[#allocation2 + $0x142] sm:$0xff]  ;;  %14912 = vst [vmem:[#allocation30_spill] sm:$0xff] %v12722_v63 }
  0xd4   : > { %10862 = vmatmul.mubr.msk.f32.gmra.mrb[22].mxu0 %vm302_vm4, %v12704_v39  ;;  %v12730_v39 = vld [vmem:[#allocation2 + $0x16a] sm:$0xff] }
  0xd5   : > { %10864 = vmatprep.mubr.msk.f32.mxu0 %vm302_vm4, %v12706_v3  ;;  %v12728_v3 = vld [vmem:[#allocation2 + $0x15a] sm:$0xff]  ;;  %14913 = vst [vmem:[#allocation31_spill] sm:$0xff] %v12730_v39 }
  0xd8   : > { %10865 = vmatmul.mubr.msk.f32.gmra.mrb[24].mxu0 %vm302_vm4, %v12712_v40 }
  0xd9   : > { %10867 = vmatprep.mubr.msk.f32.mxu0 %vm302_vm4, %v12714_v5  ;;  %v12736_v5 = vld [vmem:[#allocation2 + $0x172] sm:$0xff] }
  0xdc   : > { %10868 = vmatmul.mubr.msk.f32.gmra.mrb[26].mxu0 %vm302_vm4, %v12720_v0 }
  0xdd   : > { %10870 = vmatprep.mubr.msk.f32.mxu0 %vm302_vm4, %v12722_v63  ;;  %v9559_v63 = vld [vmem:[%s14738_s1 + $0x14] sm:$0xf] }
  0xe0   : > { %10871 = vmatmul.mubr.msk.f32.gmra.mrb[28].mxu0 %vm302_vm4, %v12728_v3 }
  0xe1   : > { %10873 = vmatprep.mubr.msk.f32.mxu0 %vm302_vm4, %v12730_v39 }
  0xe4   : > { %10874 = vmatmul.mubr.msk.f32.gmra.mrb[30].mxu0 %vm302_vm4, %v12736_v5 }
  0xe5   : > { %10878 = vmatprep.mubr.msk.f32.mxu0 %vm302_vm4, %v12475_v4  ;;  %v12810_v4 = vld [vmem:[#allocation2 + $0x188] sm:$0xff] }
  0xe8   : > { %10879 = vmatmul.mubr.msk.f32.vlgmr.msra.gmra.mrb[0].mxu0 %vm302_vm4, %v12487_v7  ;;  %v9593_v7 = vld [vmem:[%s14738_s1 + $0x18] sm:$0xf] }
  0xe9   : > { %10927 = vmatpush3.msk.msra.mxu0 %vm498_vm0, %v12615_v1  ;;  %10881 = vmatprep.mubr.msk.f32.mxu0 %vm302_vm4, %v12489_v8  ;;  %v12804_v1 = vld [vmem:[#allocation2 + $0x180] sm:$0xff] }
  0xea   : > { %10976 = vmatprep.subr.msk.mxu0 %vm498_vm0, %v9559_v63 }
  0xec   : > { %10882 = vmatmul.mubr.msk.f32.gmra.mrb[2].mxu0 %vm302_vm4, %v12497_v9 }
  0xed   : > { %10884 = vmatprep.mubr.msk.f32.mxu0 %vm302_vm4, %v12499_v10 }
  0xf0   : > { %10885 = vmatmul.mubr.msk.f32.gmra.mrb[4].mxu0 %vm302_vm4, %v12505_v6 }
  0xf1   : > { %10887 = vmatprep.mubr.msk.f32.mxu0 %vm302_vm4, %v12507_v11 }
  0xf4   : > { %10888 = vmatmul.mubr.msk.f32.gmra.mrb[6].mxu0 %vm302_vm4, %v12513_v12 }
  0xf5   : > { %10890 = vmatprep.mubr.msk.f32.mxu0 %vm302_vm4, %v12515_v13 }
  0xf8   : > { %10891 = vmatmul.mubr.msk.f32.gmra.mrb[8].mxu0 %vm302_vm4, %v12521_v14 }
  0xf9   : > { %10893 = vmatprep.mubr.msk.f32.mxu0 %vm302_vm4, %v12523_v15 }
  0xfc   : > { %10894 = vmatmul.mubr.msk.f32.gmra.mrb[10].mxu0 %vm302_vm4, %v12529_v16 }
  0xfd   : > { %10896 = vmatprep.mubr.msk.f32.mxu0 %vm302_vm4, %v12531_v17 }
 0x100   : > { %10897 = vmatmul.mubr.msk.f32.gmra.mrb[12].mxu0 %vm302_vm4, %v12537_v18 }
 0x101   : > { %10899 = vmatprep.mubr.msk.f32.mxu0 %vm302_vm4, %v12539_v19 }
 0x104   : > { %10900 = vmatmul.mubr.msk.f32.gmra.mrb[14].mxu0 %vm302_vm4, %v12545_v20 }
 0x105   : > { %10902 = vmatprep.mubr.msk.f32.mxu0 %vm302_vm4, %v12547_v21 }
 0x108   : > { %10903 = vmatmul.mubr.msk.f32.gmra.mrb[16].mxu0 %vm302_vm4, %v12553_v22 }
 0x109   : > { %10905 = vmatprep.mubr.msk.f32.mxu0 %vm302_vm4, %v12555_v23 }
 0x10c   : > { %10906 = vmatmul.mubr.msk.f32.gmra.mrb[18].mxu0 %vm302_vm4, %v12561_v24 }
 0x10d   : > { %10908 = vmatprep.mubr.msk.f32.mxu0 %vm302_vm4, %v12563_v25 }
 0x110   : > { %10909 = vmatmul.mubr.msk.f32.gmra.mrb[20].mxu0 %vm302_vm4, %v12569_v26 }
 0x111   : > { %10911 = vmatprep.mubr.msk.f32.mxu0 %vm302_vm4, %v12571_v27 }
 0x114   : > { %10912 = vmatmul.mubr.msk.f32.gmra.mrb[22].mxu0 %vm302_vm4, %v12577_v31 }
 0x115   : > { %10914 = vmatprep.mubr.msk.f32.mxu0 %vm302_vm4, %v12579_v32 }
 0x118   : > { %10915 = vmatmul.mubr.msk.f32.gmra.mrb[24].mxu0 %vm302_vm4, %v12585_v37 }
 0x119   : > { %10917 = vmatprep.mubr.msk.f32.mxu0 %vm302_vm4, %v12587_v38 }
 0x11c   : > { %10918 = vmatmul.mubr.msk.f32.gmra.mrb[26].mxu0 %vm302_vm4, %v12597_v41 }
 0x11d   : > { %10920 = vmatprep.mubr.msk.f32.mxu0 %vm302_vm4, %v12599_v42 }
 0x120   : > { %10921 = vmatmul.mubr.msk.f32.gmra.mrb[28].mxu0 %vm302_vm4, %v12605_v2 }
 0x121   : > { %10923 = vmatprep.mubr.msk.f32.mxu0 %vm302_vm4, %v12804_v1 }
 0x124   : > { %10924 = vmatmul.mubr.msk.f32.gmra.mrb[30].mxu0 %vm302_vm4, %v12810_v4 }
 0x125   : > { %10928 = vmatprep.mubr.msk.f32.mxu0 %vm302_vm4, %v12335_v28  ;;  %v14914_v28 = vld [vmem:[#allocation3_spill] sm:$0xff] }
 0x128   : > { %10929 = vmatmul.mubr.msk.f32.vlgmr.msra.gmra.mrb[0].mxu0 %vm302_vm4, %v12337_v29  ;;  %v14915_v29 = vld [vmem:[#allocation4_spill] sm:$0xff] }
 0x129   : > { %10977 = vmatpush3.msk.msra.mxu0 %vm498_vm0, %v9559_v63  ;;  %10931 = vmatprep.mubr.msk.f32.mxu0 %vm302_vm4, %v12339_v30  ;;  %v12877_v30 = vld [vmem:[#allocation2 + $0x181] sm:$0xff]  ;;  %v14935_v63 = vld [vmem:[#allocation24_spill] sm:$0xff] }
 0x12a   : > { %11026 = vmatprep.subr.msk.mxu0 %vm498_vm0, %v9593_v7 }
 0x12c   : > { %10932 = vmatmul.mubr.msk.f32.gmra.mrb[2].mxu0 %vm302_vm4, %v12353_v33  ;;  %v14916_v33 = vld [vmem:[#allocation5_spill] sm:$0xff] }
 0x12d   : > { %10934 = vmatprep.mubr.msk.f32.mxu0 %vm302_vm4, %v12356_v34  ;;  %v12883_v34 = vld [vmem:[#allocation2 + $0x189] sm:$0xff] }
 0x130   : > { %10935 = vmatmul.mubr.msk.f32.gmra.mrb[4].mxu0 %vm302_vm4, %v12362_v35  ;;  %v14917_v35 = vld [vmem:[#allocation6_spill] sm:$0xff] }
 0x131   : > { %10937 = vmatprep.mubr.msk.f32.mxu0 %vm302_vm4, %v12364_v36  ;;  %v9627_v36 = vld [vmem:[%s14738_s1 + $0x1c] sm:$0xf] }
 0x134   : > { %10938 = vmatmul.mubr.msk.f32.gmra.mrb[6].mxu0 %vm302_vm4, %v12381_v43  ;;  %v14918_v43 = vld [vmem:[#allocation7_spill] sm:$0xff] }
 0x135   : > { %10940 = vmatprep.mubr.msk.f32.mxu0 %vm302_vm4, %v12384_v44  ;;  %v14919_v44 = vld [vmem:[#allocation8_spill] sm:$0xff] }
 0x138   : > { %10941 = vmatmul.mubr.msk.f32.gmra.mrb[8].mxu0 %vm302_vm4, %v12390_v45  ;;  %v14920_v45 = vld [vmem:[#allocation9_spill] sm:$0xff] }
 0x139   : > { %10943 = vmatprep.mubr.msk.f32.mxu0 %vm302_vm4, %v12392_v46  ;;  %v14921_v46 = vld [vmem:[#allocation10_spill] sm:$0xff] }
 0x13c   : > { %10944 = vmatmul.mubr.msk.f32.gmra.mrb[10].mxu0 %vm302_vm4, %v12398_v47  ;;  %v14922_v47 = vld [vmem:[#allocation11_spill] sm:$0xff] }
 0x13d   : > { %10946 = vmatprep.mubr.msk.f32.mxu0 %vm302_vm4, %v12400_v48  ;;  %v14923_v48 = vld [vmem:[#allocation12_spill] sm:$0xff] }
 0x140   : > { %10947 = vmatmul.mubr.msk.f32.gmra.mrb[12].mxu0 %vm302_vm4, %v12406_v49  ;;  %v14924_v49 = vld [vmem:[#allocation13_spill] sm:$0xff] }
 0x141   : > { %10949 = vmatprep.mubr.msk.f32.mxu0 %vm302_vm4, %v12408_v50  ;;  %v14925_v50 = vld [vmem:[#allocation14_spill] sm:$0xff] }
 0x144   : > { %10950 = vmatmul.mubr.msk.f32.gmra.mrb[14].mxu0 %vm302_vm4, %v12414_v51  ;;  %v14926_v51 = vld [vmem:[#allocation15_spill] sm:$0xff] }
 0x145   : > { %10952 = vmatprep.mubr.msk.f32.mxu0 %vm302_vm4, %v12416_v52  ;;  %v14927_v52 = vld [vmem:[#allocation16_spill] sm:$0xff] }
 0x148   : > { %10953 = vmatmul.mubr.msk.f32.gmra.mrb[16].mxu0 %vm302_vm4, %v12422_v53  ;;  %v14928_v53 = vld [vmem:[#allocation17_spill] sm:$0xff] }
 0x149   : > { %10955 = vmatprep.mubr.msk.f32.mxu0 %vm302_vm4, %v12424_v54  ;;  %v14929_v54 = vld [vmem:[#allocation18_spill] sm:$0xff] }
 0x14c   : > { %10956 = vmatmul.mubr.msk.f32.gmra.mrb[18].mxu0 %vm302_vm4, %v12430_v55  ;;  %v14930_v55 = vld [vmem:[#allocation19_spill] sm:$0xff] }
 0x14d   : > { %10958 = vmatprep.mubr.msk.f32.mxu0 %vm302_vm4, %v12432_v56  ;;  %v14931_v56 = vld [vmem:[#allocation20_spill] sm:$0xff] }
 0x150   : > { %10959 = vmatmul.mubr.msk.f32.gmra.mrb[20].mxu0 %vm302_vm4, %v12438_v57  ;;  %v14932_v57 = vld [vmem:[#allocation21_spill] sm:$0xff] }
 0x151   : > { %10961 = vmatprep.mubr.msk.f32.mxu0 %vm302_vm4, %v12440_v58  ;;  %v14933_v58 = vld [vmem:[#allocation22_spill] sm:$0xff] }
 0x154   : > { %10962 = vmatmul.mubr.msk.f32.gmra.mrb[22].mxu0 %vm302_vm4, %v12446_v59  ;;  %v14934_v59 = vld [vmem:[#allocation23_spill] sm:$0xff] }
 0x155   : > { %10964 = vmatprep.mubr.msk.f32.mxu0 %vm302_vm4, %v12448_v60 }
 0x158   : > { %10965 = vmatmul.mubr.msk.f32.gmra.mrb[24].mxu0 %vm302_vm4, %v12454_v61 }
 0x159   : > { %10967 = vmatprep.mubr.msk.f32.mxu0 %vm302_vm4, %v12456_v62 }
 0x15c   : > { %10968 = vmatmul.mubr.msk.f32.gmra.mrb[26].mxu0 %vm302_vm4, %v14914_v28 }
 0x15d   : > { %10970 = vmatprep.mubr.msk.f32.mxu0 %vm302_vm4, %v14915_v29 }
 0x160   : > { %10971 = vmatmul.mubr.msk.f32.gmra.mrb[28].mxu0 %vm302_vm4, %v14916_v33 }
 0x161   : > { %10973 = vmatprep.mubr.msk.f32.mxu0 %vm302_vm4, %v12877_v30 }
 0x164   : > { %10974 = vmatmul.mubr.msk.f32.gmra.mrb[30].mxu0 %vm302_vm4, %v12883_v34 }
 0x165   : > { %10978 = vmatprep.mubr.msk.f32.mxu0 %vm302_vm4, %v14917_v35  ;;  %v14937_v35 = vld [vmem:[#allocation26_spill] sm:$0xff] }
 0x168   : > { %10979 = vmatmul.mubr.msk.f32.vlgmr.msra.gmra.mrb[0].mxu0 %vm302_vm4, %v14918_v43  ;;  %v14938_v43 = vld [vmem:[#allocation27_spill] sm:$0xff] }
 0x169   : > { %11027 = vmatpush3.msk.msra.mxu0 %vm498_vm0, %v9593_v7  ;;  %10981 = vmatprep.mubr.msk.f32.mxu0 %vm302_vm4, %v14919_v44  ;;  %v14936_v7 = vld [vmem:[#allocation25_spill] sm:$0xff] }
 0x16a   : > { %11076 = vmatprep.subr.msk.mxu0 %vm498_vm0, %v9627_v36 }
 0x16c   : > { %10982 = vmatmul.mubr.msk.f32.gmra.mrb[2].mxu0 %vm302_vm4, %v14920_v45 }
 0x16d   : > { %10984 = vmatprep.mubr.msk.f32.mxu0 %vm302_vm4, %v14921_v46 }
 0x170   : > { %10985 = vmatmul.mubr.msk.f32.gmra.mrb[4].mxu0 %vm302_vm4, %v14922_v47 }
 0x171   : > { %10987 = vmatprep.mubr.msk.f32.mxu0 %vm302_vm4, %v14923_v48 }
 0x174   : > { %10988 = vmatmul.mubr.msk.f32.gmra.mrb[6].mxu0 %vm302_vm4, %v14924_v49 }
 0x175   : > { %10990 = vmatprep.mubr.msk.f32.mxu0 %vm302_vm4, %v14925_v50 }
 0x178   : > { %10991 = vmatmul.mubr.msk.f32.gmra.mrb[8].mxu0 %vm302_vm4, %v14926_v51 }
 0x179   : > { %10993 = vmatprep.mubr.msk.f32.mxu0 %vm302_vm4, %v14927_v52 }
 0x17c   : > { %10994 = vmatmul.mubr.msk.f32.gmra.mrb[10].mxu0 %vm302_vm4, %v14928_v53 }
 0x17d   : > { %10996 = vmatprep.mubr.msk.f32.mxu0 %vm302_vm4, %v14929_v54 }
 0x180   : > { %10997 = vmatmul.mubr.msk.f32.gmra.mrb[12].mxu0 %vm302_vm4, %v14930_v55 }
 0x181   : > { %10999 = vmatprep.mubr.msk.f32.mxu0 %vm302_vm4, %v14931_v56  ;;  %v14939_v56 = vld [vmem:[#allocation28_spill] sm:$0xff] }
 0x184   : > { %11000 = vmatmul.mubr.msk.f32.gmra.mrb[14].mxu0 %vm302_vm4, %v14932_v57 }
 0x185   : > { %11002 = vmatprep.mubr.msk.f32.mxu0 %vm302_vm4, %v14933_v58  ;;  %v14940_v58 = vld [vmem:[#allocation29_spill] sm:$0xff] }
 0x188   : > { %11003 = vmatmul.mubr.msk.f32.gmra.mrb[16].mxu0 %vm302_vm4, %v14934_v59 }
 0x189   : > { %11005 = vmatprep.mubr.msk.f32.mxu0 %vm302_vm4, %v14935_v63  ;;  %v14941_v63 = vld [vmem:[#allocation30_spill] sm:$0xff] }
 0x18c   : > { %11006 = vmatmul.mubr.msk.f32.gmra.mrb[18].mxu0 %vm302_vm4, %v14936_v7 }
 0x18d   : > { %11008 = vmatprep.mubr.msk.f32.mxu0 %vm302_vm4, %v14937_v35 }
 0x190   : > { %11009 = vmatmul.mubr.msk.f32.gmra.mrb[20].mxu0 %vm302_vm4, %v14938_v43  ;;  %v12950_v43 = vld [vmem:[#allocation2 + $0x182] sm:$0xff] }
 0x191   : > { %11011 = vmatprep.mubr.msk.f32.mxu0 %vm302_vm4, %v14939_v56 }
 0x194   : > { %11012 = vmatmul.mubr.msk.f32.gmra.mrb[22].mxu0 %vm302_vm4, %v12712_v40 }
 0x195   : > { %11014 = vmatprep.mubr.msk.f32.mxu0 %vm302_vm4, %v14940_v58  ;;  %v12956_v58 = vld [vmem:[#allocation2 + $0x18a] sm:$0xff] }
 0x198   : > { %11015 = vmatmul.mubr.msk.f32.gmra.mrb[24].mxu0 %vm302_vm4, %v12720_v0 }
 0x199   : > { %11017 = vmatprep.mubr.msk.f32.mxu0 %vm302_vm4, %v14941_v63 }
 0x19c   : > { %11018 = vmatmul.mubr.msk.f32.gmra.mrb[26].mxu0 %vm302_vm4, %v12728_v3 }
 0x19d   : > { %11020 = vmatprep.mubr.msk.f32.mxu0 %vm302_vm4, %v12730_v39  ;;  %v9661_v39 = vld [vmem:[%s14738_s1 + $0x20] sm:$0xf] }
 0x1a0   : > { %11021 = vmatmul.mubr.msk.f32.gmra.mrb[28].mxu0 %vm302_vm4, %v12736_v5 }
 0x1a1   : > { %11023 = vmatprep.mubr.msk.f32.mxu0 %vm302_vm4, %v12950_v43 }
 0x1a4   : > { %11024 = vmatmul.mubr.msk.f32.gmra.mrb[30].mxu0 %vm302_vm4, %v12956_v58 }
 0x1a5   : > { %11028 = vmatprep.mubr.msk.f32.mxu0 %vm302_vm4, %v12489_v8  ;;  %v2642_v8 = vld [vmem:[#allocation2 + $0x198] sm:$0xff] }
 0x1a8   : > { %11029 = vmatmul.mubr.msk.f32.vlgmr.msra.gmra.mrb[0].mxu0 %vm302_vm4, %v12497_v9  ;;  %v2643_v9 = vld [vmem:[#allocation2 + $0x1a0] sm:$0xff] }
 0x1a9   : > { %11077 = vmatpush3.msk.msra.mxu0 %vm498_vm0, %v9627_v36  ;;  %11031 = vmatprep.mubr.msk.f32.mxu0 %vm302_vm4, %v12499_v10  ;;  %v3002_v10 = vld [vmem:[#allocation2 + $0x31] sm:$0xff] }
 0x1aa   : > { %11126 = vmatprep.subr.msk.mxu0 %vm498_vm0, %v9661_v39 }
 0x1ac   : > { %11032 = vmatmul.mubr.msk.f32.gmra.mrb[2].mxu0 %vm302_vm4, %v12505_v6  ;;  %v3003_v6 = vld [vmem:[#allocation2 + $0x39] sm:$0xff] }
 0x1ad   : > { %11034 = vmatprep.mubr.msk.f32.mxu0 %vm302_vm4, %v12507_v11  ;;  %v3004_v11 = vld [vmem:[#allocation2 + $0x49] sm:$0xff] }
 0x1b0   : > { %11035 = vmatmul.mubr.msk.f32.gmra.mrb[4].mxu0 %vm302_vm4, %v12513_v12  ;;  %v3005_v12 = vld [vmem:[#allocation2 + $0x51] sm:$0xff] }
 0x1b1   : > { %11037 = vmatprep.mubr.msk.f32.mxu0 %vm302_vm4, %v12515_v13  ;;  %v3006_v13 = vld [vmem:[#allocation2 + $0x61] sm:$0xff] }
 0x1b4   : > { %11038 = vmatmul.mubr.msk.f32.gmra.mrb[6].mxu0 %vm302_vm4, %v12521_v14  ;;  %v3007_v14 = vld [vmem:[#allocation2 + $0x69] sm:$0xff] }
 0x1b5   : > { %11040 = vmatprep.mubr.msk.f32.mxu0 %vm302_vm4, %v12523_v15  ;;  %v3008_v15 = vld [vmem:[#allocation2 + $0x79] sm:$0xff] }
 0x1b8   : > { %11041 = vmatmul.mubr.msk.f32.gmra.mrb[8].mxu0 %vm302_vm4, %v12529_v16  ;;  %v3009_v16 = vld [vmem:[#allocation2 + $0x81] sm:$0xff] }
 0x1b9   : > { %11043 = vmatprep.mubr.msk.f32.mxu0 %vm302_vm4, %v12531_v17  ;;  %v3010_v17 = vld [vmem:[#allocation2 + $0x91] sm:$0xff] }
 0x1bc   : > { %11044 = vmatmul.mubr.msk.f32.gmra.mrb[10].mxu0 %vm302_vm4, %v12537_v18  ;;  %v3011_v18 = vld [vmem:[#allocation2 + $0x99] sm:$0xff] }
 0x1bd   : > { %11046 = vmatprep.mubr.msk.f32.mxu0 %vm302_vm4, %v12539_v19  ;;  %v3012_v19 = vld [vmem:[#allocation2 + $0xa9] sm:$0xff] }
 0x1c0   : > { %11047 = vmatmul.mubr.msk.f32.gmra.mrb[12].mxu0 %vm302_vm4, %v12545_v20  ;;  %v3013_v20 = vld [vmem:[#allocation2 + $0xb1] sm:$0xff] }
 0x1c1   : > { %11049 = vmatprep.mubr.msk.f32.mxu0 %vm302_vm4, %v12547_v21  ;;  %v3014_v21 = vld [vmem:[#allocation2 + $0xc1] sm:$0xff] }
 0x1c4   : > { %11050 = vmatmul.mubr.msk.f32.gmra.mrb[14].mxu0 %vm302_vm4, %v12553_v22  ;;  %v3015_v22 = vld [vmem:[#allocation2 + $0xc9] sm:$0xff] }
 0x1c5   : > { %11052 = vmatprep.mubr.msk.f32.mxu0 %vm302_vm4, %v12555_v23  ;;  %v3016_v23 = vld [vmem:[#allocation2 + $0xd9] sm:$0xff] }
 0x1c8   : > { %11053 = vmatmul.mubr.msk.f32.gmra.mrb[16].mxu0 %vm302_vm4, %v12561_v24  ;;  %v3017_v24 = vld [vmem:[#allocation2 + $0xe1] sm:$0xff] }
 0x1c9   : > { %11055 = vmatprep.mubr.msk.f32.mxu0 %vm302_vm4, %v12563_v25  ;;  %v3018_v25 = vld [vmem:[#allocation2 + $0xf1] sm:$0xff] }
 0x1cc   : > { %11056 = vmatmul.mubr.msk.f32.gmra.mrb[18].mxu0 %vm302_vm4, %v12569_v26  ;;  %v3019_v26 = vld [vmem:[#allocation2 + $0xf9] sm:$0xff] }
 0x1cd   : > { %11058 = vmatprep.mubr.msk.f32.mxu0 %vm302_vm4, %v12571_v27  ;;  %v3020_v27 = vld [vmem:[#allocation2 + $0x109] sm:$0xff] }
 0x1d0   : > { %11059 = vmatmul.mubr.msk.f32.gmra.mrb[20].mxu0 %vm302_vm4, %v12577_v31  ;;  %v3021_v31 = vld [vmem:[#allocation2 + $0x111] sm:$0xff] }
 0x1d1   : > { %11061 = vmatprep.mubr.msk.f32.mxu0 %vm302_vm4, %v12579_v32  ;;  %v3022_v32 = vld [vmem:[#allocation2 + $0x121] sm:$0xff] }
 0x1d4   : > { %11062 = vmatmul.mubr.msk.f32.gmra.mrb[22].mxu0 %vm302_vm4, %v12585_v37  ;;  %v3023_v37 = vld [vmem:[#allocation2 + $0x129] sm:$0xff] }
 0x1d5   : > { %11064 = vmatprep.mubr.msk.f32.mxu0 %vm302_vm4, %v12587_v38  ;;  %v3032_v38 = vld [vmem:[#allocation2 + $0x199] sm:$0xff] }
 0x1d8   : > { %11065 = vmatmul.mubr.msk.f32.gmra.mrb[24].mxu0 %vm302_vm4, %v12597_v41  ;;  %v14944_v41 = vld [vmem:[#allocation24_spill] sm:$0xff] }
 0x1d9   : > { %11067 = vmatprep.mubr.msk.f32.mxu0 %vm302_vm4, %v12599_v42  ;;  %v14945_v42 = vld [vmem:[#allocation27_spill] sm:$0xff] }
 0x1dc   : > { %11068 = vmatmul.mubr.msk.f32.gmra.mrb[26].mxu0 %vm302_vm4, %v12605_v2  ;;  %v14946_v2 = vld [vmem:[#allocation29_spill] sm:$0xff] }
 0x1dd   : > { %11070 = vmatprep.mubr.msk.f32.mxu0 %vm302_vm4, %v12804_v1  ;;  %v3918_v1 = vld [vmem:[#allocation2 + $0x1] sm:$0xff] }
 0x1de   : > { %11178 = vmatprep.mubr.msk.f32.mxu1 %vm223_vm1, %v3918_v1 }
 0x1e0   : > { %11071 = vmatmul.mubr.msk.f32.gmra.mrb[28].mxu0 %vm302_vm4, %v12810_v4  ;;  %v3917_v4 = vld [vmem:[%s14740_s3] sm:$0xff] }
 0x1e1   : > { %11073 = vmatprep.mubr.msk.f32.mxu0 %vm302_vm4, %v2642_v8 }
 0x1e4   : > { %11074 = vmatmul.mubr.msk.f32.gmra.mrb[30].mxu0 %vm302_vm4, %v2643_v9 }
 0x1e5   : > { %11078 = vmatprep.mubr.msk.f32.mxu0 %vm302_vm4, %v3002_v10 }
 0x1e8   : > { %11079 = vmatmul.mubr.msk.f32.vlgmr.msra.gmra.mrb[0].mxu0 %vm302_vm4, %v3003_v6 }
 0x1e9   : > { %11127 = vmatpush3.msk.msra.mxu0 %vm498_vm0, %v9661_v39  ;;  %11081 = vmatprep.mubr.msk.f32.mxu0 %vm302_vm4, %v3004_v11  ;;  %v14947_v39 = vld [vmem:[#allocation31_spill] sm:$0xff] }
 0x1ec   : > { %11082 = vmatmul.mubr.msk.f32.gmra.mrb[2].mxu0 %vm302_vm4, %v3005_v12 }
 0x1ed   : > { %11084 = vmatprep.mubr.msk.f32.mxu0 %vm302_vm4, %v3006_v13 }
 0x1f0   : > { %11085 = vmatmul.mubr.msk.f32.gmra.mrb[4].mxu0 %vm302_vm4, %v3007_v14 }
 0x1f1   : > { %11087 = vmatprep.mubr.msk.f32.mxu0 %vm302_vm4, %v3008_v15 }
 0x1f4   : > { %11088 = vmatmul.mubr.msk.f32.gmra.mrb[6].mxu0 %vm302_vm4, %v3009_v16 }
 0x1f5   : > { %11090 = vmatprep.mubr.msk.f32.mxu0 %vm302_vm4, %v3010_v17 }
 0x1f8   : > { %11091 = vmatmul.mubr.msk.f32.gmra.mrb[8].mxu0 %vm302_vm4, %v3011_v18 }
 0x1f9   : > { %11093 = vmatprep.mubr.msk.f32.mxu0 %vm302_vm4, %v3012_v19 }
 0x1fc   : > { %11094 = vmatmul.mubr.msk.f32.gmra.mrb[10].mxu0 %vm302_vm4, %v3013_v20 }
 0x1fd   : > { %11096 = vmatprep.mubr.msk.f32.mxu0 %vm302_vm4, %v3014_v21 }
 0x200   : > { %11097 = vmatmul.mubr.msk.f32.gmra.mrb[12].mxu0 %vm302_vm4, %v3015_v22 }
 0x201   : > { %11099 = vmatprep.mubr.msk.f32.mxu0 %vm302_vm4, %v3016_v23 }
 0x204   : > { %11100 = vmatmul.mubr.msk.f32.gmra.mrb[14].mxu0 %vm302_vm4, %v3017_v24 }
 0x205   : > { %11102 = vmatprep.mubr.msk.f32.mxu0 %vm302_vm4, %v3018_v25 }
 0x208   : > { %11103 = vmatmul.mubr.msk.f32.gmra.mrb[16].mxu0 %vm302_vm4, %v3019_v26 }
 0x209   : > { %11105 = vmatprep.mubr.msk.f32.mxu0 %vm302_vm4, %v3020_v27 }
 0x20c   : > { %11106 = vmatmul.mubr.msk.f32.gmra.mrb[18].mxu0 %vm302_vm4, %v3021_v31 }
 0x20d   : > { %11108 = vmatprep.mubr.msk.f32.mxu0 %vm302_vm4, %v3022_v32 }
 0x210   : > { %11109 = vmatmul.mubr.msk.f32.gmra.mrb[20].mxu0 %vm302_vm4, %v3023_v37 }
 0x211   : > { %11111 = vmatprep.mubr.msk.f32.mxu0 %vm302_vm4, %v12448_v60  ;;  %v3033_v60 = vld [vmem:[#allocation2 + $0x1a1] sm:$0xff] }
 0x214   : > { %11112 = vmatmul.mubr.msk.f32.gmra.mrb[22].mxu0 %vm302_vm4, %v12454_v61  ;;  %v14942_v61 = vld [vmem:[#allocation20_spill] sm:$0xff] }
 0x215   : > { %11114 = vmatprep.mubr.msk.f32.mxu0 %vm302_vm4, %v12456_v62  ;;  %v14943_v62 = vld [vmem:[#allocation22_spill] sm:$0xff] }
 0x218   : > { %11115 = vmatmul.mubr.msk.f32.gmra.mrb[24].mxu0 %vm302_vm4, %v14914_v28  ;;  %v13141_v28 = vld [vmem:[%s14740_s3 + $0x10] sm:$0xff] }
 0x219   : > { %11117 = vmatprep.mubr.msk.f32.mxu0 %vm302_vm4, %v14915_v29  ;;  %v13147_v29 = vld [vmem:[%s14739_s2] ss:$0 sm:$0xff] }
 0x21c   : > { %11118 = vmatmul.mubr.msk.f32.gmra.mrb[26].mxu0 %vm302_vm4, %v14916_v33 }
 0x21d   : > { %11120 = vmatprep.mubr.msk.f32.mxu0 %vm302_vm4, %v12877_v30 }
 0x220   : > { %11121 = vmatmul.mubr.msk.f32.gmra.mrb[28].mxu0 %vm302_vm4, %v12883_v34 }
 0x221   : > { %11123 = vmatprep.mubr.msk.f32.mxu0 %vm302_vm4, %v3032_v38 }
 0x224   : > { %11124 = vmatmul.mubr.msk.f32.gmra.mrb[30].mxu0 %vm302_vm4, %v3033_v60 }
 0x225   : > { %11128 = vmatprep.mubr.msk.f32.mxu0 %vm302_vm4, %v14919_v44 }
 0x228   : > { %11129 = vmatmul.mubr.msk.f32.vlgmr.msra.gmra.mrb[0].mxu0 %vm302_vm4, %v14920_v45 }
 0x229   : > { %11131 = vmatprep.mubr.msk.f32.mxu0 %vm302_vm4, %v14921_v46 }
 0x22c   : > { %11132 = vmatmul.mubr.msk.f32.gmra.mrb[2].mxu0 %vm302_vm4, %v14922_v47 }
 0x22d   : > { %11134 = vmatprep.mubr.msk.f32.mxu0 %vm302_vm4, %v14923_v48 }
 0x230   : > { %11135 = vmatmul.mubr.msk.f32.gmra.mrb[4].mxu0 %vm302_vm4, %v14924_v49 }
 0x231   : > { %11137 = vmatprep.mubr.msk.f32.mxu0 %vm302_vm4, %v14925_v50 }
 0x234   : > { %11138 = vmatmul.mubr.msk.f32.gmra.mrb[6].mxu0 %vm302_vm4, %v14926_v51 }
 0x235   : > { %11140 = vmatprep.mubr.msk.f32.mxu0 %vm302_vm4, %v14927_v52 }
 0x238   : > { %11141 = vmatmul.mubr.msk.f32.gmra.mrb[8].mxu0 %vm302_vm4, %v14928_v53 }
 0x239   : > { %11143 = vmatprep.mubr.msk.f32.mxu0 %vm302_vm4, %v14929_v54 }
 0x23c   : > { %11144 = vmatmul.mubr.msk.f32.gmra.mrb[10].mxu0 %vm302_vm4, %v14930_v55 }
 0x23d   : > { %11146 = vmatprep.mubr.msk.f32.mxu0 %vm302_vm4, %v14942_v61 }
 0x240   : > { %11147 = vmatmul.mubr.msk.f32.gmra.mrb[12].mxu0 %vm302_vm4, %v14932_v57 }
 0x241   : > { %11149 = vmatprep.mubr.msk.f32.mxu0 %vm302_vm4, %v14943_v62 }
 0x244   : > { %11150 = vmatmul.mubr.msk.f32.gmra.mrb[14].mxu0 %vm302_vm4, %v14934_v59 }
 0x245   : > { %11152 = vmatprep.mubr.msk.f32.mxu0 %vm302_vm4, %v14944_v41 }
 0x248   : > { %11153 = vmatmul.mubr.msk.f32.gmra.mrb[16].mxu0 %vm302_vm4, %v14936_v7 }
 0x249   : > { %11155 = vmatprep.mubr.msk.f32.mxu0 %vm302_vm4, %v14937_v35 }
 0x24c   : > { %11156 = vmatmul.mubr.msk.f32.gmra.mrb[18].mxu0 %vm302_vm4, %v14945_v42 }
 0x24d   : > { %11158 = vmatprep.mubr.msk.f32.mxu0 %vm302_vm4, %v14939_v56 }
 0x250   : > { %11159 = vmatmul.mubr.msk.f32.gmra.mrb[20].mxu0 %vm302_vm4, %v12712_v40  ;;  %v3422_v40 = vld [vmem:[#allocation2 + $0x19a] sm:$0xff] }
 0x251   : > { %11161 = vmatprep.mubr.msk.f32.mxu0 %vm302_vm4, %v14946_v2 }
 0x254   : > { %11162 = vmatmul.mubr.msk.f32.gmra.mrb[22].mxu0 %vm302_vm4, %v12720_v0  ;;  %v3423_v0 = vld [vmem:[#allocation2 + $0x1a2] sm:$0xff] }
 0x255   : > { %11164 = vmatprep.mubr.msk.f32.mxu0 %vm302_vm4, %v14941_v63 }
 0x258   : > { %11165 = vmatmul.mubr.msk.f32.gmra.mrb[24].mxu0 %vm302_vm4, %v12728_v3  ;;  %v9696_v3 = vld [vmem:[%s14740_s3 + $0x8] sm:$0xff] }
 0x259   : > { %11167 = vmatprep.mubr.msk.f32.mxu0 %vm302_vm4, %v14947_v39  ;;  %11176 = vmatprep.subr.mxu1 %v9696_v3 }
 0x25a   : > { %11177 = vmatpush3.msra.mxu1 %v9696_v3 }
 0x25b   : > { %11226 = vmatprep.subr.mxu1 %v3917_v4 }
 0x25c   : > { %11168 = vmatmul.mubr.msk.f32.gmra.mrb[26].mxu0 %vm302_vm4, %v12736_v5  ;;  %v3919_v5 = vld [vmem:[#allocation2 + $0x9] sm:$0xff] }
 0x25d   : > { %11170 = vmatprep.mubr.msk.f32.mxu0 %vm302_vm4, %v12950_v43  ;;  %11179 = vmatmul.mubr.msk.f32.vlgmr.msra.gmra.mrb[0].mxu1 %vm223_vm1, %v3919_v5 }
 0x25e   : > { %11227 = vmatpush3.msra.mxu1 %v3917_v4 }
 0x25f   : > { %11276 = vmatprep.subr.mxu1 %v13141_v28 }
 0x260   : > { %11171 = vmatmul.mubr.msk.f32.gmra.mrb[28].mxu0 %vm302_vm4, %v12956_v58 }
 0x261   : > { %11173 = vmatprep.mubr.msk.f32.mxu0 %vm302_vm4, %v3422_v40 }
 0x264   : > { %11174 = vmatmul.mubr.msk.f32.gmra.mrb[30].mxu0 %vm302_vm4, %v3423_v0 }
 0x2fb   : > { %v11130_v30 = vpop.f32.mrb[0].mxu0 }
 0x2fc   : > { %v3790_v33 = vadd.f32 %v11130_v30, %v13147_v29  ;;  %v3591_v34 = vpop.f32.mrb[1].mxu0 }
 0x2fd   : > { %v3789_v36 = vadd.f32 %v13147_v29, %v3591_v34 }
 0x2fe   : > { %v3822_v44 = vmax.f32 %v3790_v33, 0.0 }
 0x2ff   : > { %v3821_v45 = vmax.f32 %v3789_v36, 0.0  ;;  %v11133_v46 = vpop.f32.mrb[2].mxu0 }
 0x300   : > { %3854 = vst.msk [vmem:[#allocation2 + $0x21] sm:$0xff] %vm223_vm1, %v3822_v44  ;;  %v3792_v47 = vadd.f32 %v11133_v46, %v13147_v29  ;;  %v3601_v48 = vpop.f32.mrb[3].mxu0 }
 0x301   : > { %3853 = vst.msk [vmem:[#allocation2 + $0x19] sm:$0xff] %vm223_vm1, %v3821_v45  ;;  %v3791_v49 = vadd.f32 %v13147_v29, %v3601_v48 }
 0x302   : > { %v3824_v50 = vmax.f32 %v3792_v47, 0.0 }
 0x303   : > { %v3823_v51 = vmax.f32 %v3791_v49, 0.0  ;;  %v11136_v52 = vpop.f32.mrb[4].mxu0 }
 0x304   : > { %3856 = vst.msk [vmem:[#allocation2 + $0x39] sm:$0xff] %vm223_vm1, %v3824_v50  ;;  %v3794_v53 = vadd.f32 %v11136_v52, %v13147_v29  ;;  %v3611_v54 = vpop.f32.mrb[5].mxu0 }
 0x305   : > { %3855 = vst.msk [vmem:[#allocation2 + $0x31] sm:$0xff] %vm223_vm1, %v3823_v51  ;;  %v3793_v55 = vadd.f32 %v13147_v29, %v3611_v54 }
 0x306   : > { %v3826_v56 = vmax.f32 %v3794_v53, 0.0 }
 0x307   : > { %v3825_v57 = vmax.f32 %v3793_v55, 0.0  ;;  %v11139_v58 = vpop.f32.mrb[6].mxu0  ;;  %v13167_v43 = vld [vmem:[#allocation2 + $0x21] sm:$0xff] }
 0x308   : > { %3858 = vst.msk [vmem:[#allocation2 + $0x51] sm:$0xff] %vm223_vm1, %v3826_v56  ;;  %v3796_v59 = vadd.f32 %v11139_v58, %v13147_v29  ;;  %v3621_v63 = vpop.f32.mrb[7].mxu0  ;;  %v13161_v7 = vld [vmem:[#allocation2 + $0x19] sm:$0xff] }
 0x309   : > { %3857 = vst.msk [vmem:[#allocation2 + $0x49] sm:$0xff] %vm223_vm1, %v3825_v57  ;;  %v3795_v35 = vadd.f32 %v13147_v29, %v3621_v63  ;;  %11181 = vmatprep.mubr.msk.f32.mxu1 %vm223_vm1, %v13161_v7 }
 0x30a   : > { %v3828_v8 = vmax.f32 %v3796_v59, 0.0  ;;  %11182 = vmatmul.mubr.msk.f32.gmra.mrb[2].mxu1 %vm223_vm1, %v13167_v43 }
 0x30b   : > { %v3827_v9 = vmax.f32 %v3795_v35, 0.0  ;;  %v11142_v10 = vpop.f32.mrb[8].mxu0  ;;  %v13179_v14 = vld [vmem:[#allocation2 + $0x39] sm:$0xff] }
 0x30c   : > { %3860 = vst.msk [vmem:[#allocation2 + $0x69] sm:$0xff] %vm223_vm1, %v3828_v8  ;;  %v3798_v6 = vadd.f32 %v11142_v10, %v13147_v29  ;;  %v3631_v11 = vpop.f32.mrb[9].mxu0  ;;  %v13173_v12 = vld [vmem:[#allocation2 + $0x31] sm:$0xff] }
 0x30d   : > { %3859 = vst.msk [vmem:[#allocation2 + $0x61] sm:$0xff] %vm223_vm1, %v3827_v9  ;;  %v3797_v13 = vadd.f32 %v13147_v29, %v3631_v11  ;;  %11184 = vmatprep.mubr.msk.f32.mxu1 %vm223_vm1, %v13173_v12 }
 0x30e   : > { %v3830_v15 = vmax.f32 %v3798_v6, 0.0  ;;  %11185 = vmatmul.mubr.msk.f32.gmra.mrb[4].mxu1 %vm223_vm1, %v13179_v14 }
 0x30f   : > { %v3829_v16 = vmax.f32 %v3797_v13, 0.0  ;;  %v11145_v17 = vpop.f32.mrb[10].mxu0  ;;  %v13191_v22 = vld [vmem:[#allocation2 + $0x51] sm:$0xff] }
 0x310   : > { %3862 = vst.msk [vmem:[#allocation2 + $0x81] sm:$0xff] %vm223_vm1, %v3830_v15  ;;  %v3800_v18 = vadd.f32 %v11145_v17, %v13147_v29  ;;  %v3641_v19 = vpop.f32.mrb[11].mxu0  ;;  %v13185_v20 = vld [vmem:[#allocation2 + $0x49] sm:$0xff] }
 0x311   : > { %3861 = vst.msk [vmem:[#allocation2 + $0x79] sm:$0xff] %vm223_vm1, %v3829_v16  ;;  %v3799_v21 = vadd.f32 %v13147_v29, %v3641_v19  ;;  %11187 = vmatprep.mubr.msk.f32.mxu1 %vm223_vm1, %v13185_v20 }
 0x312   : > { %v3832_v23 = vmax.f32 %v3800_v18, 0.0  ;;  %11188 = vmatmul.mubr.msk.f32.gmra.mrb[6].mxu1 %vm223_vm1, %v13191_v22 }
 0x313   : > { %v3831_v24 = vmax.f32 %v3799_v21, 0.0  ;;  %v11148_v25 = vpop.f32.mrb[12].mxu0  ;;  %v13203_v37 = vld [vmem:[#allocation2 + $0x69] sm:$0xff] }
 0x314   : > { %3864 = vst.msk [vmem:[#allocation2 + $0x99] sm:$0xff] %vm223_vm1, %v3832_v23  ;;  %v3802_v26 = vadd.f32 %v11148_v25, %v13147_v29  ;;  %v3651_v27 = vpop.f32.mrb[13].mxu0  ;;  %v13197_v31 = vld [vmem:[#allocation2 + $0x61] sm:$0xff] }
 0x315   : > { %3863 = vst.msk [vmem:[#allocation2 + $0x91] sm:$0xff] %vm223_vm1, %v3831_v24  ;;  %v3801_v32 = vadd.f32 %v13147_v29, %v3651_v27  ;;  %11190 = vmatprep.mubr.msk.f32.mxu1 %vm223_vm1, %v13197_v31 }
 0x316   : > { %v3834_v38 = vmax.f32 %v3802_v26, 0.0  ;;  %11191 = vmatmul.mubr.msk.f32.gmra.mrb[8].mxu1 %vm223_vm1, %v13203_v37 }
 0x317   : > { %v3833_v60 = vmax.f32 %v3801_v32, 0.0  ;;  %v11151_v61 = vpop.f32.mrb[14].mxu0  ;;  %v13215_v39 = vld [vmem:[#allocation2 + $0x81] sm:$0xff] }
 0x318   : > { %3866 = vst.msk [vmem:[#allocation2 + $0xb1] sm:$0xff] %vm223_vm1, %v3834_v38  ;;  %v3804_v62 = vadd.f32 %v11151_v61, %v13147_v29  ;;  %v3661_v41 = vpop.f32.mrb[15].mxu0  ;;  %v13209_v42 = vld [vmem:[#allocation2 + $0x79] sm:$0xff] }
 0x319   : > { %3865 = vst.msk [vmem:[#allocation2 + $0xa9] sm:$0xff] %vm223_vm1, %v3833_v60  ;;  %v3803_v2 = vadd.f32 %v13147_v29, %v3661_v41  ;;  %11193 = vmatprep.mubr.msk.f32.mxu1 %vm223_vm1, %v13209_v42 }
 0x31a   : > { %v3836_v40 = vmax.f32 %v3804_v62, 0.0  ;;  %11194 = vmatmul.mubr.msk.f32.gmra.mrb[10].mxu1 %vm223_vm1, %v13215_v39 }
 0x31b   : > { %v3835_v0 = vmax.f32 %v3803_v2, 0.0  ;;  %v11154_v3 = vpop.f32.mrb[16].mxu0  ;;  %v13227_v33 = vld [vmem:[#allocation2 + $0x99] sm:$0xff] }
 0x31c   : > { %3868 = vst.msk [vmem:[#allocation2 + $0xc9] sm:$0xff] %vm223_vm1, %v3836_v40  ;;  %v3806_v1 = vadd.f32 %v11154_v3, %v13147_v29  ;;  %v3671_v5 = vpop.f32.mrb[17].mxu0  ;;  %v13221_v4 = vld [vmem:[#allocation2 + $0x91] sm:$0xff] }
 0x31d   : > { %3867 = vst.msk [vmem:[#allocation2 + $0xc1] sm:$0xff] %vm223_vm1, %v3835_v0  ;;  %v3805_v30 = vadd.f32 %v13147_v29, %v3671_v5  ;;  %11196 = vmatprep.mubr.msk.f32.mxu1 %vm223_vm1, %v13221_v4 }
 0x31e   : > { %v3838_v34 = vmax.f32 %v3806_v1, 0.0  ;;  %11197 = vmatmul.mubr.msk.f32.gmra.mrb[12].mxu1 %vm223_vm1, %v13227_v33 }
 0x31f   : > { %v3837_v36 = vmax.f32 %v3805_v30, 0.0  ;;  %v11157_v44 = vpop.f32.mrb[18].mxu0  ;;  %v13239_v49 = vld [vmem:[#allocation2 + $0xb1] sm:$0xff] }
 0x320   : > { %3870 = vst.msk [vmem:[#allocation2 + $0xe1] sm:$0xff] %vm223_vm1, %v3838_v34  ;;  %v3808_v45 = vadd.f32 %v11157_v44, %v13147_v29  ;;  %v3681_v46 = vpop.f32.mrb[19].mxu0  ;;  %v13233_v47 = vld [vmem:[#allocation2 + $0xa9] sm:$0xff] }
 0x321   : > { %3869 = vst.msk [vmem:[#allocation2 + $0xd9] sm:$0xff] %vm223_vm1, %v3837_v36  ;;  %v3807_v48 = vadd.f32 %v13147_v29, %v3681_v46  ;;  %11199 = vmatprep.mubr.msk.f32.mxu1 %vm223_vm1, %v13233_v47 }
 0x322   : > { %v3840_v50 = vmax.f32 %v3808_v45, 0.0  ;;  %11200 = vmatmul.mubr.msk.f32.gmra.mrb[14].mxu1 %vm223_vm1, %v13239_v49 }
 0x323   : > { %v3839_v51 = vmax.f32 %v3807_v48, 0.0  ;;  %v11160_v52 = vpop.f32.mrb[20].mxu0  ;;  %v13251_v57 = vld [vmem:[#allocation2 + $0xc9] sm:$0xff] }
 0x324   : > { %3872 = vst.msk [vmem:[#allocation2 + $0xf9] sm:$0xff] %vm223_vm1, %v3840_v50  ;;  %v3810_v53 = vadd.f32 %v11160_v52, %v13147_v29  ;;  %v3691_v54 = vpop.f32.mrb[21].mxu0  ;;  %v13245_v55 = vld [vmem:[#allocation2 + $0xc1] sm:$0xff] }
 0x325   : > { %3871 = vst.msk [vmem:[#allocation2 + $0xf1] sm:$0xff] %vm223_vm1, %v3839_v51  ;;  %v3809_v56 = vadd.f32 %v13147_v29, %v3691_v54  ;;  %11202 = vmatprep.mubr.msk.f32.mxu1 %vm223_vm1, %v13245_v55  ;;  %v3885_v54 = vld [vmem:[#allocation2] sm:$0xff] }
 0x326   : > { %v3842_v58 = vmax.f32 %v3810_v53, 0.0  ;;  %11203 = vmatmul.mubr.msk.f32.gmra.mrb[16].mxu1 %vm223_vm1, %v13251_v57 }
 0x327   : > { %v3841_v59 = vmax.f32 %v3809_v56, 0.0  ;;  %v11163_v63 = vpop.f32.mrb[22].mxu0  ;;  %v13263_v6 = vld [vmem:[#allocation2 + $0xe1] sm:$0xff] }
 0x328   : > { %3874 = vst.msk [vmem:[#allocation2 + $0x111] sm:$0xff] %vm223_vm1, %v3842_v58  ;;  %v3812_v35 = vadd.f32 %v11163_v63, %v13147_v29  ;;  %v3701_v8 = vpop.f32.mrb[23].mxu0  ;;  %v13257_v9 = vld [vmem:[#allocation2 + $0xd9] sm:$0xff]  ;;  %v3886_v58 = vld [vmem:[#allocation2 + $0x8] sm:$0xff] }
 0x329   : > { %3873 = vst.msk [vmem:[#allocation2 + $0x109] sm:$0xff] %vm223_vm1, %v3841_v59  ;;  %v3811_v10 = vadd.f32 %v13147_v29, %v3701_v8  ;;  %11205 = vmatprep.mubr.msk.f32.mxu1 %vm223_vm1, %v13257_v9  ;;  %v13337_v59 = vld [vmem:[%s14740_s3 + $0x18] sm:$0xff]  ;;  %v13350_v8 = vld [vmem:[#allocation2 + $0x30] sm:$0xff] }
 0x32a   : > { %v3844_v11 = vmax.f32 %v3812_v35, 0.0  ;;  %11206 = vmatmul.mubr.msk.f32.gmra.mrb[18].mxu1 %vm223_vm1, %v13263_v6  ;;  %v13340_v63 = vld [vmem:[#allocation2 + $0x18] sm:$0xff]  ;;  %v13346_v35 = vld [vmem:[#allocation2 + $0x20] sm:$0xff] }
 0x32b   : > { %v3843_v13 = vmax.f32 %v3811_v10, 0.0  ;;  %v11166_v15 = vpop.f32.mrb[24].mxu0  ;;  %v13275_v21 = vld [vmem:[#allocation2 + $0xf9] sm:$0xff] }
 0x32c   : > { %3876 = vst.msk [vmem:[#allocation2 + $0x129] sm:$0xff] %vm223_vm1, %v3844_v11  ;;  %v3814_v16 = vadd.f32 %v11166_v15, %v13147_v29  ;;  %v3711_v17 = vpop.f32.mrb[25].mxu0  ;;  %v13269_v18 = vld [vmem:[#allocation2 + $0xf1] sm:$0xff]  ;;  %v13370_v15 = vld [vmem:[#allocation2 + $0x68] sm:$0xff] }
 0x32d   : > { %3875 = vst.msk [vmem:[#allocation2 + $0x121] sm:$0xff] %vm223_vm1, %v3843_v13  ;;  %v3813_v19 = vadd.f32 %v13147_v29, %v3711_v17  ;;  %11208 = vmatprep.mubr.msk.f32.mxu1 %vm223_vm1, %v13269_v18  ;;  %v13354_v10 = vld [vmem:[#allocation2 + $0x38] sm:$0xff]  ;;  %v13362_v11 = vld [vmem:[#allocation2 + $0x50] sm:$0xff]  ;;  %v13366_v13 = vld [vmem:[#allocation2 + $0x60] sm:$0xff] }
 0x32e   : > { %v3846_v23 = vmax.f32 %v3814_v16, 0.0  ;;  %11209 = vmatmul.mubr.msk.f32.gmra.mrb[20].mxu1 %vm223_vm1, %v13275_v21  ;;  %v13374_v16 = vld [vmem:[#allocation2 + $0x78] sm:$0xff]  ;;  %v13378_v17 = vld [vmem:[#allocation2 + $0x80] sm:$0xff] }
 0x32f   : > { %v3845_v24 = vmax.f32 %v3813_v19, 0.0  ;;  %v11169_v25 = vpop.f32.mrb[26].mxu0  ;;  %v13287_v60 = vld [vmem:[#allocation2 + $0x111] sm:$0xff] }
 0x330   : > { %3878 = vst.msk [vmem:[#allocation2 + $0x141] sm:$0xff] %vm223_vm1, %v3846_v23  ;;  %v3816_v26 = vadd.f32 %v11169_v25, %v13147_v29  ;;  %v3721_v27 = vpop.f32.mrb[27].mxu0  ;;  %v13281_v32 = vld [vmem:[#allocation2 + $0x109] sm:$0xff]  ;;  %v13386_v23 = vld [vmem:[#allocation2 + $0x98] sm:$0xff] }
 0x331   : > { %3877 = vst.msk [vmem:[#allocation2 + $0x139] sm:$0xff] %vm223_vm1, %v3845_v24  ;;  %v3815_v38 = vadd.f32 %v13147_v29, %v3721_v27  ;;  %11211 = vmatprep.mubr.msk.f32.mxu1 %vm223_vm1, %v13281_v32  ;;  %v13382_v19 = vld [vmem:[#allocation2 + $0x90] sm:$0xff]  ;;  %v13390_v24 = vld [vmem:[#allocation2 + $0xa8] sm:$0xff] }
 0x332   : > { %v3848_v61 = vmax.f32 %v3816_v26, 0.0  ;;  %11212 = vmatmul.mubr.msk.f32.gmra.mrb[22].mxu1 %vm223_vm1, %v13287_v60  ;;  %v13394_v25 = vld [vmem:[#allocation2 + $0xb0] sm:$0xff]  ;;  %v13398_v26 = vld [vmem:[#allocation2 + $0xc0] sm:$0xff]  ;;  %v13402_v27 = vld [vmem:[#allocation2 + $0xc8] sm:$0xff] }
 0x333   : > { %v3847_v62 = vmax.f32 %v3815_v38, 0.0  ;;  %v11172_v41 = vpop.f32.mrb[28].mxu0  ;;  %v13299_v1 = vld [vmem:[#allocation2 + $0x129] sm:$0xff]  ;;  %v13406_v38 = vld [vmem:[#allocation2 + $0xd8] sm:$0xff] }
 0x334   : > { %3880 = vst.msk [vmem:[#allocation2 + $0x159] sm:$0xff] %vm223_vm1, %v3848_v61  ;;  %v3818_v2 = vadd.f32 %v11172_v41, %v13147_v29  ;;  %v3731_v40 = vpop.f32.mrb[29].mxu0  ;;  %v13293_v0 = vld [vmem:[#allocation2 + $0x121] sm:$0xff]  ;;  %v13418_v41 = vld [vmem:[#allocation2 + $0xf8] sm:$0xff] }
 0x335   : > { %3879 = vst.msk [vmem:[#allocation2 + $0x151] sm:$0xff] %vm223_vm1, %v3847_v62  ;;  %v3817_v3 = vadd.f32 %v13147_v29, %v3731_v40  ;;  %11214 = vmatprep.mubr.msk.f32.mxu1 %vm223_vm1, %v13293_v0  ;;  %v13410_v61 = vld [vmem:[#allocation2 + $0xe0] sm:$0xff]  ;;  %v13414_v62 = vld [vmem:[#allocation2 + $0xf0] sm:$0xff] }
 0x336   : > { %v3850_v5 = vmax.f32 %v3818_v2, 0.0  ;;  %11215 = vmatmul.mubr.msk.f32.gmra.mrb[24].mxu1 %vm223_vm1, %v13299_v1  ;;  %v13422_v2 = vld [vmem:[#allocation2 + $0x108] sm:$0xff]  ;;  %v13426_v40 = vld [vmem:[#allocation2 + $0x110] sm:$0xff] }
 0x337   : > { %v3849_v30 = vmax.f32 %v3817_v3, 0.0  ;;  %v11175_v34 = vpop.f32.mrb[30].mxu0  ;;  %v13311_v48 = vld [vmem:[#allocation2 + $0x141] sm:$0xff] }
 0x338   : > { %3882 = vst.msk [vmem:[#allocation2 + $0x171] sm:$0xff] %vm223_vm1, %v3850_v5  ;;  %v3820_v36 = vadd.f32 %v11175_v34, %v13147_v29  ;;  %v3741_v44 = vpop.f32.mrb[31].mxu0  ;;  %v13305_v45 = vld [vmem:[#allocation2 + $0x139] sm:$0xff]  ;;  %v13434_v5 = vld [vmem:[#allocation2 + $0x128] sm:$0xff] }
 0x339   : > { %3881 = vst.msk [vmem:[#allocation2 + $0x169] sm:$0xff] %vm223_vm1, %v3849_v30  ;;  %v3819_v46 = vadd.f32 %v13147_v29, %v3741_v44  ;;  %11217 = vmatprep.mubr.msk.f32.mxu1 %vm223_vm1, %v13305_v45  ;;  %v13430_v3 = vld [vmem:[#allocation2 + $0x120] sm:$0xff]  ;;  %v13438_v30 = vld [vmem:[#allocation2 + $0x138] sm:$0xff] }
 0x33a   : > { %v3852_v50 = vmax.f32 %v3820_v36, 0.0  ;;  %11218 = vmatmul.mubr.msk.f32.gmra.mrb[26].mxu1 %vm223_vm1, %v13311_v48  ;;  %v13442_v34 = vld [vmem:[#allocation2 + $0x140] sm:$0xff] }
 0x33b   : > { %v3851_v51 = vmax.f32 %v3819_v46, 0.0  ;;  %v13321_v29 = vld [vmem:[#allocation2 + $0x159] sm:$0xff] }
 0x33c   : > { %3884 = vst.msk [vmem:[#allocation2 + $0x189] sm:$0xff] %vm223_vm1, %v3852_v50  ;;  %v13316_v52 = vld [vmem:[#allocation2 + $0x151] sm:$0xff]  ;;  %v4594_v50 = vld [vmem:[#allocation2 + $0x2] sm:$0xff] }
 0x33d   : > { %3883 = vst.msk [vmem:[#allocation2 + $0x181] sm:$0xff] %vm223_vm1, %v3851_v51  ;;  %11220 = vmatprep.mubr.msk.f32.mxu1 %vm223_vm1, %v13316_v52  ;;  %v13446_v36 = vld [vmem:[#allocation2 + $0x150] sm:$0xff]  ;;  %v13450_v44 = vld [vmem:[#allocation2 + $0x158] sm:$0xff] }
 0x33e   : > { %11221 = vmatmul.mubr.msk.f32.gmra.mrb[28].mxu1 %vm223_vm1, %v13321_v29 }
 0x33f   : > { %v13329_v56 = vld [vmem:[#allocation2 + $0x171] sm:$0xff] }
 0x340   : > { %v13325_v53 = vld [vmem:[#allocation2 + $0x169] sm:$0xff]  ;;  %14949 = vst [vmem:[#allocation4_spill] sm:$0xff] %v13329_v56 }
 0x341   : > { %14948 = vst [vmem:[#allocation3_spill] sm:$0xff] %v13325_v53  ;;  %11223 = vmatprep.mubr.msk.f32.mxu1 %vm223_vm1, %v13325_v53  ;;  %v13454_v46 = vld [vmem:[#allocation2 + $0x168] sm:$0xff]  ;;  %v13458_v51 = vld [vmem:[#allocation2 + $0x170] sm:$0xff] }
 0x342   : > { %11224 = vmatmul.mubr.msk.f32.gmra.mrb[30].mxu1 %vm223_vm1, %v13329_v56  ;;  %v13469_v56 = vld [vmem:[#allocation2 + $0x1a] sm:$0xff]  ;;  %v13475_v53 = vld [vmem:[#allocation2 + $0x22] sm:$0xff] }
 0x343   : > { %11228 = vmatprep.mubr.msk.f32.mxu1 %vm223_vm1, %v3885_v54  ;;  %v4595_v54 = vld [vmem:[#allocation2 + $0xa] sm:$0xff]  ;;  %14950 = vst [vmem:[#allocation5_spill] sm:$0xff] %v13469_v56  ;;  %14951 = vst [vmem:[#allocation6_spill] sm:$0xff] %v13475_v53 }
 0x346   : > { %11229 = vmatmul.mubr.msk.f32.vlgmr.msra.gmra.mrb[0].mxu1 %vm223_vm1, %v3886_v58  ;;  %v13466_v58 = vld [vmem:[%s14740_s3 + $0x20] sm:$0xff] }
 0x347   : > { %11277 = vmatpush3.msra.mxu1 %v13141_v28  ;;  %11231 = vmatprep.mubr.msk.f32.mxu1 %vm223_vm1, %v13340_v63  ;;  %v13358_v28 = vld [vmem:[#allocation2 + $0x48] sm:$0xff] }
 0x348   : > { %11326 = vmatprep.subr.mxu1 %v13337_v59 }
 0x34a   : > { %11232 = vmatmul.mubr.msk.f32.gmra.mrb[2].mxu1 %vm223_vm1, %v13346_v35 }
 0x34b   : > { %11234 = vmatprep.mubr.msk.f32.mxu1 %vm223_vm1, %v13350_v8 }
 0x34e   : > { %11235 = vmatmul.mubr.msk.f32.gmra.mrb[4].mxu1 %vm223_vm1, %v13354_v10 }
 0x34f   : > { %11237 = vmatprep.mubr.msk.f32.mxu1 %vm223_vm1, %v13358_v28 }
 0x352   : > { %11238 = vmatmul.mubr.msk.f32.gmra.mrb[6].mxu1 %vm223_vm1, %v13362_v11 }
 0x353   : > { %11240 = vmatprep.mubr.msk.f32.mxu1 %vm223_vm1, %v13366_v13 }
 0x356   : > { %11241 = vmatmul.mubr.msk.f32.gmra.mrb[8].mxu1 %vm223_vm1, %v13370_v15 }
 0x357   : > { %11243 = vmatprep.mubr.msk.f32.mxu1 %vm223_vm1, %v13374_v16 }
 0x35a   : > { %11244 = vmatmul.mubr.msk.f32.gmra.mrb[10].mxu1 %vm223_vm1, %v13378_v17 }
 0x35b   : > { %11246 = vmatprep.mubr.msk.f32.mxu1 %vm223_vm1, %v13382_v19 }
 0x35e   : > { %11247 = vmatmul.mubr.msk.f32.gmra.mrb[12].mxu1 %vm223_vm1, %v13386_v23 }
 0x35f   : > { %11249 = vmatprep.mubr.msk.f32.mxu1 %vm223_vm1, %v13390_v24 }
 0x362   : > { %11250 = vmatmul.mubr.msk.f32.gmra.mrb[14].mxu1 %vm223_vm1, %v13394_v25 }
 0x363   : > { %11252 = vmatprep.mubr.msk.f32.mxu1 %vm223_vm1, %v13398_v26 }
 0x366   : > { %11253 = vmatmul.mubr.msk.f32.gmra.mrb[16].mxu1 %vm223_vm1, %v13402_v27 }
 0x367   : > { %11255 = vmatprep.mubr.msk.f32.mxu1 %vm223_vm1, %v13406_v38 }
 0x36a   : > { %11256 = vmatmul.mubr.msk.f32.gmra.mrb[18].mxu1 %vm223_vm1, %v13410_v61 }
 0x36b   : > { %11258 = vmatprep.mubr.msk.f32.mxu1 %vm223_vm1, %v13414_v62 }
 0x36e   : > { %11259 = vmatmul.mubr.msk.f32.gmra.mrb[20].mxu1 %vm223_vm1, %v13418_v41 }
 0x36f   : > { %11261 = vmatprep.mubr.msk.f32.mxu1 %vm223_vm1, %v13422_v2 }
 0x372   : > { %11262 = vmatmul.mubr.msk.f32.gmra.mrb[22].mxu1 %vm223_vm1, %v13426_v40 }
 0x373   : > { %11264 = vmatprep.mubr.msk.f32.mxu1 %vm223_vm1, %v13430_v3 }
 0x376   : > { %11265 = vmatmul.mubr.msk.f32.gmra.mrb[24].mxu1 %vm223_vm1, %v13434_v5 }
 0x377   : > { %11267 = vmatprep.mubr.msk.f32.mxu1 %vm223_vm1, %v13438_v30 }
 0x37a   : > { %11268 = vmatmul.mubr.msk.f32.gmra.mrb[26].mxu1 %vm223_vm1, %v13442_v34 }
 0x37b   : > { %11270 = vmatprep.mubr.msk.f32.mxu1 %vm223_vm1, %v13446_v36 }
 0x37e   : > { %11271 = vmatmul.mubr.msk.f32.gmra.mrb[28].mxu1 %vm223_vm1, %v13450_v44 }
 0x37f   : > { %11273 = vmatprep.mubr.msk.f32.mxu1 %vm223_vm1, %v13454_v46 }
 0x382   : > { %11274 = vmatmul.mubr.msk.f32.gmra.mrb[30].mxu1 %vm223_vm1, %v13458_v51 }
 0x383   : > { %11278 = vmatprep.mubr.msk.f32.mxu1 %vm223_vm1, %v4594_v50  ;;  %v13479_v50 = vld [vmem:[#allocation2 + $0x32] sm:$0xff] }
 0x384   : > { %14952 = vst [vmem:[#allocation7_spill] sm:$0xff] %v13479_v50 }
 0x386   : > { %11279 = vmatmul.mubr.msk.f32.vlgmr.msra.gmra.mrb[0].mxu1 %vm223_vm1, %v4595_v54  ;;  %v13483_v54 = vld [vmem:[#allocation2 + $0x3a] sm:$0xff] }
 0x387   : > { %11327 = vmatpush3.msra.mxu1 %v13337_v59  ;;  %11281 = vmatprep.mubr.msk.f32.mxu1 %vm223_vm1, %v13469_v56  ;;  %14953 = vst [vmem:[#allocation8_spill] sm:$0xff] %v13483_v54  ;;  %v13487_v59 = vld [vmem:[#allocation2 + $0x4a] sm:$0xff]  ;;  %v13491_v56 = vld [vmem:[#allocation2 + $0x52] sm:$0xff] }
 0x388   : > { %11376 = vmatprep.subr.mxu1 %v13466_v58  ;;  %14954 = vst [vmem:[#allocation9_spill] sm:$0xff] %v13487_v59  ;;  %14955 = vst [vmem:[#allocation10_spill] sm:$0xff] %v13491_v56 }
 0x38a   : > { %11282 = vmatmul.mubr.msk.f32.gmra.mrb[2].mxu1 %vm223_vm1, %v13475_v53  ;;  %v13495_v53 = vld [vmem:[#allocation2 + $0x62] sm:$0xff] }
 0x38b   : > { %11284 = vmatprep.mubr.msk.f32.mxu1 %vm223_vm1, %v13479_v50  ;;  %14956 = vst [vmem:[#allocation11_spill] sm:$0xff] %v13495_v53  ;;  %v13499_v50 = vld [vmem:[#allocation2 + $0x6a] sm:$0xff] }
 0x38c   : > { %14957 = vst [vmem:[#allocation12_spill] sm:$0xff] %v13499_v50 }
 0x38e   : > { %11285 = vmatmul.mubr.msk.f32.gmra.mrb[4].mxu1 %vm223_vm1, %v13483_v54  ;;  %v13503_v54 = vld [vmem:[#allocation2 + $0x7a] sm:$0xff] }
 0x38f   : > { %11287 = vmatprep.mubr.msk.f32.mxu1 %vm223_vm1, %v13487_v59  ;;  %14958 = vst [vmem:[#allocation13_spill] sm:$0xff] %v13503_v54  ;;  %v13507_v59 = vld [vmem:[#allocation2 + $0x82] sm:$0xff] }
 0x390   : > { %14959 = vst [vmem:[#allocation14_spill] sm:$0xff] %v13507_v59 }
 0x392   : > { %11288 = vmatmul.mubr.msk.f32.gmra.mrb[6].mxu1 %vm223_vm1, %v13491_v56  ;;  %v13511_v56 = vld [vmem:[#allocation2 + $0x92] sm:$0xff] }
 0x393   : > { %11290 = vmatprep.mubr.msk.f32.mxu1 %vm223_vm1, %v13495_v53  ;;  %14960 = vst [vmem:[#allocation15_spill] sm:$0xff] %v13511_v56  ;;  %v13515_v53 = vld [vmem:[#allocation2 + $0x9a] sm:$0xff] }
 0x394   : > { %14961 = vst [vmem:[#allocation16_spill] sm:$0xff] %v13515_v53 }
 0x396   : > { %11291 = vmatmul.mubr.msk.f32.gmra.mrb[8].mxu1 %vm223_vm1, %v13499_v50  ;;  %v13519_v50 = vld [vmem:[#allocation2 + $0xaa] sm:$0xff] }
 0x397   : > { %11293 = vmatprep.mubr.msk.f32.mxu1 %vm223_vm1, %v13503_v54  ;;  %14962 = vst [vmem:[#allocation17_spill] sm:$0xff] %v13519_v50  ;;  %v13523_v54 = vld [vmem:[#allocation2 + $0xb2] sm:$0xff] }
 0x398   : > { %14963 = vst [vmem:[#allocation18_spill] sm:$0xff] %v13523_v54 }
 0x39a   : > { %11294 = vmatmul.mubr.msk.f32.gmra.mrb[10].mxu1 %vm223_vm1, %v13507_v59  ;;  %v13527_v59 = vld [vmem:[#allocation2 + $0xc2] sm:$0xff] }
 0x39b   : > { %11296 = vmatprep.mubr.msk.f32.mxu1 %vm223_vm1, %v13511_v56  ;;  %14964 = vst [vmem:[#allocation19_spill] sm:$0xff] %v13527_v59  ;;  %v13531_v56 = vld [vmem:[#allocation2 + $0xca] sm:$0xff] }
 0x39c   : > { %14965 = vst [vmem:[#allocation21_spill] sm:$0xff] %v13531_v56 }
 0x39e   : > { %11297 = vmatmul.mubr.msk.f32.gmra.mrb[12].mxu1 %vm223_vm1, %v13515_v53  ;;  %v13535_v53 = vld [vmem:[#allocation2 + $0xda] sm:$0xff] }
 0x39f   : > { %11299 = vmatprep.mubr.msk.f32.mxu1 %vm223_vm1, %v13519_v50  ;;  %14966 = vst [vmem:[#allocation23_spill] sm:$0xff] %v13535_v53  ;;  %v13539_v50 = vld [vmem:[#allocation2 + $0xe2] sm:$0xff] }
 0x3a0   : > { %14967 = vst [vmem:[#allocation25_spill] sm:$0xff] %v13539_v50 }
 0x3a2   : > { %11300 = vmatmul.mubr.msk.f32.gmra.mrb[14].mxu1 %vm223_vm1, %v13523_v54  ;;  %v13543_v54 = vld [vmem:[#allocation2 + $0xf2] sm:$0xff] }
 0x3a3   : > { %11302 = vmatprep.mubr.msk.f32.mxu1 %vm223_vm1, %v13527_v59  ;;  %14968 = vst [vmem:[#allocation26_spill] sm:$0xff] %v13543_v54  ;;  %v13547_v59 = vld [vmem:[#allocation2 + $0xfa] sm:$0xff] }
 0x3a4   : > { %14969 = vst [vmem:[#allocation28_spill] sm:$0xff] %v13547_v59 }
 0x3a6   : > { %11303 = vmatmul.mubr.msk.f32.gmra.mrb[16].mxu1 %vm223_vm1, %v13531_v56  ;;  %v13551_v56 = vld [vmem:[#allocation2 + $0x10a] sm:$0xff] }
 0x3a7   : > { %11305 = vmatprep.mubr.msk.f32.mxu1 %vm223_vm1, %v13535_v53  ;;  %14970 = vst [vmem:[#allocation30_spill] sm:$0xff] %v13551_v56  ;;  %v13555_v53 = vld [vmem:[#allocation2 + $0x112] sm:$0xff] }
 0x3a8   : > { %14971 = vst [vmem:[#allocation20_spill] sm:$0xff] %v13555_v53 }
 0x3aa   : > { %11306 = vmatmul.mubr.msk.f32.gmra.mrb[18].mxu1 %vm223_vm1, %v13539_v50  ;;  %v13559_v50 = vld [vmem:[#allocation2 + $0x122] sm:$0xff] }
 0x3ab   : > { %11308 = vmatprep.mubr.msk.f32.mxu1 %vm223_vm1, %v13543_v54  ;;  %14972 = vst [vmem:[#allocation22_spill] sm:$0xff] %v13559_v50  ;;  %v13563_v54 = vld [vmem:[#allocation2 + $0x12a] sm:$0xff] }
 0x3ac   : > { %14973 = vst [vmem:[#allocation24_spill] sm:$0xff] %v13563_v54 }
 0x3ae   : > { %11309 = vmatmul.mubr.msk.f32.gmra.mrb[20].mxu1 %vm223_vm1, %v13547_v59  ;;  %v13567_v59 = vld [vmem:[#allocation2 + $0x13a] sm:$0xff] }
 0x3af   : > { %11311 = vmatprep.mubr.msk.f32.mxu1 %vm223_vm1, %v13551_v56  ;;  %14974 = vst [vmem:[#allocation27_spill] sm:$0xff] %v13567_v59  ;;  %v13571_v56 = vld [vmem:[#allocation2 + $0x142] sm:$0xff] }
 0x3b2   : > { %11312 = vmatmul.mubr.msk.f32.gmra.mrb[22].mxu1 %vm223_vm1, %v13555_v53  ;;  %v13575_v53 = vld [vmem:[#allocation2 + $0x152] sm:$0xff] }
 0x3b3   : > { %11314 = vmatprep.mubr.msk.f32.mxu1 %vm223_vm1, %v13559_v50  ;;  %14975 = vst [vmem:[#allocation29_spill] sm:$0xff] %v13575_v53  ;;  %v13579_v50 = vld [vmem:[#allocation2 + $0x15a] sm:$0xff] }
 0x3b6   : > { %11315 = vmatmul.mubr.msk.f32.gmra.mrb[24].mxu1 %vm223_vm1, %v13563_v54  ;;  %v13583_v54 = vld [vmem:[#allocation2 + $0x16a] sm:$0xff] }
 0x3b7   : > { %11317 = vmatprep.mubr.msk.f32.mxu1 %vm223_vm1, %v13567_v59  ;;  %14976 = vst [vmem:[#allocation31_spill] sm:$0xff] %v13583_v54  ;;  %v13587_v59 = vld [vmem:[#allocation2 + $0x172] sm:$0xff] }
 0x3ba   : > { %11318 = vmatmul.mubr.msk.f32.gmra.mrb[26].mxu1 %vm223_vm1, %v13571_v56 }
 0x3bb   : > { %11320 = vmatprep.mubr.msk.f32.mxu1 %vm223_vm1, %v13575_v53  ;;  %v9860_v53 = vld [vmem:[%s14740_s3 + $0x28] sm:$0xff] }
 0x3be   : > { %11321 = vmatmul.mubr.msk.f32.gmra.mrb[28].mxu1 %vm223_vm1, %v13579_v50 }
 0x3bf   : > { %11323 = vmatprep.mubr.msk.f32.mxu1 %vm223_vm1, %v13583_v54 }
 0x3c2   : > { %11324 = vmatmul.mubr.msk.f32.gmra.mrb[30].mxu1 %vm223_vm1, %v13587_v59 }
 0x3c3   : > { %11328 = vmatprep.mubr.msk.f32.mxu1 %vm223_vm1, %v13340_v63  ;;  %v13655_v63 = vld [vmem:[#allocation2 + $0x180] sm:$0xff] }
 0x3c6   : > { %11329 = vmatmul.mubr.msk.f32.vlgmr.msra.gmra.mrb[0].mxu1 %vm223_vm1, %v13346_v35  ;;  %v13659_v35 = vld [vmem:[#allocation2 + $0x188] sm:$0xff] }
 0x3c7   : > { %11377 = vmatpush3.msra.mxu1 %v13466_v58  ;;  %11331 = vmatprep.mubr.msk.f32.mxu1 %vm223_vm1, %v13350_v8  ;;  %v9893_v58 = vld [vmem:[%s14740_s3 + $0x30] sm:$0xff] }
 0x3c8   : > { %11426 = vmatprep.subr.mxu1 %v9860_v53 }
 0x3ca   : > { %11332 = vmatmul.mubr.msk.f32.gmra.mrb[2].mxu1 %vm223_vm1, %v13354_v10 }
 0x3cb   : > { %11334 = vmatprep.mubr.msk.f32.mxu1 %vm223_vm1, %v13358_v28 }
 0x3ce   : > { %11335 = vmatmul.mubr.msk.f32.gmra.mrb[4].mxu1 %vm223_vm1, %v13362_v11 }
 0x3cf   : > { %11337 = vmatprep.mubr.msk.f32.mxu1 %vm223_vm1, %v13366_v13 }
 0x3d2   : > { %11338 = vmatmul.mubr.msk.f32.gmra.mrb[6].mxu1 %vm223_vm1, %v13370_v15 }
 0x3d3   : > { %11340 = vmatprep.mubr.msk.f32.mxu1 %vm223_vm1, %v13374_v16 }
 0x3d6   : > { %11341 = vmatmul.mubr.msk.f32.gmra.mrb[8].mxu1 %vm223_vm1, %v13378_v17 }
 0x3d7   : > { %11343 = vmatprep.mubr.msk.f32.mxu1 %vm223_vm1, %v13382_v19 }
 0x3da   : > { %11344 = vmatmul.mubr.msk.f32.gmra.mrb[10].mxu1 %vm223_vm1, %v13386_v23 }
 0x3db   : > { %11346 = vmatprep.mubr.msk.f32.mxu1 %vm223_vm1, %v13390_v24 }
 0x3de   : > { %11347 = vmatmul.mubr.msk.f32.gmra.mrb[12].mxu1 %vm223_vm1, %v13394_v25 }
 0x3df   : > { %11349 = vmatprep.mubr.msk.f32.mxu1 %vm223_vm1, %v13398_v26 }
 0x3e2   : > { %11350 = vmatmul.mubr.msk.f32.gmra.mrb[14].mxu1 %vm223_vm1, %v13402_v27 }
 0x3e3   : > { %11352 = vmatprep.mubr.msk.f32.mxu1 %vm223_vm1, %v13406_v38 }
 0x3e6   : > { %11353 = vmatmul.mubr.msk.f32.gmra.mrb[16].mxu1 %vm223_vm1, %v13410_v61 }
 0x3e7   : > { %11355 = vmatprep.mubr.msk.f32.mxu1 %vm223_vm1, %v13414_v62 }
 0x3ea   : > { %11356 = vmatmul.mubr.msk.f32.gmra.mrb[18].mxu1 %vm223_vm1, %v13418_v41 }
 0x3eb   : > { %11358 = vmatprep.mubr.msk.f32.mxu1 %vm223_vm1, %v13422_v2 }
 0x3ee   : > { %11359 = vmatmul.mubr.msk.f32.gmra.mrb[20].mxu1 %vm223_vm1, %v13426_v40 }
 0x3ef   : > { %11361 = vmatprep.mubr.msk.f32.mxu1 %vm223_vm1, %v13430_v3 }
 0x3f2   : > { %11362 = vmatmul.mubr.msk.f32.gmra.mrb[22].mxu1 %vm223_vm1, %v13434_v5 }
 0x3f3   : > { %11364 = vmatprep.mubr.msk.f32.mxu1 %vm223_vm1, %v13438_v30 }
 0x3f6   : > { %11365 = vmatmul.mubr.msk.f32.gmra.mrb[24].mxu1 %vm223_vm1, %v13442_v34 }
 0x3f7   : > { %11367 = vmatprep.mubr.msk.f32.mxu1 %vm223_vm1, %v13446_v36 }
 0x3fa   : > { %11368 = vmatmul.mubr.msk.f32.gmra.mrb[26].mxu1 %vm223_vm1, %v13450_v44 }
 0x3fb   : > { %11370 = vmatprep.mubr.msk.f32.mxu1 %vm223_vm1, %v13454_v46 }
 0x3fe   : > { %11371 = vmatmul.mubr.msk.f32.gmra.mrb[28].mxu1 %vm223_vm1, %v13458_v51 }
 0x3ff   : > { %11373 = vmatprep.mubr.msk.f32.mxu1 %vm223_vm1, %v13655_v63 }
 0x402   : > { %11374 = vmatmul.mubr.msk.f32.gmra.mrb[30].mxu1 %vm223_vm1, %v13659_v35 }
 0x403   : > { %11378 = vmatprep.mubr.msk.f32.mxu1 %vm223_vm1, %v13161_v7  ;;  %v14977_v7 = vld [vmem:[#allocation3_spill] sm:$0xff] }
 0x406   : > { %11379 = vmatmul.mubr.msk.f32.vlgmr.msra.gmra.mrb[0].mxu1 %vm223_vm1, %v13167_v43  ;;  %v14978_v43 = vld [vmem:[#allocation4_spill] sm:$0xff] }
 0x407   : > { %11427 = vmatpush3.msra.mxu1 %v9860_v53  ;;  %11381 = vmatprep.mubr.msk.f32.mxu1 %vm223_vm1, %v13173_v12  ;;  %v13726_v12 = vld [vmem:[#allocation2 + $0x181] sm:$0xff]  ;;  %v14986_v53 = vld [vmem:[#allocation12_spill] sm:$0xff] }
 0x408   : > { %11476 = vmatprep.subr.mxu1 %v9893_v58 }
 0x40a   : > { %11382 = vmatmul.mubr.msk.f32.gmra.mrb[2].mxu1 %vm223_vm1, %v13179_v14  ;;  %v13730_v14 = vld [vmem:[#allocation2 + $0x189] sm:$0xff] }
 0x40b   : > { %11384 = vmatprep.mubr.msk.f32.mxu1 %vm223_vm1, %v13185_v20  ;;  %v14979_v20 = vld [vmem:[#allocation5_spill] sm:$0xff] }
 0x40e   : > { %11385 = vmatmul.mubr.msk.f32.gmra.mrb[4].mxu1 %vm223_vm1, %v13191_v22  ;;  %v9926_v22 = vld [vmem:[%s14740_s3 + $0x38] sm:$0xff] }
 0x40f   : > { %11387 = vmatprep.mubr.msk.f32.mxu1 %vm223_vm1, %v13197_v31  ;;  %v14980_v31 = vld [vmem:[#allocation6_spill] sm:$0xff] }
 0x412   : > { %11388 = vmatmul.mubr.msk.f32.gmra.mrb[6].mxu1 %vm223_vm1, %v13203_v37  ;;  %v14981_v37 = vld [vmem:[#allocation7_spill] sm:$0xff] }
 0x413   : > { %11390 = vmatprep.mubr.msk.f32.mxu1 %vm223_vm1, %v13209_v42  ;;  %v14982_v42 = vld [vmem:[#allocation8_spill] sm:$0xff] }
 0x416   : > { %11391 = vmatmul.mubr.msk.f32.gmra.mrb[8].mxu1 %vm223_vm1, %v13215_v39  ;;  %v14983_v39 = vld [vmem:[#allocation9_spill] sm:$0xff] }
 0x417   : > { %11393 = vmatprep.mubr.msk.f32.mxu1 %vm223_vm1, %v13221_v4  ;;  %v14984_v4 = vld [vmem:[#allocation10_spill] sm:$0xff] }
 0x41a   : > { %11394 = vmatmul.mubr.msk.f32.gmra.mrb[10].mxu1 %vm223_vm1, %v13227_v33  ;;  %v14985_v33 = vld [vmem:[#allocation11_spill] sm:$0xff] }
 0x41b   : > { %11396 = vmatprep.mubr.msk.f32.mxu1 %vm223_vm1, %v13233_v47 }
 0x41e   : > { %11397 = vmatmul.mubr.msk.f32.gmra.mrb[12].mxu1 %vm223_vm1, %v13239_v49 }
 0x41f   : > { %11399 = vmatprep.mubr.msk.f32.mxu1 %vm223_vm1, %v13245_v55 }
 0x422   : > { %11400 = vmatmul.mubr.msk.f32.gmra.mrb[14].mxu1 %vm223_vm1, %v13251_v57 }
 0x423   : > { %11402 = vmatprep.mubr.msk.f32.mxu1 %vm223_vm1, %v13257_v9 }
 0x426   : > { %11403 = vmatmul.mubr.msk.f32.gmra.mrb[16].mxu1 %vm223_vm1, %v13263_v6 }
 0x427   : > { %11405 = vmatprep.mubr.msk.f32.mxu1 %vm223_vm1, %v13269_v18 }
 0x42a   : > { %11406 = vmatmul.mubr.msk.f32.gmra.mrb[18].mxu1 %vm223_vm1, %v13275_v21 }
 0x42b   : > { %11408 = vmatprep.mubr.msk.f32.mxu1 %vm223_vm1, %v13281_v32 }
 0x42e   : > { %11409 = vmatmul.mubr.msk.f32.gmra.mrb[20].mxu1 %vm223_vm1, %v13287_v60 }
 0x42f   : > { %11411 = vmatprep.mubr.msk.f32.mxu1 %vm223_vm1, %v13293_v0 }
 0x432   : > { %11412 = vmatmul.mubr.msk.f32.gmra.mrb[22].mxu1 %vm223_vm1, %v13299_v1 }
 0x433   : > { %11414 = vmatprep.mubr.msk.f32.mxu1 %vm223_vm1, %v13305_v45 }
 0x436   : > { %11415 = vmatmul.mubr.msk.f32.gmra.mrb[24].mxu1 %vm223_vm1, %v13311_v48 }
 0x437   : > { %11417 = vmatprep.mubr.msk.f32.mxu1 %vm223_vm1, %v13316_v52 }
 0x43a   : > { %11418 = vmatmul.mubr.msk.f32.gmra.mrb[26].mxu1 %vm223_vm1, %v13321_v29 }
 0x43b   : > { %11420 = vmatprep.mubr.msk.f32.mxu1 %vm223_vm1, %v14977_v7 }
 0x43e   : > { %11421 = vmatmul.mubr.msk.f32.gmra.mrb[28].mxu1 %vm223_vm1, %v14978_v43 }
 0x43f   : > { %11423 = vmatprep.mubr.msk.f32.mxu1 %vm223_vm1, %v13726_v12 }
 0x442   : > { %11424 = vmatmul.mubr.msk.f32.gmra.mrb[30].mxu1 %vm223_vm1, %v13730_v14 }
 0x443   : > { %11428 = vmatprep.mubr.msk.f32.mxu1 %vm223_vm1, %v14979_v20  ;;  %v14988_v20 = vld [vmem:[#allocation14_spill] sm:$0xff] }
 0x446   : > { %11429 = vmatmul.mubr.msk.f32.vlgmr.msra.gmra.mrb[0].mxu1 %vm223_vm1, %v14980_v31  ;;  %v14989_v31 = vld [vmem:[#allocation15_spill] sm:$0xff] }
 0x447   : > { %11477 = vmatpush3.msra.mxu1 %v9893_v58  ;;  %11431 = vmatprep.mubr.msk.f32.mxu1 %vm223_vm1, %v14981_v37  ;;  %v14987_v58 = vld [vmem:[#allocation13_spill] sm:$0xff] }
 0x448   : > { %11526 = vmatprep.subr.mxu1 %v9926_v22 }
 0x44a   : > { %11432 = vmatmul.mubr.msk.f32.gmra.mrb[2].mxu1 %vm223_vm1, %v14982_v42  ;;  %v14990_v42 = vld [vmem:[#allocation16_spill] sm:$0xff] }
 0x44b   : > { %11434 = vmatprep.mubr.msk.f32.mxu1 %vm223_vm1, %v14983_v39  ;;  %v14991_v39 = vld [vmem:[#allocation17_spill] sm:$0xff] }
 0x44e   : > { %11435 = vmatmul.mubr.msk.f32.gmra.mrb[4].mxu1 %vm223_vm1, %v14984_v4  ;;  %v14992_v4 = vld [vmem:[#allocation18_spill] sm:$0xff] }
 0x44f   : > { %11437 = vmatprep.mubr.msk.f32.mxu1 %vm223_vm1, %v14985_v33  ;;  %v14993_v33 = vld [vmem:[#allocation19_spill] sm:$0xff] }
 0x452   : > { %11438 = vmatmul.mubr.msk.f32.gmra.mrb[6].mxu1 %vm223_vm1, %v14986_v53  ;;  %v14994_v53 = vld [vmem:[#allocation21_spill] sm:$0xff] }
 0x453   : > { %11440 = vmatprep.mubr.msk.f32.mxu1 %vm223_vm1, %v14987_v58  ;;  %v14995_v58 = vld [vmem:[#allocation23_spill] sm:$0xff] }
 0x456   : > { %11441 = vmatmul.mubr.msk.f32.gmra.mrb[8].mxu1 %vm223_vm1, %v14988_v20  ;;  %v14996_v20 = vld [vmem:[#allocation25_spill] sm:$0xff] }
 0x457   : > { %11443 = vmatprep.mubr.msk.f32.mxu1 %vm223_vm1, %v14989_v31  ;;  %v14997_v31 = vld [vmem:[#allocation26_spill] sm:$0xff] }
 0x45a   : > { %11444 = vmatmul.mubr.msk.f32.gmra.mrb[10].mxu1 %vm223_vm1, %v14990_v42  ;;  %v14998_v42 = vld [vmem:[#allocation28_spill] sm:$0xff] }
 0x45b   : > { %11446 = vmatprep.mubr.msk.f32.mxu1 %vm223_vm1, %v14991_v39  ;;  %v14999_v39 = vld [vmem:[#allocation30_spill] sm:$0xff] }
 0x45e   : > { %11447 = vmatmul.mubr.msk.f32.gmra.mrb[12].mxu1 %vm223_vm1, %v14992_v4  ;;  %v15000_v4 = vld [vmem:[#allocation20_spill] sm:$0xff] }
 0x45f   : > { %11449 = vmatprep.mubr.msk.f32.mxu1 %vm223_vm1, %v14993_v33  ;;  %v15001_v33 = vld [vmem:[#allocation22_spill] sm:$0xff] }
 0x462   : > { %11450 = vmatmul.mubr.msk.f32.gmra.mrb[14].mxu1 %vm223_vm1, %v14994_v53  ;;  %v15002_v53 = vld [vmem:[#allocation24_spill] sm:$0xff] }
 0x463   : > { %11452 = vmatprep.mubr.msk.f32.mxu1 %vm223_vm1, %v14995_v58  ;;  %v15003_v58 = vld [vmem:[#allocation27_spill] sm:$0xff] }
 0x466   : > { %11453 = vmatmul.mubr.msk.f32.gmra.mrb[16].mxu1 %vm223_vm1, %v14996_v20 }
 0x467   : > { %11455 = vmatprep.mubr.msk.f32.mxu1 %vm223_vm1, %v14997_v31  ;;  %v15004_v31 = vld [vmem:[#allocation29_spill] sm:$0xff] }
 0x46a   : > { %11456 = vmatmul.mubr.msk.f32.gmra.mrb[18].mxu1 %vm223_vm1, %v14998_v42 }
 0x46b   : > { %11458 = vmatprep.mubr.msk.f32.mxu1 %vm223_vm1, %v14999_v39 }
 0x46e   : > { %11459 = vmatmul.mubr.msk.f32.gmra.mrb[20].mxu1 %vm223_vm1, %v15000_v4 }
 0x46f   : > { %11461 = vmatprep.mubr.msk.f32.mxu1 %vm223_vm1, %v15001_v33  ;;  %v13797_v33 = vld [vmem:[#allocation2 + $0x182] sm:$0xff] }
 0x472   : > { %11462 = vmatmul.mubr.msk.f32.gmra.mrb[22].mxu1 %vm223_vm1, %v15002_v53 }
 0x473   : > { %11464 = vmatprep.mubr.msk.f32.mxu1 %vm223_vm1, %v15003_v58  ;;  %v13801_v58 = vld [vmem:[#allocation2 + $0x18a] sm:$0xff] }
 0x476   : > { %11465 = vmatmul.mubr.msk.f32.gmra.mrb[24].mxu1 %vm223_vm1, %v13571_v56 }
 0x477   : > { %11467 = vmatprep.mubr.msk.f32.mxu1 %vm223_vm1, %v15004_v31 }
 0x47a   : > { %11468 = vmatmul.mubr.msk.f32.gmra.mrb[26].mxu1 %vm223_vm1, %v13579_v50 }
 0x47b   : > { %11470 = vmatprep.mubr.msk.f32.mxu1 %vm223_vm1, %v13583_v54  ;;  %v9959_v54 = vld [vmem:[%s14740_s3 + $0x40] sm:$0xff] }
 0x47e   : > { %11471 = vmatmul.mubr.msk.f32.gmra.mrb[28].mxu1 %vm223_vm1, %v13587_v59 }
 0x47f   : > { %11473 = vmatprep.mubr.msk.f32.mxu1 %vm223_vm1, %v13797_v33 }
 0x482   : > { %11474 = vmatmul.mubr.msk.f32.gmra.mrb[30].mxu1 %vm223_vm1, %v13801_v58 }
 0x483   : > { %11478 = vmatprep.mubr.msk.f32.mxu1 %vm223_vm1, %v13350_v8  ;;  %v6172_v8 = vld [vmem:[#allocation2 + $0x198] sm:$0xff] }
 0x486   : > { %11479 = vmatmul.mubr.msk.f32.vlgmr.msra.gmra.mrb[0].mxu1 %vm223_vm1, %v13354_v10  ;;  %v6173_v10 = vld [vmem:[#allocation2 + $0x1a0] sm:$0xff] }
 0x487   : > { %11527 = vmatpush3.msra.mxu1 %v9926_v22  ;;  %11481 = vmatprep.mubr.msk.f32.mxu1 %vm223_vm1, %v13358_v28  ;;  %v6529_v28 = vld [vmem:[#allocation2 + $0x31] sm:$0xff] }
 0x488   : > { %11576 = vmatprep.subr.mxu1 %v9959_v54 }
 0x48a   : > { %11482 = vmatmul.mubr.msk.f32.gmra.mrb[2].mxu1 %vm223_vm1, %v13362_v11  ;;  %v6530_v11 = vld [vmem:[#allocation2 + $0x39] sm:$0xff] }
 0x48b   : > { %11484 = vmatprep.mubr.msk.f32.mxu1 %vm223_vm1, %v13366_v13  ;;  %v6531_v13 = vld [vmem:[#allocation2 + $0x49] sm:$0xff] }
 0x48e   : > { %11485 = vmatmul.mubr.msk.f32.gmra.mrb[4].mxu1 %vm223_vm1, %v13370_v15  ;;  %v6532_v15 = vld [vmem:[#allocation2 + $0x51] sm:$0xff] }
 0x48f   : > { %11487 = vmatprep.mubr.msk.f32.mxu1 %vm223_vm1, %v13374_v16  ;;  %v6533_v16 = vld [vmem:[#allocation2 + $0x61] sm:$0xff] }
 0x492   : > { %11488 = vmatmul.mubr.msk.f32.gmra.mrb[6].mxu1 %vm223_vm1, %v13378_v17  ;;  %v6534_v17 = vld [vmem:[#allocation2 + $0x69] sm:$0xff] }
 0x493   : > { %11490 = vmatprep.mubr.msk.f32.mxu1 %vm223_vm1, %v13382_v19  ;;  %v6535_v19 = vld [vmem:[#allocation2 + $0x79] sm:$0xff] }
 0x496   : > { %11491 = vmatmul.mubr.msk.f32.gmra.mrb[8].mxu1 %vm223_vm1, %v13386_v23  ;;  %v6536_v23 = vld [vmem:[#allocation2 + $0x81] sm:$0xff] }
 0x497   : > { %11493 = vmatprep.mubr.msk.f32.mxu1 %vm223_vm1, %v13390_v24  ;;  %v6537_v24 = vld [vmem:[#allocation2 + $0x91] sm:$0xff] }
 0x49a   : > { %11494 = vmatmul.mubr.msk.f32.gmra.mrb[10].mxu1 %vm223_vm1, %v13394_v25  ;;  %v6538_v25 = vld [vmem:[#allocation2 + $0x99] sm:$0xff] }
 0x49b   : > { %11496 = vmatprep.mubr.msk.f32.mxu1 %vm223_vm1, %v13398_v26  ;;  %v15019_v26 = vld [vmem:[#allocation26_spill] sm:$0xff] }
 0x49e   : > { %11497 = vmatmul.mubr.msk.f32.gmra.mrb[12].mxu1 %vm223_vm1, %v13402_v27  ;;  %v15020_v27 = vld [vmem:[#allocation22_spill] sm:$0xff] }
 0x49f   : > { %11499 = vmatprep.mubr.msk.f32.mxu1 %vm223_vm1, %v13406_v38  ;;  %v15021_v38 = vld [vmem:[#allocation27_spill] sm:$0xff] }
 0x4a2   : > { %11500 = vmatmul.mubr.msk.f32.gmra.mrb[14].mxu1 %vm223_vm1, %v13410_v61  ;;  %v15022_v61 = vld [vmem:[#allocation31_spill] sm:$0xff] }
 0x4a3   : > { %11502 = vmatprep.mubr.msk.f32.mxu1 %vm223_vm1, %v13414_v62  ;;  %v6946_v62 = vld [vmem:[#allocation2 + $0x19a] sm:$0xff] }
 0x4a6   : > { %11503 = vmatmul.mubr.msk.f32.gmra.mrb[16].mxu1 %vm223_vm1, %v13418_v41  ;;  %v12166_v41 = vmov 1983009808  }
 0x4a7   : > { %11505 = vmatprep.mubr.msk.f32.mxu1 %vm223_vm1, %v13422_v2  ;;  %v7408_v2 = vunpack.c.l.s4 %v12166_v41 }
 0x4aa   : > { %11506 = vmatmul.mubr.msk.f32.gmra.mrb[18].mxu1 %vm223_vm1, %v13426_v40  ;;  %v7410_v40 = vlaneseq }
 0x4ab   : > { %11508 = vmatprep.mubr.msk.f32.mxu1 %vm223_vm1, %v13430_v3  ;;  %v7409_v3 = vunpack.c.0.s8 %v7408_v2 }
 0x4ae   : > { %11509 = vmatmul.mubr.msk.f32.gmra.mrb[20].mxu1 %vm223_vm1, %v13434_v5  ;;  %v13984_v5 = vshrl.u32 %v7410_v40, 7 }
 0x4af   : > { %11511 = vmatprep.mubr.msk.f32.mxu1 %vm223_vm1, %v13438_v30  ;;  %v13989_v30 = vld [vmem:[%s14741_s4] ss:$0 sm:$0xff] }
 0x4b0   : > { %15023 = vst [vmem:[#allocation3_spill] sm:$0xff] %v13984_v5 }
 0x4b2   : > { %11512 = vmatmul.mubr.msk.f32.gmra.mrb[22].mxu1 %vm223_vm1, %v13442_v34 }
 0x4b3   : > { %11514 = vmatprep.mubr.msk.f32.mxu1 %vm223_vm1, %v13446_v36 }
 0x4b6   : > { %11515 = vmatmul.mubr.msk.f32.gmra.mrb[24].mxu1 %vm223_vm1, %v13450_v44  ;;  %v13993_v44 = vsub.s32 %v7409_v3, %v13984_v5 }
 0x4b7   : > { %11517 = vmatprep.mubr.msk.f32.mxu1 %vm223_vm1, %v13454_v46 }
 0x4ba   : > { %11518 = vmatmul.mubr.msk.f32.gmra.mrb[26].mxu1 %vm223_vm1, %v13458_v51 }
 0x4bb   : > { %11520 = vmatprep.mubr.msk.f32.mxu1 %vm223_vm1, %v13655_v63 }
 0x4be   : > { %11521 = vmatmul.mubr.msk.f32.gmra.mrb[28].mxu1 %vm223_vm1, %v13659_v35 }
 0x4bf   : > { %11523 = vmatprep.mubr.msk.f32.mxu1 %vm223_vm1, %v6172_v8 }
 0x4c2   : > { %11524 = vmatmul.mubr.msk.f32.gmra.mrb[30].mxu1 %vm223_vm1, %v6173_v10 }
 0x4c3   : > { %11528 = vmatprep.mubr.msk.f32.mxu1 %vm223_vm1, %v6529_v28 }
 0x4c6   : > { %11529 = vmatmul.mubr.msk.f32.vlgmr.msra.gmra.mrb[0].mxu1 %vm223_vm1, %v6530_v11 }
 0x4c7   : > { %11577 = vmatpush3.msra.mxu1 %v9959_v54  ;;  %11531 = vmatprep.mubr.msk.f32.mxu1 %vm223_vm1, %v6531_v13 }
 0x4ca   : > { %11532 = vmatmul.mubr.msk.f32.gmra.mrb[2].mxu1 %vm223_vm1, %v6532_v15 }
 0x4cb   : > { %11534 = vmatprep.mubr.msk.f32.mxu1 %vm223_vm1, %v6533_v16 }
 0x4ce   : > { %11535 = vmatmul.mubr.msk.f32.gmra.mrb[4].mxu1 %vm223_vm1, %v6534_v17 }
 0x4cf   : > { %11537 = vmatprep.mubr.msk.f32.mxu1 %vm223_vm1, %v6535_v19 }
 0x4d2   : > { %11538 = vmatmul.mubr.msk.f32.gmra.mrb[6].mxu1 %vm223_vm1, %v6536_v23 }
 0x4d3   : > { %11540 = vmatprep.mubr.msk.f32.mxu1 %vm223_vm1, %v6537_v24 }
 0x4d6   : > { %11541 = vmatmul.mubr.msk.f32.gmra.mrb[8].mxu1 %vm223_vm1, %v6538_v25 }
 0x4d7   : > { %11543 = vmatprep.mubr.msk.f32.mxu1 %vm223_vm1, %v13233_v47  ;;  %v6559_v47 = vld [vmem:[#allocation2 + $0x199] sm:$0xff] }
 0x4da   : > { %11544 = vmatmul.mubr.msk.f32.gmra.mrb[10].mxu1 %vm223_vm1, %v13239_v49  ;;  %v6560_v49 = vld [vmem:[#allocation2 + $0x1a1] sm:$0xff] }
 0x4db   : > { %11546 = vmatprep.mubr.msk.f32.mxu1 %vm223_vm1, %v13245_v55  ;;  %v15005_v55 = vld [vmem:[#allocation8_spill] sm:$0xff] }
 0x4de   : > { %11547 = vmatmul.mubr.msk.f32.gmra.mrb[12].mxu1 %vm223_vm1, %v13251_v57  ;;  %v15006_v57 = vld [vmem:[#allocation9_spill] sm:$0xff] }
 0x4df   : > { %11549 = vmatprep.mubr.msk.f32.mxu1 %vm223_vm1, %v13257_v9  ;;  %v15007_v9 = vld [vmem:[#allocation10_spill] sm:$0xff] }
 0x4e2   : > { %11550 = vmatmul.mubr.msk.f32.gmra.mrb[14].mxu1 %vm223_vm1, %v13263_v6  ;;  %v15008_v6 = vld [vmem:[#allocation11_spill] sm:$0xff] }
 0x4e3   : > { %11552 = vmatprep.mubr.msk.f32.mxu1 %vm223_vm1, %v13269_v18  ;;  %v15009_v18 = vld [vmem:[#allocation12_spill] sm:$0xff] }
 0x4e6   : > { %11553 = vmatmul.mubr.msk.f32.gmra.mrb[16].mxu1 %vm223_vm1, %v13275_v21  ;;  %v15010_v21 = vld [vmem:[#allocation13_spill] sm:$0xff] }
 0x4e7   : > { %11555 = vmatprep.mubr.msk.f32.mxu1 %vm223_vm1, %v13281_v32  ;;  %v15011_v32 = vld [vmem:[#allocation14_spill] sm:$0xff] }
 0x4ea   : > { %11556 = vmatmul.mubr.msk.f32.gmra.mrb[18].mxu1 %vm223_vm1, %v13287_v60  ;;  %v15012_v60 = vld [vmem:[#allocation15_spill] sm:$0xff] }
 0x4eb   : > { %11558 = vmatprep.mubr.msk.f32.mxu1 %vm223_vm1, %v13293_v0  ;;  %v15013_v0 = vld [vmem:[#allocation16_spill] sm:$0xff] }
 0x4ee   : > { %11559 = vmatmul.mubr.msk.f32.gmra.mrb[20].mxu1 %vm223_vm1, %v13299_v1  ;;  %v15014_v1 = vld [vmem:[#allocation17_spill] sm:$0xff] }
 0x4ef   : > { %11561 = vmatprep.mubr.msk.f32.mxu1 %vm223_vm1, %v13305_v45  ;;  %v15015_v45 = vld [vmem:[#allocation18_spill] sm:$0xff] }
 0x4f2   : > { %11562 = vmatmul.mubr.msk.f32.gmra.mrb[22].mxu1 %vm223_vm1, %v13311_v48  ;;  %v15016_v48 = vld [vmem:[#allocation19_spill] sm:$0xff] }
 0x4f3   : > { %11564 = vmatprep.mubr.msk.f32.mxu1 %vm223_vm1, %v13316_v52  ;;  %v15017_v52 = vld [vmem:[#allocation21_spill] sm:$0xff] }
 0x4f6   : > { %11565 = vmatmul.mubr.msk.f32.gmra.mrb[24].mxu1 %vm223_vm1, %v13321_v29  ;;  %v15018_v29 = vld [vmem:[#allocation23_spill] sm:$0xff] }
 0x4f7   : > { %11567 = vmatprep.mubr.msk.f32.mxu1 %vm223_vm1, %v14977_v7 }
 0x4fa   : > { %11568 = vmatmul.mubr.msk.f32.gmra.mrb[26].mxu1 %vm223_vm1, %v14978_v43 }
 0x4fb   : > { %11570 = vmatprep.mubr.msk.f32.mxu1 %vm223_vm1, %v13726_v12 }
 0x4fe   : > { %11571 = vmatmul.mubr.msk.f32.gmra.mrb[28].mxu1 %vm223_vm1, %v13730_v14 }
 0x4ff   : > { %11573 = vmatprep.mubr.msk.f32.mxu1 %vm223_vm1, %v6559_v47 }
 0x502   : > { %11574 = vmatmul.mubr.msk.f32.gmra.mrb[30].mxu1 %vm223_vm1, %v6560_v49 }
 0x503   : > { %11578 = vmatprep.mubr.msk.f32.mxu1 %vm223_vm1, %v14981_v37 }
 0x506   : > { %11579 = vmatmul.mubr.msk.f32.vlgmr.msra.gmra.mrb[0].mxu1 %vm223_vm1, %v15005_v55 }
 0x507   : > { %11581 = vmatprep.mubr.msk.f32.mxu1 %vm223_vm1, %v15006_v57 }
 0x50a   : > { %11582 = vmatmul.mubr.msk.f32.gmra.mrb[2].mxu1 %vm223_vm1, %v15007_v9 }
 0x50b   : > { %11584 = vmatprep.mubr.msk.f32.mxu1 %vm223_vm1, %v15008_v6 }
 0x50e   : > { %11585 = vmatmul.mubr.msk.f32.gmra.mrb[4].mxu1 %vm223_vm1, %v15009_v18 }
 0x50f   : > { %11587 = vmatprep.mubr.msk.f32.mxu1 %vm223_vm1, %v15010_v21 }
 0x512   : > { %11588 = vmatmul.mubr.msk.f32.gmra.mrb[6].mxu1 %vm223_vm1, %v15011_v32 }
 0x513   : > { %11590 = vmatprep.mubr.msk.f32.mxu1 %vm223_vm1, %v15012_v60 }
 0x516   : > { %11591 = vmatmul.mubr.msk.f32.gmra.mrb[8].mxu1 %vm223_vm1, %v15013_v0 }
 0x517   : > { %11593 = vmatprep.mubr.msk.f32.mxu1 %vm223_vm1, %v15014_v1 }
 0x51a   : > { %11594 = vmatmul.mubr.msk.f32.gmra.mrb[10].mxu1 %vm223_vm1, %v15015_v45 }
 0x51b   : > { %11596 = vmatprep.mubr.msk.f32.mxu1 %vm223_vm1, %v15016_v48 }
 0x51e   : > { %11597 = vmatmul.mubr.msk.f32.gmra.mrb[12].mxu1 %vm223_vm1, %v15017_v52 }
 0x51f   : > { %11599 = vmatprep.mubr.msk.f32.mxu1 %vm223_vm1, %v15018_v29 }
 0x522   : > { %11600 = vmatmul.mubr.msk.f32.gmra.mrb[14].mxu1 %vm223_vm1, %v14996_v20 }
 0x523   : > { %11602 = vmatprep.mubr.msk.f32.mxu1 %vm223_vm1, %v15019_v26 }
 0x526   : > { %11603 = vmatmul.mubr.msk.f32.gmra.mrb[16].mxu1 %vm223_vm1, %v14998_v42 }
 0x527   : > { %11605 = vmatprep.mubr.msk.f32.mxu1 %vm223_vm1, %v14999_v39 }
 0x52a   : > { %11606 = vmatmul.mubr.msk.f32.gmra.mrb[18].mxu1 %vm223_vm1, %v15000_v4 }
 0x52b   : > { %11608 = vmatprep.mubr.msk.f32.mxu1 %vm223_vm1, %v15020_v27 }
 0x52e   : > { %11609 = vmatmul.mubr.msk.f32.gmra.mrb[20].mxu1 %vm223_vm1, %v15002_v53 }
 0x52f   : > { %11611 = vmatprep.mubr.msk.f32.mxu1 %vm223_vm1, %v15021_v38 }
 0x532   : > { %11612 = vmatmul.mubr.msk.f32.gmra.mrb[22].mxu1 %vm223_vm1, %v13571_v56  ;;  %v6947_v56 = vld [vmem:[#allocation2 + $0x1a2] sm:$0xff] }
 0x533   : > { %11614 = vmatprep.mubr.msk.f32.mxu1 %vm223_vm1, %v15004_v31 }
 0x536   : > { %11615 = vmatmul.mubr.msk.f32.gmra.mrb[24].mxu1 %vm223_vm1, %v13579_v50 }
 0x537   : > { %11617 = vmatprep.mubr.msk.f32.mxu1 %vm223_vm1, %v15022_v61 }
 0x53a   : > { %11618 = vmatmul.mubr.msk.f32.gmra.mrb[26].mxu1 %vm223_vm1, %v13587_v59 }
 0x53b   : > { %11620 = vmatprep.mubr.msk.f32.mxu1 %vm223_vm1, %v13797_v33 }
 0x53e   : > { %11621 = vmatmul.mubr.msk.f32.gmra.mrb[28].mxu1 %vm223_vm1, %v13801_v58 }
 0x53f   : > { %11623 = vmatprep.mubr.msk.f32.mxu1 %vm223_vm1, %v6946_v62 }
 0x542   : > { %11624 = vmatmul.mubr.msk.f32.gmra.mrb[30].mxu1 %vm223_vm1, %v6947_v56 }
 0x5d9   : > { %v11580_v34 = vpop.f32.mrb[0].mxu1 }
 0x5da   : > { %v7311_v36 = vadd.f32 %v11580_v34, %v13989_v30  ;;  %v7112_v46 = vpop.f32.mrb[1].mxu1 }
 0x5db   : > { %v7310_v51 = vadd.f32 %v13989_v30, %v7112_v46 }
 0x5dc   : > { %v7343_v50 = vmax.f32 %v7311_v36, 0.0 }
 0x5dd   : > { %v7342_v54 = vmax.f32 %v7310_v51, 0.0  ;;  %v11583_v59 = vpop.f32.mrb[2].mxu1 }
 0x5de   : > { %v7423_v63 = vcombine.high %v7343_v50, %v7343_v50  ;;  %v7430_v35 = vrot.slane %v7343_v50, %v13993_v44  ;;  %v7313_v7 = vadd.f32 %v11583_v59, %v13989_v30  ;;  %v7122_v43 = vpop.f32.mrb[3].mxu1 }
 0x5df   : > { %v7406_v12 = vcombine.high %v7342_v54, %v7342_v54  ;;  %v7413_v14 = vrot.slane %v7342_v54, %v13993_v44  ;;  %v7312_v22 = vadd.f32 %v13989_v30, %v7122_v43 }
 0x5e0   : > { %v7437_v37 = vrot.slane %v7423_v63, %v13993_v44  ;;  %v7438_v42 = vcombine.high %v7430_v35, %v7430_v35  ;;  %v9997_v39 = vrot.slane %v7430_v35, 9  ;;  %v7345_v4 = vmax.f32 %v7313_v7, 0.0 }
 0x5e1   : > { %v7420_v33 = vrot.slane %v7406_v12, %v13993_v44  ;;  %v7421_v53 = vcombine.high %v7413_v14, %v7413_v14  ;;  %v9993_v58 = vrot.slane %v7413_v14, 9  ;;  %v7344_v20 = vmax.f32 %v7312_v22, 0.0  ;;  %v11586_v31 = vpop.f32.mrb[4].mxu1 }
 0x5e2   : > { %v7439_v8 = vcombine.high %v7437_v37, %v7437_v37  ;;  %v9998_v10 = vrot.slane %v7438_v42, 9  ;;  %v9999_v28 = vrot.slane %v7437_v37, 9  ;;  %v14002_v11 = vmax.f32 %v7430_v35, %v9997_v39  ;;  %v7132_v13 = vpop.f32.mrb[5].mxu1 }
 0x5e3   : > { %v7422_v15 = vcombine.high %v7420_v33, %v7420_v33  ;;  %v9994_v16 = vrot.slane %v7421_v53, 9  ;;  %v9995_v17 = vrot.slane %v7420_v33, 9  ;;  %v14004_v19 = vmax.f32 %v7413_v14, %v9993_v58 }
 0x5e4   : > { %v10000_v23 = vrot.slane %v7439_v8, 9  ;;  %v8467_v24 = vmax.f32 %v7438_v42, %v9998_v10  ;;  %v14006_v25 = vmax.f32 %v7437_v37, %v9999_v28  ;;  %v7457_v47 = vcombine.high %v7345_v4, %v7345_v4 }
 0x5e5   : > { %v9996_v49 = vrot.slane %v7422_v15, 9  ;;  %v8463_v55 = vmax.f32 %v7421_v53, %v9994_v16  ;;  %v14008_v57 = vmax.f32 %v7420_v33, %v9995_v17  ;;  %v7464_v9 = vrot.slane %v7345_v4, %v13993_v44  ;;  %v14011_v6 = vpop.f32.mrb[6].mxu1 }
 0x5e6   : > { %v8469_v18 = vmax.f32 %v7439_v8, %v10000_v23  ;;  %v7471_v21 = vrot.slane %v7457_v47, %v13993_v44  ;;  %v7440_v32 = vcombine.high %v7344_v20, %v7344_v20  ;;  %v7447_v60 = vrot.slane %v7344_v20, %v13993_v44  ;;  %v7142_v0 = vpop.f32.mrb[7].mxu1 }
 0x5e7   : > { %v8465_v1 = vmax.f32 %v7422_v15, %v9996_v49  ;;  %v7472_v45 = vcombine.high %v7464_v9, %v7464_v9  ;;  %v10005_v48 = vrot.slane %v7464_v9, 9  ;;  %v7315_v52 = vadd.f32 %v11586_v31, %v13989_v30 }
 0x5e8   : > { %v7473_v29 = vcombine.high %v7471_v21, %v7471_v21  ;;  %v10007_v26 = vrot.slane %v7471_v21, 9  ;;  %v7454_v27 = vrot.slane %v7440_v32, %v13993_v44  ;;  %v7455_v38 = vcombine.high %v7447_v60, %v7447_v60 }
 0x5e9   : > { %v10006_v61 = vrot.slane %v7472_v45, 9  ;;  %v8474_v62 = vmax.f32 %v7464_v9, %v10005_v48  ;;  %v10001_v56 = vrot.slane %v7447_v60, 9  ;;  %v7347_v41 = vmax.f32 %v7315_v52, 0.0  ;;  %v11592_v2 = vpop.f32.mrb[8].mxu1 }
 0x5ea   : > { %v10008_v40 = vrot.slane %v7473_v29, 9  ;;  %v8476_v3 = vmax.f32 %v7471_v21, %v10007_v26  ;;  %v7456_v34 = vcombine.high %v7454_v27, %v7454_v27  ;;  %v10002_v36 = vrot.slane %v7455_v38, 9  ;;  %v7152_v46 = vpop.f32.mrb[9].mxu1 }
 0x5eb   : > { %v8475_v51 = vmax.f32 %v7472_v45, %v10006_v61  ;;  %v8594_v50 = vmax.f32 %v14002_v11, %v8474_v62  ;;  %v10003_v54 = vrot.slane %v7454_v27, 9  ;;  %v8470_v59 = vmax.f32 %v7447_v60, %v10001_v56 }
 0x5ec   : > { %v8477_v63 = vmax.f32 %v7473_v29, %v10008_v40  ;;  %v8596_v35 = vmax.f32 %v14006_v25, %v8476_v3  ;;  %v10004_v7 = vrot.slane %v7456_v34, 9  ;;  %v8471_v43 = vmax.f32 %v7455_v38, %v10002_v36 }
 0x5ed   : > { %v8595_v12 = vmax.f32 %v8467_v24, %v8475_v51  ;;  %v8472_v14 = vmax.f32 %v7454_v27, %v10003_v54  ;;  %v8590_v22 = vmax.f32 %v14004_v19, %v8470_v59  ;;  %v7491_v37 = vcombine.high %v7347_v41, %v7347_v41  ;;  %v11595_v42 = vpop.f32.mrb[10].mxu1 }
 0x5ee   : > { %v8597_v39 = vmax.f32 %v8469_v18, %v8477_v63  ;;  %v8473_v4 = vmax.f32 %v7456_v34, %v10004_v7  ;;  %v8591_v33 = vmax.f32 %v8463_v55, %v8471_v43  ;;  %v7498_v53 = vrot.slane %v7347_v41, %v13993_v44  ;;  %v14021_v58 = vpop.f32.mrb[11].mxu1 }
 0x5ef   : > { %v14023_v20 = vrot.slane %v8595_v12, 7  ;;  %v8592_v31 = vmax.f32 %v14008_v57, %v8472_v14  ;;  %v7505_v8 = vrot.slane %v7491_v37, %v13993_v44  ;;  %v7314_v10 = vadd.f32 %v13989_v30, %v7132_v13 }
 0x5f0   : > { %v14028_v28 = vrot.slane %v8597_v39, 7  ;;  %v8593_v11 = vmax.f32 %v8465_v1, %v8473_v4  ;;  %v14030_v15 = vrot.slane %v8591_v33, 7  ;;  %v7506_v16 = vcombine.high %v7498_v53, %v7498_v53 }
 0x5f1   : > { %v14034_v17 = vsel %vm8723_vm5, %v14023_v20, %v8594_v50  ;;  %v7507_v19 = vcombine.high %v7505_v8, %v7505_v8  ;;  %v10013_v23 = vrot.slane %v7498_v53, 9  ;;  %v10015_v24 = vrot.slane %v7505_v8, 9  ;;  %v14036_v25 = vpop.f32.mrb[12].mxu1 }
 0x5f2   : > { %15024 = vst [vmem:[#allocation4_spill] sm:$0xff] %v14028_v28  ;;  %v14040_v47 = vsel %vm8723_vm5, %v14028_v28, %v8596_v35  ;;  %v14044_v13 = vsel %vm8723_vm5, %v14030_v15, %v8590_v22  ;;  %v14046_v49 = vrot.slane %v8593_v11, 7  ;;  %v10014_v55 = vrot.slane %v7506_v16, 9  ;;  %v14048_v57 = vpop.f32.mrb[13].mxu1 }
 0x5f3   : > { %15025 = vst [vmem:[#allocation5_spill] sm:$0xff] %v14040_v47  ;;  %v10016_v9 = vrot.slane %v7507_v19, 9  ;;  %v14050_v18 = vmax.f32 %v7498_v53, %v10013_v23  ;;  %v14052_v21 = vmax.f32 %v7505_v8, %v10015_v24  ;;  %v7346_v32 = vmax.f32 %v7314_v10, 0.0 }
 0x5f4   : > { %15026 = vst [vmem:[#allocation6_spill] sm:$0xff] %v14046_v49  ;;  %v14056_v60 = vsel %vm8723_vm5, %v14046_v49, %v8592_v31  ;;  %v14058_v1 = vmax.f32 %v7506_v16, %v10014_v55  ;;  %v7317_v45 = vadd.f32 %v14011_v6, %v13989_v30  ;;  %v7316_v48 = vadd.f32 %v13989_v30, %v7142_v0 }
 0x5f5   : > { %15027 = vst [vmem:[#allocation7_spill] sm:$0xff] %v14056_v60  ;;  %v14063_v52 = vmax.f32 %v7507_v19, %v10016_v9  ;;  %v7474_v29 = vcombine.high %v7346_v32, %v7346_v32  ;;  %v7481_v26 = vrot.slane %v7346_v32, %v13993_v44  ;;  %v7319_v27 = vadd.f32 %v11592_v2, %v13989_v30  ;;  %v14067_v38 = vpop.f32.mrb[14].mxu1 }
 0x5f6   : > { %v7349_v61 = vmax.f32 %v7317_v45, 0.0  ;;  %v7348_v62 = vmax.f32 %v7316_v48, 0.0  ;;  %v7318_v56 = vadd.f32 %v13989_v30, %v7152_v46  ;;  %v14071_v41 = vadd.f32 %v11595_v42, %v13989_v30  ;;  %v14073_v40 = vpop.f32.mrb[15].mxu1 }
 0x5f7   : > { %v7488_v6 = vrot.slane %v7474_v29, %v13993_v44  ;;  %v7489_v0 = vcombine.high %v7481_v26, %v7481_v26  ;;  %v10009_v3 = vrot.slane %v7481_v26, 9  ;;  %v7351_v34 = vmax.f32 %v7319_v27, 0.0 }
 0x5f8   : > { %v7525_v36 = vcombine.high %v7349_v61, %v7349_v61  ;;  %v7532_v51 = vrot.slane %v7349_v61, %v13993_v44  ;;  %v7508_v2 = vcombine.high %v7348_v62, %v7348_v62  ;;  %v7515_v50 = vrot.slane %v7348_v62, %v13993_v44 }
 0x5f9   : > { %v7490_v54 = vcombine.high %v7488_v6, %v7488_v6  ;;  %v10010_v59 = vrot.slane %v7489_v0, 9  ;;  %v10011_v63 = vrot.slane %v7488_v6, 9  ;;  %v8478_v46 = vmax.f32 %v7481_v26, %v10009_v3  ;;  %v14078_v35 = vpop.f32.mrb[16].mxu1 }
 0x5fa   : > { %v7539_v7 = vrot.slane %v7525_v36, %v13993_v44  ;;  %v7540_v43 = vcombine.high %v7532_v51, %v7532_v51  ;;  %v10021_v12 = vrot.slane %v7532_v51, 9  ;;  %v7522_v14 = vrot.slane %v7508_v2, %v13993_v44  ;;  %v14082_v22 = vpop.f32.mrb[17].mxu1 }
 0x5fb   : > { %v10012_v37 = vrot.slane %v7490_v54, 9  ;;  %v8479_v42 = vmax.f32 %v7489_v0, %v10010_v59  ;;  %v8480_v39 = vmax.f32 %v7488_v6, %v10011_v63  ;;  %v7523_v4 = vcombine.high %v7515_v50, %v7515_v50 }
 0x5fc   : > { %v7541_v33 = vcombine.high %v7539_v7, %v7539_v7  ;;  %v10022_v53 = vrot.slane %v7540_v43, 9  ;;  %v10023_v31 = vrot.slane %v7539_v7, 9  ;;  %v8490_v8 = vmax.f32 %v7532_v51, %v10021_v12 }
 0x5fd   : > { %v8481_v10 = vmax.f32 %v7490_v54, %v10012_v37  ;;  %v7524_v11 = vcombine.high %v7522_v14, %v7522_v14  ;;  %v10017_v16 = vrot.slane %v7515_v50, 9  ;;  %v10018_v19 = vrot.slane %v7523_v4, 9  ;;  %v14084_v23 = vpop.f32.mrb[18].mxu1 }
 0x5fe   : > { %v10024_v24 = vrot.slane %v7541_v33, 9  ;;  %v8491_v55 = vmax.f32 %v7540_v43, %v10022_v53  ;;  %v8492_v9 = vmax.f32 %v7539_v7, %v10023_v31  ;;  %v8602_v32 = vmax.f32 %v14050_v18, %v8490_v8  ;;  %v14087_v45 = vpop.f32.mrb[19].mxu1 }
 0x5ff   : > { %v10019_v48 = vrot.slane %v7522_v14, 9  ;;  %v10020_v29 = vrot.slane %v7524_v11, 9  ;;  %v8486_v26 = vmax.f32 %v7515_v50, %v10017_v16  ;;  %v8487_v27 = vmax.f32 %v7523_v4, %v10018_v19 }
 0x600   : > { %v8493_v61 = vmax.f32 %v7541_v33, %v10024_v24  ;;  %v8603_v62 = vmax.f32 %v14058_v1, %v8491_v55  ;;  %v8604_v6 = vmax.f32 %v14052_v21, %v8492_v9  ;;  %v7559_v0 = vcombine.high %v7351_v34, %v7351_v34 }
 0x601   : > { %v8488_v3 = vmax.f32 %v7522_v14, %v10019_v48  ;;  %v8489_v36 = vmax.f32 %v7524_v11, %v10020_v29  ;;  %v8598_v51 = vmax.f32 %v8478_v46, %v8486_v26  ;;  %v8599_v2 = vmax.f32 %v8479_v42, %v8487_v27  ;;  %v14091_v54 = vpop.f32.mrb[20].mxu1 }
 0x602   : > { %v8605_v18 = vmax.f32 %v14063_v52, %v8493_v61  ;;  %v14094_v59 = vrot.slane %v8603_v62, 7  ;;  %v7566_v63 = vrot.slane %v7351_v34, %v13993_v44  ;;  %v7573_v50 = vrot.slane %v7559_v0, %v13993_v44  ;;  %v14098_v7 = vpop.f32.mrb[21].mxu1 }
 0x603   : > { %v8600_v1 = vmax.f32 %v8480_v39, %v8488_v3  ;;  %v8601_v43 = vmax.f32 %v8481_v10, %v8489_v36  ;;  %v14100_v21 = vrot.slane %v8599_v2, 7  ;;  %v7350_v12 = vmax.f32 %v7318_v56, 0.0 }
 0x604   : > { %v14104_v46 = vsel %vm8723_vm5, %v14094_v59, %v8602_v32  ;;  %v14106_v14 = vrot.slane %v8605_v18, 7  ;;  %v7574_v52 = vcombine.high %v7566_v63, %v7566_v63  ;;  %v7575_v37 = vcombine.high %v7573_v50, %v7573_v50 }
 0x605   : > { %15028 = vst [vmem:[#allocation25_spill] sm:$0xff] %v14100_v21  ;;  %v14110_v34 = vsel %vm8723_vm5, %v14100_v21, %v8598_v51  ;;  %v14112_v42 = vrot.slane %v8601_v43, 7  ;;  %v10029_v4 = vrot.slane %v7566_v63, 9  ;;  %v10031_v39 = vrot.slane %v7573_v50, 9  ;;  %v14114_v33 = vpop.f32.mrb[22].mxu1 }
 0x606   : > { %15029 = vst [vmem:[#allocation28_spill] sm:$0xff] %v14106_v14  ;;  %v14118_v56 = vsel %vm8723_vm5, %v14106_v14, %v8604_v6  ;;  %v10030_v53 = vrot.slane %v7574_v52, 9  ;;  %v10032_v31 = vrot.slane %v7575_v37, 9  ;;  %v7542_v8 = vcombine.high %v7350_v12, %v7350_v12  ;;  %v14120_v10 = vpop.f32.mrb[23].mxu1 }
 0x607   : > { %15030 = vst [vmem:[#allocation30_spill] sm:$0xff] %v14112_v42  ;;  %15031 = vst [vmem:[#allocation20_spill] sm:$0xff] %v14118_v56  ;;  %v14124_v11 = vsel %vm8723_vm5, %v14112_v42, %v8600_v1  ;;  %v14126_v16 = vmax.f32 %v7566_v63, %v10029_v4  ;;  %v14128_v19 = vmax.f32 %v7573_v50, %v10031_v39  ;;  %v7353_v48 = vmax.f32 %v14071_v41, 0.0 }
 0x608   : > { %15032 = vst [vmem:[#allocation24_spill] sm:$0xff] %v14124_v11  ;;  %v7549_v24 = vrot.slane %v7350_v12, %v13993_v44  ;;  %v8499_v55 = vmax.f32 %v7574_v52, %v10030_v53  ;;  %v14131_v9 = vmax.f32 %v7575_v37, %v10032_v31  ;;  %v7556_v32 = vrot.slane %v7542_v8, %v13993_v44 }
 0x609   : > { %v7320_v27 = vadd.f32 %v13989_v30, %v14021_v58  ;;  %v7323_v61 = vadd.f32 %v14036_v25, %v13989_v30  ;;  %v14139_v62 = vpop.f32.mrb[24].mxu1  ;;  %v7593_v3 = vcombine.high %v7353_v48, %v7353_v48  ;;  %v7600_v36 = vrot.slane %v7353_v48, %v13993_v44 }
 0x60a   : > { %v7557_v29 = vcombine.high %v7549_v24, %v7549_v24  ;;  %v10025_v26 = vrot.slane %v7549_v24, 9  ;;  %v7558_v6 = vcombine.high %v7556_v32, %v7556_v32  ;;  %v10027_v0 = vrot.slane %v7556_v32, 9  ;;  %v14142_v51 = vpop.f32.mrb[25].mxu1 }
 0x60b   : > { %v7352_v41 = vmax.f32 %v7320_v27, 0.0  ;;  %v7355_v63 = vmax.f32 %v7323_v61, 0.0  ;;  %v7607_v58 = vrot.slane %v7593_v3, %v13993_v44  ;;  %v7608_v25 = vcombine.high %v7600_v36, %v7600_v36 }
 0x60c   : > { %v10026_v2 = vrot.slane %v7557_v29, 9  ;;  %v14144_v18 = vmax.f32 %v7549_v24, %v10025_v26  ;;  %v10028_v50 = vrot.slane %v7558_v6, 9  ;;  %v14146_v1 = vmax.f32 %v7556_v32, %v10027_v0 }
 0x60d   : > { %v10037_v12 = vrot.slane %v7600_v36, 9  ;;  %v7576_v52 = vcombine.high %v7352_v41, %v7352_v41  ;;  %v7583_v37 = vrot.slane %v7352_v41, %v13993_v44  ;;  %v14150_v4 = vpop.f32.mrb[26].mxu1  ;;  %v7609_v53 = vcombine.high %v7607_v58, %v7607_v58 }
 0x60e   : > { %v8495_v43 = vmax.f32 %v7557_v29, %v10026_v2  ;;  %v8497_v39 = vmax.f32 %v7558_v6, %v10028_v50  ;;  %v10038_v31 = vrot.slane %v7608_v25, 9  ;;  %v10039_v8 = vrot.slane %v7607_v58, 9  ;;  %v14152_v24 = vpop.f32.mrb[27].mxu1 }
 0x60f   : > { %v8506_v48 = vmax.f32 %v7600_v36, %v10037_v12  ;;  %v7590_v32 = vrot.slane %v7576_v52, %v13993_v44  ;;  %v7591_v26 = vcombine.high %v7583_v37, %v7583_v37  ;;  %v10033_v27 = vrot.slane %v7583_v37, 9 }
 0x610   : > { %v10040_v61 = vrot.slane %v7609_v53, 9  ;;  %v8507_v0 = vmax.f32 %v7608_v25, %v10038_v31  ;;  %v8508_v29 = vmax.f32 %v7607_v58, %v10039_v8  ;;  %v7627_v3 = vcombine.high %v7355_v63, %v7355_v63 }
 0x611   : > { %v8610_v2 = vmax.f32 %v14126_v16, %v8506_v48  ;;  %v7592_v41 = vcombine.high %v7590_v32, %v7590_v32  ;;  %v10034_v14 = vrot.slane %v7591_v26, 9  ;;  %v10035_v56 = vrot.slane %v7590_v32, 9  ;;  %v14156_v6 = vpop.f32.mrb[28].mxu1 }
 0x612   : > { %v8509_v50 = vmax.f32 %v7609_v53, %v10040_v61  ;;  %v8611_v28 = vmax.f32 %v8499_v55, %v8507_v0  ;;  %v8612_v47 = vmax.f32 %v14128_v19, %v8508_v29  ;;  %v8502_v36 = vmax.f32 %v7583_v37, %v10033_v27  ;;  %v14159_v12 = vpop.f32.mrb[29].mxu1 }
 0x613   : > { %v10036_v52 = vrot.slane %v7592_v41, 9  ;;  %v8503_v42 = vmax.f32 %v7591_v26, %v10034_v14  ;;  %v8504_v11 = vmax.f32 %v7590_v32, %v10035_v56  ;;  %v7634_v58 = vrot.slane %v7355_v63, %v13993_v44 }
 0x614   : > { %v8613_v25 = vmax.f32 %v14131_v9, %v8509_v50  ;;  %v14163_v16 = vrot.slane %v8611_v28, 7  ;;  %v8606_v31 = vmax.f32 %v14144_v18, %v8502_v36  ;;  %v7641_v8 = vrot.slane %v7627_v3, %v13993_v44 }
 0x615   : > { %v8505_v53 = vmax.f32 %v7592_v41, %v10036_v52  ;;  %v8607_v55 = vmax.f32 %v8495_v43, %v8503_v42  ;;  %v8608_v19 = vmax.f32 %v14146_v1, %v8504_v11  ;;  %v7642_v37 = vcombine.high %v7634_v58, %v7634_v58  ;;  %v14168_v48 = vpop.f32.mrb[30].mxu1 }
 0x616   : > { %v14172_v14 = vsel %vm8723_vm5, %v14163_v16, %v8610_v2  ;;  %v14174_v56 = vrot.slane %v8613_v25, 7  ;;  %v7643_v9 = vcombine.high %v7641_v8, %v7641_v8  ;;  %v10045_v28 = vrot.slane %v7634_v58, 9  ;;  %v14176_v63 = vpop.f32.mrb[31].mxu1 }
 0x617   : > { %v8609_v18 = vmax.f32 %v8497_v39, %v8505_v53  ;;  %v14178_v32 = vrot.slane %v8607_v55, 7  ;;  %v10046_v26 = vrot.slane %v7642_v37, 9  ;;  %v10047_v42 = vrot.slane %v7641_v8, 9 }
 0x618   : > { %15033 = vst [vmem:[#allocation29_spill] sm:$0xff] %v14174_v56  ;;  %v14182_v11 = vsel %vm8723_vm5, %v14174_v56, %v8612_v47  ;;  %v10048_v1 = vrot.slane %v7643_v9, 9  ;;  %v14184_v43 = vmax.f32 %v7634_v58, %v10045_v28  ;;  %v7322_v27 = vadd.f32 %v13989_v30, %v14048_v57 }
 0x619   : > { %15034 = vst [vmem:[#allocation8_spill] sm:$0xff] %v14178_v32  ;;  %15035 = vst [vmem:[#allocation9_spill] sm:$0xff] %v14182_v11  ;;  %v14190_v61 = vsel %vm8723_vm5, %v14178_v32, %v8606_v31  ;;  %v14192_v0 = vrot.slane %v8609_v18, 7  ;;  %v14194_v39 = vmax.f32 %v7642_v37, %v10046_v26  ;;  %v14196_v29 = vmax.f32 %v7641_v8, %v10047_v42 }
 0x61a   : > { %15036 = vst [vmem:[#allocation10_spill] sm:$0xff] %v14190_v61  ;;  %v14198_v3 = vmax.f32 %v7643_v9, %v10048_v1  ;;  %v7354_v47 = vmax.f32 %v7322_v27, 0.0  ;;  %v7325_v2 = vadd.f32 %v14067_v38, %v13989_v30  ;;  %v7324_v41 = vadd.f32 %v13989_v30, %v14073_v40 }
 0x61b   : > { %15037 = vst [vmem:[#allocation11_spill] sm:$0xff] %v14192_v0  ;;  %v14206_v57 = vsel %vm8723_vm5, %v14192_v0, %v8608_v19  ;;  %v7327_v50 = vadd.f32 %v14078_v35, %v13989_v30  ;;  %v7326_v36 = vadd.f32 %v13989_v30, %v14082_v22  ;;  %v7329_v52 = vadd.f32 %v14084_v23, %v13989_v30 }
 0x61c   : > { %15038 = vst [vmem:[#allocation12_spill] sm:$0xff] %v14206_v57  ;;  %v7610_v58 = vcombine.high %v7354_v47, %v7354_v47  ;;  %v7617_v25 = vrot.slane %v7354_v47, %v13993_v44  ;;  %v7357_v38 = vmax.f32 %v7325_v2, 0.0  ;;  %v7356_v31 = vmax.f32 %v7324_v41, 0.0 }
 0x61d   : > { %v7359_v8 = vmax.f32 %v7327_v50, 0.0  ;;  %v14215_v40 = vmax.f32 %v7326_v36, 0.0  ;;  %v14217_v53 = vmax.f32 %v7329_v52, 0.0  ;;  %v14221_v55 = vadd.f32 %v13989_v30, %v14087_v45 }
 0x61e   : > { %v7624_v35 = vrot.slane %v7610_v58, %v13993_v44  ;;  %v7625_v22 = vcombine.high %v7617_v25, %v7617_v25  ;;  %v10041_v19 = vrot.slane %v7617_v25, 9  ;;  %v7661_v37 = vcombine.high %v7357_v38, %v7357_v38 }
 0x61f   : > { %v7668_v23 = vrot.slane %v7357_v38, %v13993_v44  ;;  %v7644_v9 = vcombine.high %v7356_v31, %v7356_v31  ;;  %v7651_v28 = vrot.slane %v7356_v31, %v13993_v44  ;;  %v7695_v18 = vcombine.high %v7359_v8, %v7359_v8 }
 0x620   : > { %v7626_v26 = vcombine.high %v7624_v35, %v7624_v35  ;;  %v10042_v42 = vrot.slane %v7625_v22, 9  ;;  %v10043_v1 = vrot.slane %v7624_v35, 9  ;;  %v8510_v27 = vmax.f32 %v7617_v25, %v10041_v19 }
 0x621   : > { %v7675_v47 = vrot.slane %v7661_v37, %v13993_v44  ;;  %v7676_v2 = vcombine.high %v7668_v23, %v7668_v23  ;;  %v10053_v45 = vrot.slane %v7668_v23, 9  ;;  %v7658_v41 = vrot.slane %v7644_v9, %v13993_v44 }
 0x622   : > { %v10044_v50 = vrot.slane %v7626_v26, 9  ;;  %v8511_v36 = vmax.f32 %v7625_v22, %v10042_v42  ;;  %v8512_v52 = vmax.f32 %v7624_v35, %v10043_v1  ;;  %v7659_v58 = vcombine.high %v7651_v28, %v7651_v28 }
 0x623   : > { %v7677_v56 = vcombine.high %v7675_v47, %v7675_v47  ;;  %v10054_v38 = vrot.slane %v7676_v2, 9  ;;  %v10055_v11 = vrot.slane %v7675_v47, 9  ;;  %v8522_v0 = vmax.f32 %v7668_v23, %v10053_v45 }
 0x624   : > { %v8513_v31 = vmax.f32 %v7626_v26, %v10044_v50  ;;  %v7660_v57 = vcombine.high %v7658_v41, %v7658_v41  ;;  %v10049_v49 = vrot.slane %v7651_v28, 9  ;;  %v10050_v60 = vrot.slane %v7659_v58, 9 }
 0x625   : > { %v10056_v5 = vrot.slane %v7677_v56, 9  ;;  %v8523_v25 = vmax.f32 %v7676_v2, %v10054_v38  ;;  %v8524_v19 = vmax.f32 %v7675_v47, %v10055_v11  ;;  %v8618_v37 = vmax.f32 %v14184_v43, %v8522_v0 }
 0x626   : > { %v10051_v32 = vrot.slane %v7658_v41, 9  ;;  %v10052_v61 = vrot.slane %v7660_v57, 9  ;;  %v8518_v9 = vmax.f32 %v7651_v28, %v10049_v49  ;;  %v8519_v21 = vmax.f32 %v7659_v58, %v10050_v60 }
 0x627   : > { %v8525_v22 = vmax.f32 %v7677_v56, %v10056_v5  ;;  %v8619_v35 = vmax.f32 %v14194_v39, %v8523_v25  ;;  %v8620_v42 = vmax.f32 %v14196_v29, %v8524_v19  ;;  %v7702_v23 = vrot.slane %v7359_v8, %v13993_v44 }
 0x628   : > { %v8520_v26 = vmax.f32 %v7658_v41, %v10051_v32  ;;  %v8521_v1 = vmax.f32 %v7660_v57, %v10052_v61  ;;  %v8614_v45 = vmax.f32 %v8510_v27, %v8518_v9  ;;  %v8615_v50 = vmax.f32 %v8511_v36, %v8519_v21 }
 0x629   : > { %v8621_v2 = vmax.f32 %v14198_v3, %v8525_v22  ;;  %v14233_v11 = vrot.slane %v8619_v35, 7  ;;  %v7709_v43 = vrot.slane %v7695_v18, %v13993_v44  ;;  %v7710_v0 = vcombine.high %v7702_v23, %v7702_v23 }
 0x62a   : > { %v8616_v49 = vmax.f32 %v8512_v52, %v8520_v26  ;;  %v8617_v60 = vmax.f32 %v8513_v31, %v8521_v1  ;;  %v14236_v5 = vrot.slane %v8615_v50, 7  ;;  %v10061_v56 = vrot.slane %v7702_v23, 9 }
 0x62b   : > { %v14240_v39 = vsel %vm8723_vm5, %v14233_v11, %v8618_v37  ;;  %v14242_v32 = vrot.slane %v8621_v2, 7  ;;  %v7711_v61 = vcombine.high %v7709_v43, %v7709_v43  ;;  %v10062_v21 = vrot.slane %v7710_v0, 9 }
 0x62c   : > { %v14246_v29 = vsel %vm8723_vm5, %v14236_v5, %v8614_v45  ;;  %v14248_v3 = vrot.slane %v8617_v60, 7  ;;  %v10063_v57 = vrot.slane %v7709_v43, 9  ;;  %v8530_v8 = vmax.f32 %v7702_v23, %v10061_v56 }
 0x62d   : > { %15039 = vst [vmem:[#allocation13_spill] sm:$0xff] %v14242_v32  ;;  %v14252_v28 = vsel %vm8723_vm5, %v14242_v32, %v8620_v42  ;;  %v10064_v18 = vrot.slane %v7711_v61, 9  ;;  %v8531_v27 = vmax.f32 %v7710_v0, %v10062_v21  ;;  %v7678_v47 = vcombine.high %v14215_v40, %v14215_v40 }
 0x62e   : > { %15040 = vst [vmem:[#allocation14_spill] sm:$0xff] %v14248_v3  ;;  %15041 = vst [vmem:[#allocation15_spill] sm:$0xff] %v14252_v28  ;;  %v14258_v41 = vsel %vm8723_vm5, %v14248_v3, %v8616_v49  ;;  %v8532_v36 = vmax.f32 %v7709_v43, %v10063_v57  ;;  %v7685_v52 = vrot.slane %v14215_v40, %v13993_v44  ;;  %v7360_v19 = vmax.f32 %v14221_v55, 0.0 }
 0x62f   : > { %15042 = vst [vmem:[#allocation16_spill] sm:$0xff] %v14258_v41  ;;  %v7729_v58 = vcombine.high %v14217_v53, %v14217_v53  ;;  %v8533_v38 = vmax.f32 %v7711_v61, %v10064_v18  ;;  %v7692_v31 = vrot.slane %v7678_v47, %v13993_v44  ;;  %v7736_v25 = vrot.slane %v14217_v53, %v13993_v44 }
 0x630   : > { %v7693_v37 = vcombine.high %v7685_v52, %v7685_v52  ;;  %v10057_v9 = vrot.slane %v7685_v52, 9  ;;  %v7331_v35 = vadd.f32 %v14091_v54, %v13989_v30  ;;  %v7712_v61 = vcombine.high %v7360_v19, %v7360_v19 }
 0x631   : > { %v7743_v22 = vrot.slane %v7729_v58, %v13993_v44  ;;  %v7694_v42 = vcombine.high %v7692_v31, %v7692_v31  ;;  %v10059_v40 = vrot.slane %v7692_v31, 9  ;;  %v7744_v23 = vcombine.high %v7736_v25, %v7736_v25 }
 0x632   : > { %v10069_v26 = vrot.slane %v7736_v25, 9  ;;  %v10058_v1 = vrot.slane %v7693_v37, 9  ;;  %v8526_v45 = vmax.f32 %v7685_v52, %v10057_v9  ;;  %v7719_v54 = vrot.slane %v7360_v19, %v13993_v44 }
 0x633   : > { %v7745_v50 = vcombine.high %v7743_v22, %v7743_v22  ;;  %v10071_v2 = vrot.slane %v7743_v22, 9  ;;  %v10060_v43 = vrot.slane %v7694_v42, 9  ;;  %v8528_v0 = vmax.f32 %v7692_v31, %v10059_v40 }
 0x634   : > { %v10070_v53 = vrot.slane %v7744_v23, 9  ;;  %v8538_v49 = vmax.f32 %v7736_v25, %v10069_v26  ;;  %v8527_v55 = vmax.f32 %v7693_v37, %v10058_v1  ;;  %v7726_v32 = vrot.slane %v7712_v61, %v13993_v44 }
 0x635   : > { %v10072_v60 = vrot.slane %v7745_v50, 9  ;;  %v8540_v56 = vmax.f32 %v7743_v22, %v10071_v2  ;;  %v8529_v21 = vmax.f32 %v7694_v42, %v10060_v43  ;;  %v7363_v52 = vmax.f32 %v7331_v35, 0.0 }
 0x636   : > { %v8539_v57 = vmax.f32 %v7744_v23, %v10070_v53  ;;  %v8626_v18 = vmax.f32 %v8530_v8, %v8538_v49  ;;  %v7727_v28 = vcombine.high %v7719_v54, %v7719_v54  ;;  %v10065_v3 = vrot.slane %v7719_v54, 9 }
 0x637   : > { %v8541_v47 = vmax.f32 %v7745_v50, %v10072_v60  ;;  %v8628_v58 = vmax.f32 %v8532_v36, %v8540_v56  ;;  %v7330_v31 = vadd.f32 %v13989_v30, %v14098_v7  ;;  %v7728_v37 = vcombine.high %v7726_v32, %v7726_v32 }
 0x638   : > { %v8627_v9 = vmax.f32 %v8531_v27, %v8539_v57  ;;  %v10067_v22 = vrot.slane %v7726_v32, 9  ;;  %v7763_v40 = vcombine.high %v7363_v52, %v7363_v52  ;;  %v10066_v8 = vrot.slane %v7727_v28, 9 }
 0x639   : > { %v8629_v25 = vmax.f32 %v8533_v38, %v8541_v47  ;;  %v8534_v23 = vmax.f32 %v7719_v54, %v10065_v3  ;;  %v7770_v19 = vrot.slane %v7363_v52, %v13993_v44  ;;  %v10068_v26 = vrot.slane %v7728_v37, 9 }
 0x63a   : > { %v14275_v42 = vrot.slane %v8627_v9, 7  ;;  %v8536_v35 = vmax.f32 %v7726_v32, %v10067_v22  ;;  %v7777_v27 = vrot.slane %v7763_v40, %v13993_v44  ;;  %v8535_v7 = vmax.f32 %v7727_v28, %v10066_v8 }
 0x63b   : > { %v14278_v36 = vrot.slane %v8629_v25, 7  ;;  %v8622_v38 = vmax.f32 %v8526_v45, %v8534_v23  ;;  %v7778_v50 = vcombine.high %v7770_v19, %v7770_v19  ;;  %v8537_v3 = vmax.f32 %v7728_v37, %v10068_v26 }
 0x63c   : > { %v14283_v1 = vsel %vm8723_vm5, %v14275_v42, %v8626_v18  ;;  %v8624_v43 = vmax.f32 %v8528_v0, %v8536_v35  ;;  %v7779_v53 = vcombine.high %v7777_v27, %v7777_v27  ;;  %v8623_v49 = vmax.f32 %v8527_v55, %v8535_v7 }
 0x63d   : > { %15043 = vst [vmem:[#allocation17_spill] sm:$0xff] %v14278_v36  ;;  %v14287_v2 = vsel %vm8723_vm5, %v14278_v36, %v8628_v58  ;;  %v10077_v60 = vrot.slane %v7770_v19, 9  ;;  %v10078_v56 = vrot.slane %v7778_v50, 9  ;;  %v10079_v32 = vrot.slane %v7777_v27, 9 }
 0x63e   : > { %15044 = vst [vmem:[#allocation18_spill] sm:$0xff] %v14287_v2  ;;  %v8625_v61 = vmax.f32 %v8529_v21, %v8537_v3  ;;  %v10080_v57 = vrot.slane %v7779_v53, 9  ;;  %v7362_v54 = vmax.f32 %v7330_v31, 0.0  ;;  %v7333_v18 = vadd.f32 %v14114_v33, %v13989_v30 }
 0x63f   : > { %v14291_v28 = vrot.slane %v8623_v49, 7  ;;  %v14293_v45 = vmax.f32 %v7770_v19, %v10077_v60  ;;  %v8547_v47 = vmax.f32 %v7778_v50, %v10078_v56  ;;  %v14295_v58 = vmax.f32 %v7777_v27, %v10079_v32 }
 0x640   : > { %v14297_v52 = vrot.slane %v8625_v61, 7  ;;  %v8549_v0 = vmax.f32 %v7779_v53, %v10080_v57  ;;  %v7746_v55 = vcombine.high %v7362_v54, %v7362_v54  ;;  %v7753_v9 = vrot.slane %v7362_v54, %v13993_v44 }
 0x641   : > { %v14302_v21 = vsel %vm8723_vm5, %v14291_v28, %v8622_v38  ;;  %v7365_v31 = vmax.f32 %v7333_v18, 0.0  ;;  %v7332_v33 = vadd.f32 %v13989_v30, %v14120_v10  ;;  %v7335_v25 = vadd.f32 %v14139_v62, %v13989_v30 }
 0x642   : > { %15045 = vst [vmem:[#allocation19_spill] sm:$0xff] %v14297_v52  ;;  %v14310_v37 = vsel %vm8723_vm5, %v14297_v52, %v8624_v43  ;;  %v7760_v22 = vrot.slane %v7746_v55, %v13993_v44  ;;  %v7761_v40 = vcombine.high %v7753_v9, %v7753_v9  ;;  %v10073_v8 = vrot.slane %v7753_v9, 9 }
 0x643   : > { %15046 = vst [vmem:[#allocation21_spill] sm:$0xff] %v14310_v37  ;;  %v7797_v23 = vcombine.high %v7365_v31, %v7365_v31  ;;  %v7804_v19 = vrot.slane %v7365_v31, %v13993_v44  ;;  %v7364_v26 = vmax.f32 %v7332_v33, 0.0  ;;  %v7367_v35 = vmax.f32 %v7335_v25, 0.0 }
 0x644   : > { %v7762_v27 = vcombine.high %v7760_v22, %v7760_v22  ;;  %v10074_v7 = vrot.slane %v7761_v40, 9  ;;  %v10075_v38 = vrot.slane %v7760_v22, 9  ;;  %v8542_v10 = vmax.f32 %v7753_v9, %v10073_v8 }
 0x645   : > { %v7811_v50 = vrot.slane %v7797_v23, %v13993_v44  ;;  %v7812_v62 = vcombine.high %v7804_v19, %v7804_v19  ;;  %v10085_v3 = vrot.slane %v7804_v19, 9  ;;  %v7780_v53 = vcombine.high %v7364_v26, %v7364_v26 }
 0x646   : > { %v10076_v43 = vrot.slane %v7762_v27, 9  ;;  %v8543_v49 = vmax.f32 %v7761_v40, %v10074_v7  ;;  %v8544_v60 = vmax.f32 %v7760_v22, %v10075_v38  ;;  %v7787_v56 = vrot.slane %v7364_v26, %v13993_v44 }
 0x647   : > { %v7813_v32 = vcombine.high %v7811_v50, %v7811_v50  ;;  %v10086_v61 = vrot.slane %v7812_v62, 9  ;;  %v10087_v57 = vrot.slane %v7811_v50, 9  ;;  %v8554_v54 = vmax.f32 %v7804_v19, %v10085_v3 }
 0x648   : > { %v8545_v18 = vmax.f32 %v7762_v27, %v10076_v43  ;;  %v7794_v55 = vrot.slane %v7780_v53, %v13993_v44  ;;  %v7795_v31 = vcombine.high %v7787_v56, %v7787_v56  ;;  %v10081_v33 = vrot.slane %v7787_v56, 9 }
 0x649   : > { %v10088_v9 = vrot.slane %v7813_v32, 9  ;;  %v8555_v25 = vmax.f32 %v7812_v62, %v10086_v61  ;;  %v8556_v8 = vmax.f32 %v7811_v50, %v10087_v57  ;;  %v8634_v23 = vmax.f32 %v14293_v45, %v8554_v54 }
 0x64a   : > { %v7796_v36 = vcombine.high %v7794_v55, %v7794_v55  ;;  %v10082_v2 = vrot.slane %v7795_v31, 9  ;;  %v10083_v40 = vrot.slane %v7794_v55, 9  ;;  %v8550_v22 = vmax.f32 %v7787_v56, %v10081_v33 }
 0x64b   : > { %v8557_v7 = vmax.f32 %v7813_v32, %v10088_v9  ;;  %v8635_v26 = vmax.f32 %v8547_v47, %v8555_v25  ;;  %v8636_v38 = vmax.f32 %v14295_v58, %v8556_v8  ;;  %v7831_v52 = vcombine.high %v7367_v35, %v7367_v35 }
 0x64c   : > { %v10084_v19 = vrot.slane %v7796_v36, 9  ;;  %v8551_v27 = vmax.f32 %v7795_v31, %v10082_v2  ;;  %v8552_v3 = vmax.f32 %v7794_v55, %v10083_v40  ;;  %v8630_v53 = vmax.f32 %v8542_v10, %v8550_v22 }
 0x64d   : > { %v8637_v43 = vmax.f32 %v8549_v0, %v8557_v7  ;;  %v14319_v37 = vrot.slane %v8635_v26, 7  ;;  %v7838_v50 = vrot.slane %v7367_v35, %v13993_v44  ;;  %v7845_v45 = vrot.slane %v7831_v52, %v13993_v44  ;;  %v14363_v7 = vld [vmem:[%s14741_s4] ss:$0 sm:$0xff] }
 0x64e   : > { %v8553_v62 = vmax.f32 %v7796_v36, %v10084_v19  ;;  %v8631_v61 = vmax.f32 %v8543_v49, %v8551_v27  ;;  %v8632_v57 = vmax.f32 %v8544_v60, %v8552_v3  ;;  %v7334_v47 = vadd.f32 %v13989_v30, %v14142_v51 }
 0x64f   : > { %v14327_v58 = vsel %vm8723_vm5, %v14319_v37, %v8634_v23  ;;  %v14329_v2 = vrot.slane %v8637_v43, 7  ;;  %v7846_v10 = vcombine.high %v7838_v50, %v7838_v50  ;;  %v7847_v0 = vcombine.high %v7845_v45, %v7845_v45 }
 0x650   : > { %v8633_v56 = vmax.f32 %v8545_v18, %v8553_v62  ;;  %v14331_v32 = vrot.slane %v8631_v61, 7  ;;  %v10093_v35 = vrot.slane %v7838_v50, 9  ;;  %v10095_v54 = vrot.slane %v7845_v45, 9 }
 0x651   : > { %15047 = vst [vmem:[#allocation23_spill] sm:$0xff] %v14329_v2  ;;  %v14335_v36 = vsel %vm8723_vm5, %v14329_v2, %v8636_v38  ;;  %v10094_v52 = vrot.slane %v7846_v10, 9  ;;  %v10096_v49 = vrot.slane %v7847_v0, 9  ;;  %v7366_v51 = vmax.f32 %v7334_v47, 0.0 }
 0x652   : > { %15048 = vst [vmem:[#allocation26_spill] sm:$0xff] %v14335_v36  ;;  %v14339_v60 = vsel %vm8723_vm5, %v14331_v32, %v8630_v53  ;;  %v14341_v55 = vrot.slane %v8633_v56, 7  ;;  %v14343_v31 = vmax.f32 %v7838_v50, %v10093_v35  ;;  %v14345_v18 = vmax.f32 %v7845_v45, %v10095_v54 }
 0x653   : > { %v14347_v33 = vmax.f32 %v7846_v10, %v10094_v52  ;;  %v14349_v9 = vmax.f32 %v7847_v0, %v10096_v49  ;;  %v7814_v25 = vcombine.high %v7366_v51, %v7366_v51  ;;  %v7821_v8 = vrot.slane %v7366_v51, %v13993_v44 }
 0x654   : > { %15049 = vst [vmem:[#allocation22_spill] sm:$0xff] %v14341_v55  ;;  %v14354_v23 = vsel %vm8723_vm5, %v14341_v55, %v8632_v57  ;;  %v7337_v40 = vadd.f32 %v14150_v4, %v13989_v30  ;;  %v7336_v22 = vadd.f32 %v13989_v30, %v14152_v24  ;;  %v7339_v26 = vadd.f32 %v14363_v7, %v14156_v6 }
 0x655   : > { %15050 = vst [vmem:[#allocation27_spill] sm:$0xff] %v14354_v23  ;;  %v7828_v38 = vrot.slane %v7814_v25, %v13993_v44  ;;  %v7829_v19 = vcombine.high %v7821_v8, %v7821_v8  ;;  %v10089_v27 = vrot.slane %v7821_v8, 9  ;;  %v14370_v3 = vadd.f32 %v14363_v7, %v14159_v12 }
 0x656   : > { %v7369_v4 = vmax.f32 %v7337_v40, 0.0  ;;  %v7368_v53 = vmax.f32 %v7336_v22, 0.0  ;;  %v7371_v43 = vmax.f32 %v7339_v26, 0.0  ;;  %v14374_v30 = vadd.f32 %v14363_v7, %v14168_v48 }
 0x657   : > { %v7830_v24 = vcombine.high %v7828_v38, %v7828_v38  ;;  %v10090_v50 = vrot.slane %v7829_v19, 9  ;;  %v10091_v45 = vrot.slane %v7828_v38, 9  ;;  %v8558_v62 = vmax.f32 %v7821_v8, %v10089_v27 }
 0x658   : > { %v7865_v6 = vcombine.high %v7369_v4, %v7369_v4  ;;  %v7872_v61 = vrot.slane %v7369_v4, %v13993_v44  ;;  %v7848_v57 = vcombine.high %v7368_v53, %v7368_v53  ;;  %v7855_v47 = vrot.slane %v7368_v53, %v13993_v44 }
 0x659   : > { %v10092_v10 = vrot.slane %v7830_v24, 9  ;;  %v8559_v12 = vmax.f32 %v7829_v19, %v10090_v50  ;;  %v8560_v0 = vmax.f32 %v7828_v38, %v10091_v45  ;;  %v7899_v56 = vcombine.high %v7371_v43, %v7371_v43 }
 0x65a   : > { %v7879_v35 = vrot.slane %v7865_v6, %v13993_v44  ;;  %v7880_v54 = vcombine.high %v7872_v61, %v7872_v61  ;;  %v10101_v52 = vrot.slane %v7872_v61, 9  ;;  %v7862_v48 = vrot.slane %v7848_v57, %v13993_v44 }
 0x65b   : > { %v8561_v49 = vmax.f32 %v7830_v24, %v10092_v10  ;;  %v7863_v51 = vcombine.high %v7855_v47, %v7855_v47  ;;  %v10097_v25 = vrot.slane %v7855_v47, 9  ;;  %v7906_v8 = vrot.slane %v7371_v43, %v13993_v44 }
 0x65c   : > { %v7881_v40 = vcombine.high %v7879_v35, %v7879_v35  ;;  %v10102_v22 = vrot.slane %v7880_v54, 9  ;;  %v10103_v26 = vrot.slane %v7879_v35, 9  ;;  %v8570_v27 = vmax.f32 %v7872_v61, %v10101_v52 }
 0x65d   : > { %v7864_v4 = vcombine.high %v7862_v48, %v7862_v48  ;;  %v10098_v19 = vrot.slane %v7863_v51, 9  ;;  %v10099_v38 = vrot.slane %v7862_v48, 9  ;;  %v8566_v53 = vmax.f32 %v7855_v47, %v10097_v25 }
 0x65e   : > { %v10104_v50 = vrot.slane %v7881_v40, 9  ;;  %v8571_v45 = vmax.f32 %v7880_v54, %v10102_v22  ;;  %v8572_v6 = vmax.f32 %v7879_v35, %v10103_v26  ;;  %v8642_v2 = vmax.f32 %v14343_v31, %v8570_v27 }
 0x65f   : > { %v10100_v24 = vrot.slane %v7864_v4, 9  ;;  %v8567_v57 = vmax.f32 %v7863_v51, %v10098_v19  ;;  %v8568_v10 = vmax.f32 %v7862_v48, %v10099_v38  ;;  %v8638_v36 = vmax.f32 %v8558_v62, %v8566_v53 }
 0x660   : > { %v8573_v43 = vmax.f32 %v7881_v40, %v10104_v50  ;;  %v8643_v55 = vmax.f32 %v14347_v33, %v8571_v45  ;;  %v8644_v61 = vmax.f32 %v14345_v18, %v8572_v6  ;;  %v7913_v52 = vrot.slane %v7899_v56, %v13993_v44 }
 0x661   : > { %v8569_v23 = vmax.f32 %v7864_v4, %v10100_v24  ;;  %v8639_v41 = vmax.f32 %v8559_v12, %v8567_v57  ;;  %v8640_v47 = vmax.f32 %v8560_v0, %v8568_v10  ;;  %v7914_v25 = vcombine.high %v7906_v8, %v7906_v8 }
 0x662   : > { %v8645_v35 = vmax.f32 %v14349_v9, %v8573_v43  ;;  %v14386_v54 = vrot.slane %v8643_v55, 7  ;;  %v7915_v31 = vcombine.high %v7913_v52, %v7913_v52  ;;  %v10109_v22 = vrot.slane %v7906_v8, 9 }
 0x663   : > { %v8641_v51 = vmax.f32 %v8561_v49, %v8569_v23  ;;  %v14388_v48 = vrot.slane %v8639_v41, 7  ;;  %v10110_v62 = vrot.slane %v7914_v25, 9  ;;  %v10111_v40 = vrot.slane %v7913_v52, 9 }
 0x664   : > { %v14392_v18 = vsel %vm8723_vm5, %v14386_v54, %v8642_v2  ;;  %v14394_v33 = vrot.slane %v8645_v35, 7  ;;  %v10112_v12 = vrot.slane %v7915_v31, 9  ;;  %v14396_v0 = vmax.f32 %v7906_v8, %v10109_v22 }
 0x665   : > { %v14400_v55 = vsel %vm8723_vm5, %v14388_v48, %v8638_v36  ;;  %v14402_v9 = vrot.slane %v8641_v51, 7  ;;  %v8579_v23 = vmax.f32 %v7914_v25, %v10110_v62  ;;  %v14404_v41 = vmax.f32 %v7913_v52, %v10111_v40 }
 0x666   : > { %15051 = vst [vmem:[#allocation31_spill] sm:$0xff] %v14394_v33  ;;  %v14408_v56 = vsel %vm8723_vm5, %v14394_v33, %v8644_v61  ;;  %v8581_v2 = vmax.f32 %v7915_v31, %v10112_v12  ;;  %v7370_v49 = vmax.f32 %v14370_v3, 0.0  ;;  %v7373_v26 = vmax.f32 %v14374_v30, 0.0 }
 0x667   : > { %15052 = vst [vmem:[#allocation32_spill] sm:$0xff] %v14408_v56  ;;  %v14414_v8 = vsel %vm8723_vm5, %v14402_v9, %v8640_v47  ;;  %v7340_v36 = vadd.f32 %v14363_v7, %v14176_v63  ;;  %v8742_v27 = vsel %vm8725_vm6, %v14023_v20, %v14034_v17  ;;  %v8770_v4 = vsel %vm8725_vm6, %v14094_v59, %v14104_v46 }
 0x668   : > { %v7882_v19 = vcombine.high %v7370_v49, %v7370_v49  ;;  %v7889_v3 = vrot.slane %v7370_v49, %v13993_v44  ;;  %v7933_v30 = vcombine.high %v7373_v26, %v7373_v26  ;;  %v7940_v38 = vrot.slane %v7373_v26, %v13993_v44 }
 0x669   : > { %v7372_v53 = vmax.f32 %v7340_v36, 0.0  ;;  %v8743_v50 = vsel %vm8727_vm7, %v14023_v20, %v8742_v27  ;;  %v8771_v63 = vsel %vm8727_vm7, %v14094_v59, %v8770_v4  ;;  %v8798_v17 = vsel %vm8725_vm6, %v14163_v16, %v14172_v14 }
 0x66a   : > { %v7896_v7 = vrot.slane %v7882_v19, %v13993_v44  ;;  %v7897_v46 = vcombine.high %v7889_v3, %v7889_v3  ;;  %v10105_v45 = vrot.slane %v7889_v3, 9  ;;  %v7947_v6 = vrot.slane %v7933_v30, %v13993_v44 }
 0x66b   : > { %v7948_v24 = vcombine.high %v7940_v38, %v7940_v38  ;;  %v10117_v57 = vrot.slane %v7940_v38, 9  ;;  %v7916_v10 = vcombine.high %v7372_v53, %v7372_v53  ;;  %v7923_v43 = vrot.slane %v7372_v53, %v13993_v44 }
 0x66c   : > { %v7898_v61 = vcombine.high %v7896_v7, %v7896_v7  ;;  %v10106_v52 = vrot.slane %v7897_v46, 9  ;;  %v10107_v47 = vrot.slane %v7896_v7, 9  ;;  %v8574_v25 = vmax.f32 %v7889_v3, %v10105_v45 }
 0x66d   : > { %v7949_v35 = vcombine.high %v7947_v6, %v7947_v6  ;;  %v10118_v31 = vrot.slane %v7948_v24, 9  ;;  %v10119_v22 = vrot.slane %v7947_v6, 9  ;;  %v8586_v51 = vmax.f32 %v7940_v38, %v10117_v57 }
 0x66e   : > { %v10108_v14 = vrot.slane %v7898_v61, 9  ;;  %v8575_v62 = vmax.f32 %v7897_v46, %v10106_v52  ;;  %v8576_v40 = vmax.f32 %v7896_v7, %v10107_v47  ;;  %v7930_v12 = vrot.slane %v7916_v10, %v13993_v44 }
 0x66f   : > { %v10120_v49 = vrot.slane %v7949_v35, 9  ;;  %v8587_v26 = vmax.f32 %v7948_v24, %v10118_v31  ;;  %v8588_v36 = vmax.f32 %v7947_v6, %v10119_v22  ;;  %v8650_v27 = vmax.f32 %v14396_v0, %v8586_v51 }
 0x670   : > { %v8577_v4 = vmax.f32 %v7898_v61, %v10108_v14  ;;  %v7931_v19 = vcombine.high %v7923_v43, %v7923_v43  ;;  %v7932_v30 = vcombine.high %v7930_v12, %v7930_v12  ;;  %v10113_v53 = vrot.slane %v7923_v43, 9 }
 0x671   : > { %v8589_v33 = vmax.f32 %v7949_v35, %v10120_v49  ;;  %v8651_v3 = vmax.f32 %v8579_v23, %v8587_v26  ;;  %v8652_v45 = vmax.f32 %v14404_v41, %v8588_v36  ;;  %v10115_v56 = vrot.slane %v7930_v12, 9 }
 0x672   : > { %v10114_v38 = vrot.slane %v7931_v19, 9  ;;  %v10116_v57 = vrot.slane %v7932_v30, 9  ;;  %v8582_v46 = vmax.f32 %v7923_v43, %v10113_v53  ;;  %v8744_v7 = vsel %vm8729_vm8, %v14023_v20, %v8743_v50 }
 0x673   : > { %v8653_v10 = vmax.f32 %v8581_v2, %v8589_v33  ;;  %v8936_v24 = vrot.slane %v8651_v3, 7  ;;  %v8584_v6 = vmax.f32 %v7930_v12, %v10115_v56  ;;  %v8772_v0 = vsel %vm8729_vm8, %v14094_v59, %v8771_v63 }
 0x674   : > { %v8583_v61 = vmax.f32 %v7931_v19, %v10114_v38  ;;  %v8585_v52 = vmax.f32 %v7932_v30, %v10116_v57  ;;  %v8646_v47 = vmax.f32 %v8574_v25, %v8582_v46  ;;  %v8799_v23 = vsel %vm8727_vm7, %v14163_v16, %v8798_v17  ;;  %v15054_v57 = vld [vmem:[#allocation10_spill] sm:$0xff]  ;;  %v15055_v46 = vld [vmem:[#allocation8_spill] sm:$0xff] }
 0x675   : > { %v8937_v41 = vsel %vm8723_vm5, %v8936_v24, %v8650_v27  ;;  %v14446_v35 = vrot.slane %v8653_v10, 7  ;;  %v8648_v43 = vmax.f32 %v8576_v40, %v8584_v6  ;;  %v8800_v20 = vsel %vm8729_vm8, %v14163_v16, %v8799_v23  ;;  %v15056_v10 = vld [vmem:[#allocation3_spill] sm:$0xff] }
 0x676   : > { %v8647_v33 = vmax.f32 %v8575_v62, %v8583_v61  ;;  %v8649_v2 = vmax.f32 %v8577_v4, %v8585_v52  ;;  %v8826_v59 = vsel %vm8725_vm6, %v14233_v11, %v14240_v39  ;;  %v8854_v56 = vsel %vm8725_vm6, %v14275_v42, %v14283_v1 }
 0x677   : > { %v14458_v50 = vsel %vm8723_vm5, %v14446_v35, %v8652_v45  ;;  %v8827_v63 = vsel %vm8727_vm7, %v14233_v11, %v8826_v59  ;;  %v8855_v16 = vsel %vm8727_vm7, %v14275_v42, %v8854_v56  ;;  %v8882_v17 = vsel %vm8725_vm6, %v14319_v37, %v14327_v58 }
 0x678   : > { %v8922_v25 = vrot.slane %v8647_v33, 7  ;;  %v14467_v39 = vrot.slane %v8649_v2, 7  ;;  %v8828_v1 = vsel %vm8729_vm8, %v14233_v11, %v8827_v63  ;;  %v8856_v31 = vsel %vm8729_vm8, %v14275_v42, %v8855_v16 }
 0x679   : > { %v8883_v22 = vsel %vm8727_vm7, %v14319_v37, %v8882_v17  ;;  %v8910_v51 = vsel %vm8725_vm6, %v14386_v54, %v14392_v18  ;;  %v8938_v14 = vsel %vm8725_vm6, %v8936_v24, %v8937_v41  ;;  %v12167_v18 = vmov 1934713408  }
 0x67a   : > { %v8923_v58 = vsel %vm8723_vm5, %v8922_v25, %v8646_v47  ;;  %v14482_v62 = vsel %vm8723_vm5, %v14467_v39, %v8648_v43  ;;  %v8884_v11 = vsel %vm8729_vm8, %v14319_v37, %v8883_v22  ;;  %v8911_v42 = vsel %vm8727_vm7, %v14386_v54, %v8910_v51 }
 0x67b   : > { %v8912_v40 = vsel %vm8729_vm8, %v14386_v54, %v8911_v42  ;;  %v8939_v12 = vsel %vm8727_vm7, %v8936_v24, %v8938_v14  ;;  %v8982_v49 = vunpack.c.l.s4 %v12167_v18  ;;  %v9052_v26 = vcombine.low %v8744_v7, %v8772_v0  ;;  %v15053_v54 = vld [vmem:[#allocation25_spill] sm:$0xff]  ;;  %v15057_v42 = vld [vmem:[#allocation7_spill] sm:$0xff]  ;;  %v15059_v18 = vld [vmem:[#allocation24_spill] sm:$0xff] }
 0x67c   : > { %v8940_v36 = vsel %vm8729_vm8, %v8936_v24, %v8939_v12  ;;  %v9061_v27 = vcombine.low %v8800_v20, %v8828_v1  ;;  %v9070_v4 = vcombine.low %v8856_v31, %v8884_v11  ;;  %v8726_v19 = vsel %vm8725_vm6, %v14030_v15, %v14044_v13 }
 0x67d   : > { %v8983_v37 = vunpack.c.0.s8 %v8982_v49  ;;  %v9079_v30 = vcombine.low %v8912_v40, %v8940_v36  ;;  %v8728_v53 = vsel %vm8727_vm7, %v14030_v15, %v8726_v19  ;;  %v8756_v3 = vsel %vm8725_vm6, %v15053_v54, %v14110_v34  ;;  %v15058_v40 = vld [vmem:[#allocation6_spill] sm:$0xff]  ;;  %v15062_v36 = vld [vmem:[#allocation11_spill] sm:$0xff] }
 0x67e   : > { %v8730_v45 = vsel %vm8729_vm8, %v14030_v15, %v8728_v53  ;;  %v8757_v38 = vsel %vm8727_vm7, %v15053_v54, %v8756_v3  ;;  %v8784_v7 = vsel %vm8725_vm6, %v15055_v46, %v15054_v57  ;;  %v8812_v13 = vsel %vm8725_vm6, %v14236_v5, %v14246_v29  ;;  %v15060_v49 = vld [vmem:[#allocation30_spill] sm:$0xff]  ;;  %v15063_v3 = vld [vmem:[#allocation16_spill] sm:$0xff] }
 0x67f   : > { %v14511_v24 = vsub.s32 %v8983_v37, %v15056_v10  ;;  %v8758_v34 = vsel %vm8729_vm8, %v15053_v54, %v8757_v38  ;;  %v8785_v15 = vsel %vm8727_vm7, %v15055_v46, %v8784_v7  ;;  %v8813_v6 = vsel %vm8727_vm7, %v14236_v5, %v8812_v13 }
 0x680   : > { %v8786_v0 = vsel %vm8729_vm8, %v15055_v46, %v8785_v15  ;;  %v8814_v61 = vsel %vm8729_vm8, %v14236_v5, %v8813_v6  ;;  %v8840_v29 = vsel %vm8725_vm6, %v14291_v28, %v14302_v21  ;;  %v8868_v52 = vsel %vm8725_vm6, %v14331_v32, %v14339_v60  ;;  %v15065_v6 = vld [vmem:[#allocation21_spill] sm:$0xff] }
 0x681   : > { %v14530_v47 = vrot.slane %v9052_v26, %v14511_v24  ;;  %v14533_v23 = vrot.slane %v9061_v27, %v14511_v24  ;;  %v14536_v41 = vrot.slane %v9070_v4, %v14511_v24  ;;  %v14539_v43 = vrot.slane %v9079_v30, %v14511_v24 }
 0x682   : > { %v8841_v5 = vsel %vm8727_vm7, %v14291_v28, %v8840_v29  ;;  %v8869_v21 = vsel %vm8727_vm7, %v14331_v32, %v8868_v52  ;;  %v8896_v60 = vsel %vm8725_vm6, %v14388_v48, %v14400_v55  ;;  %v8924_v20 = vsel %vm8725_vm6, %v8922_v25, %v8923_v58 }
 0x683   : > { %v9222_v33 = vcombine.low %v14530_v47, %v14533_v23  ;;  %v9223_v2 = vcombine.low %v14536_v41, %v14539_v43  ;;  %v8842_v59 = vsel %vm8729_vm8, %v14291_v28, %v8841_v5  ;;  %v8870_v56 = vsel %vm8729_vm8, %v14331_v32, %v8869_v21  ;;  %v15067_v21 = vld [vmem:[#allocation27_spill] sm:$0xff] }
 0x684   : > { %v8897_v63 = vsel %vm8727_vm7, %v14388_v48, %v8896_v60  ;;  %v8925_v16 = vsel %vm8727_vm7, %v8922_v25, %v8924_v20  ;;  %v8980_v55 = vcombine.low %v8730_v45, %v8758_v34  ;;  %v8989_v17 = vcombine.low %v8786_v0, %v8814_v61  ;;  %v15064_v45 = vld [vmem:[#allocation14_spill] sm:$0xff]  ;;  %v15066_v0 = vld [vmem:[#allocation19_spill] sm:$0xff] }
 0x685   : > { %v9230_v1 = vrot.slane %v9222_v33, %v13993_v44  ;;  %v9237_v31 = vrot.slane %v9223_v2, %v13993_v44  ;;  %v8898_v22 = vsel %vm8729_vm8, %v14388_v48, %v8897_v63  ;;  %v8926_v51 = vsel %vm8729_vm8, %v8922_v25, %v8925_v16  ;;  %v15061_v48 = vld [vmem:[#allocation12_spill] sm:$0xff]  ;;  %v15068_v60 = vld [vmem:[#allocation22_spill] sm:$0xff] }
 0x686   : > { %v14566_v28 = vrot.slane %v8980_v55, %v14511_v24  ;;  %v14569_v32 = vrot.slane %v8989_v17, %v14511_v24  ;;  %v8998_v14 = vcombine.low %v8842_v59, %v8870_v56  ;;  %v9007_v58 = vcombine.low %v8898_v22, %v8926_v51 }
 0x687   : > { %v9238_v11 = vcombine.low %v9230_v1, %v9237_v31  ;;  %v8735_v12 = vsel %vm8725_vm6, %v15058_v40, %v15057_v42  ;;  %v8763_v26 = vsel %vm8725_vm6, %v15060_v49, %v15059_v18  ;;  %v8791_v25 = vsel %vm8725_vm6, %v15062_v36, %v15061_v48  ;;  %v15071_v42 = vld [vmem:[#allocation20_spill] sm:$0xff] }
 0x688   : > { %v14581_v27 = vrot.slane %v8998_v14, %v14511_v24  ;;  %v14584_v4 = vrot.slane %v9007_v58, %v14511_v24  ;;  %v9128_v19 = vcombine.low %v14566_v28, %v14569_v32  ;;  %v10121_v37 = vcombine.high %v14566_v28, %v14569_v32  ;;  %v15069_v14 = vld [vmem:[#allocation5_spill] sm:$0xff]  ;;  %v15070_v58 = vld [vmem:[#allocation4_spill] sm:$0xff] }
 0x689   : > { %9239 = vrot.lane.b32.xlu1 %v9238_v11, %s12168_s21  ;;  %v8736_v30 = vsel %vm8727_vm7, %v15058_v40, %v8735_v12  ;;  %v8764_v53 = vsel %vm8727_vm7, %v15060_v49, %v8763_v26  ;;  %v8792_v54 = vsel %vm8727_vm7, %v15062_v36, %v8791_v25  ;;  %v8819_v38 = vsel %vm8725_vm6, %v15064_v45, %v15063_v3 }
 0x68a   : > { %v10122_v57 = vcombine.high %v14581_v27, %v14584_v4  ;;  %v9158_v46 = vrot.slane %v10121_v37, %v13993_v44  ;;  %v9129_v7 = vcombine.low %v14581_v27, %v14584_v4  ;;  %v8737_v13 = vsel %vm8729_vm8, %v15058_v40, %v8736_v30  ;;  %v15072_v40 = vld [vmem:[#allocation28_spill] sm:$0xff] }
 0x68b   : > { %v8765_v10 = vsel %vm8729_vm8, %v15060_v49, %v8764_v53  ;;  %v8793_v34 = vsel %vm8729_vm8, %v15062_v36, %v8792_v54  ;;  %v8820_v15 = vsel %vm8727_vm7, %v15064_v45, %v8819_v38  ;;  %v8847_v61 = vsel %vm8725_vm6, %v15066_v0, %v15065_v6  ;;  %v15073_v53 = vld [vmem:[#allocation9_spill] sm:$0xff] }
 0x68c   : > { %v9165_v29 = vrot.slane %v10122_v57, %v13993_v44  ;;  %v8821_v52 = vsel %vm8729_vm8, %v15064_v45, %v8820_v15  ;;  %v8848_v5 = vsel %vm8727_vm7, %v15066_v0, %v8847_v61  ;;  %v8875_v20 = vsel %vm8725_vm6, %v15068_v60, %v15067_v21  ;;  %v15074_v54 = vld [vmem:[#allocation29_spill] sm:$0xff]  ;;  %v15075_v45 = vld [vmem:[#allocation15_spill] sm:$0xff] }
 0x68d   : > { %v8849_v33 = vsel %vm8729_vm8, %v15066_v0, %v8848_v5  ;;  %v8876_v2 = vsel %vm8727_vm7, %v15068_v60, %v8875_v20  ;;  %v8903_v59 = vsel %vm8725_vm6, %v14402_v9, %v14414_v8  ;;  %v8931_v56 = vsel %vm8725_vm6, %v14467_v39, %v14482_v62  ;;  %v15076_v38 = vld [vmem:[#allocation13_spill] sm:$0xff]  ;;  %v15077_v5 = vld [vmem:[#allocation18_spill] sm:$0xff] }
 0x68e   : > { %v9166_v63 = vcombine.low %v9158_v46, %v9165_v29  ;;  %v8877_v16 = vsel %vm8729_vm8, %v15068_v60, %v8876_v2  ;;  %v8904_v55 = vsel %vm8727_vm7, %v14402_v9, %v8903_v59  ;;  %v8932_v17 = vsel %vm8727_vm7, %v14467_v39, %v8931_v56  ;;  %v15078_v21 = vld [vmem:[#allocation17_spill] sm:$0xff]  ;;  %v15079_v20 = vld [vmem:[#allocation26_spill] sm:$0xff] }
 0x68f   : > { %v8905_v1 = vsel %vm8729_vm8, %v14402_v9, %v8904_v55  ;;  %v8933_v8 = vsel %vm8729_vm8, %v14467_v39, %v8932_v17  ;;  %v9016_v31 = vcombine.low %v8737_v13, %v8765_v10  ;;  %v9025_v22 = vcombine.low %v8793_v34, %v8821_v52 }
 0x690   : > { %9167 = vrot.lane.b32.xlu0 %v9166_v63, %s12169_s22  ;;  %v9034_v62 = vcombine.low %v8849_v33, %v8877_v16  ;;  %v9043_v51 = vcombine.low %v8905_v1, %v8933_v8  ;;  %v8749_v11 = vsel %vm8725_vm6, %v15070_v58, %v15069_v14  ;;  %v8777_v12 = vsel %vm8725_vm6, %v15072_v40, %v15071_v42  ;;  %v15080_v33 = vld [vmem:[#allocation23_spill] sm:$0xff]  ;;  %v15081_v63 = vld [vmem:[#allocation32_spill] sm:$0xff] }
 0x691   : > { %v9023_v18 = vrot.slane %v9016_v31, %v14511_v24  ;;  %v9032_v9 = vrot.slane %v9025_v22, %v14511_v24  ;;  %v8750_v39 = vsel %vm8727_vm7, %v15070_v58, %v8749_v11  ;;  %v8778_v49 = vsel %vm8727_vm7, %v15072_v40, %v8777_v12  ;;  %v15082_v16 = vld [vmem:[#allocation31_spill] sm:$0xff] }
 0x692   : > { %v9041_v26 = vrot.slane %v9034_v62, %v14511_v24  ;;  %v9050_v48 = vrot.slane %v9043_v51, %v14511_v24  ;;  %v8751_v36 = vsel %vm8729_vm8, %v15070_v58, %v8750_v39  ;;  %v8779_v25 = vsel %vm8729_vm8, %v15072_v40, %v8778_v49 }
 0x693   : > { %v10123_v37 = vcombine.high %v9023_v18, %v9032_v9  ;;  %v9174_v30 = vcombine.low %v9023_v18, %v9032_v9  ;;  %v8805_v3 = vsel %vm8725_vm6, %v15074_v54, %v15073_v53  ;;  %v8833_v57 = vsel %vm8725_vm6, %v15076_v38, %v15075_v45 }
 0x694   : > { %v10124_v46 = vcombine.high %v9041_v26, %v9050_v48  ;;  %v9175_v13 = vcombine.low %v9041_v26, %v9050_v48  ;;  %v8806_v10 = vsel %vm8727_vm7, %v15074_v54, %v8805_v3  ;;  %v8834_v34 = vsel %vm8727_vm7, %v15076_v38, %v8833_v57 }
 0x695   : > { %v9206_v15 = vrot.slane %v10123_v37, %v13993_v44  ;;  %v9182_v6 = vrot.slane %v9174_v30, %v13993_v44  ;;  %v8807_v0 = vsel %vm8729_vm8, %v15074_v54, %v8806_v10  ;;  %v8835_v61 = vsel %vm8729_vm8, %v15076_v38, %v8834_v34 }
 0x696   : > { %v9213_v29 = vrot.slane %v10124_v46, %v13993_v44  ;;  %v9189_v52 = vrot.slane %v9175_v13, %v13993_v44  ;;  %v8861_v60 = vsel %vm8725_vm6, %v15078_v21, %v15077_v5  ;;  %v8889_v2 = vsel %vm8725_vm6, %v15080_v33, %v15079_v20 }
 0x697   : > { %v8862_v59 = vsel %vm8727_vm7, %v15078_v21, %v8861_v60  ;;  %v8890_v56 = vsel %vm8727_vm7, %v15080_v33, %v8889_v2  ;;  %v8917_v55 = vsel %vm8725_vm6, %v15082_v16, %v15081_v63  ;;  %v8945_v17 = vsel %vm8725_vm6, %v14446_v35, %v14458_v50 }
 0x698   : > { %v9214_v1 = vcombine.low %v9206_v15, %v9213_v29  ;;  %v9190_v8 = vcombine.low %v9182_v6, %v9189_v52  ;;  %v8863_v31 = vsel %vm8729_vm8, %v15078_v21, %v8862_v59  ;;  %v8891_v22 = vsel %vm8729_vm8, %v15080_v33, %v8890_v56 }
 0x699   : > { %v8918_v62 = vsel %vm8727_vm7, %v15082_v16, %v8917_v55  ;;  %v8946_v51 = vsel %vm8727_vm7, %v14446_v35, %v8945_v17  ;;  %v9088_v14 = vcombine.low %v8751_v36, %v8779_v25  ;;  %v9097_v58 = vcombine.low %v8807_v0, %v8835_v61 }
 0x69a   : > { %9215 = vrot.lane.b32.xlu1 %v9214_v1, %s12170_s23  ;;  %9191 = vrot.lane.b32.xlu0 %v9190_v8, %s12171_s24  ;;  %v8919_v50 = vsel %vm8729_vm8, %v15082_v16, %v8918_v62  ;;  %v8947_v11 = vsel %vm8729_vm8, %v14446_v35, %v8946_v51  ;;  %v9106_v42 = vcombine.low %v8863_v31, %v8891_v22 }
 0x69b   : > { %v9095_v40 = vrot.slane %v9088_v14, %v14511_v24  ;;  %v9104_v12 = vrot.slane %v9097_v58, %v14511_v24  ;;  %v9115_v18 = vcombine.low %v8919_v50, %v8947_v11  ;;  %v10125_v9 = vcombine.high %v14530_v47, %v14533_v23 }
 0x69c   : > { %v10126_v39 = vcombine.high %v14536_v41, %v14539_v43  ;;  %v9136_v49 = vrot.slane %v9128_v19, %v13993_v44  ;;  %v9143_v35 = vrot.slane %v9129_v7, %v13993_v44  ;;  %v9113_v26 = vrot.slane %v9106_v42, %v14511_v24 }
 0x69d   : > { %v9122_v48 = vrot.slane %v9115_v18, %v14511_v24  ;;  %v9270_v36 = vcombine.low %v9095_v40, %v9104_v12  ;;  %v10127_v25 = vcombine.high %v9095_v40, %v9104_v12  ;;  %v9254_v47 = vrot.slane %v10125_v9, %v13993_v44 }
 0x69e   : > { %v9261_v23 = vrot.slane %v10126_v39, %v13993_v44  ;;  %v9144_v41 = vcombine.low %v9136_v49, %v9143_v35 }
 0x69f   : > { %v9271_v43 = vcombine.low %v9113_v26, %v9122_v48  ;;  %v10128_v37 = vcombine.high %v9113_v26, %v9122_v48  ;;  %v9278_v32 = vrot.slane %v9270_v36, %v13993_v44  ;;  %v9302_v27 = vrot.slane %v10127_v25, %v13993_v44 }
 0x6a0   : > { %v9262_v28 = vcombine.low %v9254_v47, %v9261_v23 }
 0x6a1   : > { %v9285_v19 = vrot.slane %v9271_v43, %v13993_v44  ;;  %v9309_v4 = vrot.slane %v10128_v37, %v13993_v44 }
 0x6a2   : > { %9263 = vrot.lane.b32.xlu0 %v9262_v28, %s12172_s25 }
 0x6a3   : > { %v9286_v24 = vcombine.low %v9278_v32, %v9285_v19  ;;  %v9310_v7 = vcombine.low %v9302_v27, %v9309_v4 }
 0x6a5   : > { %9287 = vrot.lane.b32.xlu1 %v9286_v24, %s12173_s26 }
 0x6a6   : > { %9311 = vrot.lane.b32.xlu0 %v9310_v7, %s12174_s27 }
 0x6fb   : > { %v9240_v53 = vpop.permute.xlu1 %9239 }
 0x702   : > { %v9168_v30 = vpop.permute.xlu0 %9167 }
 0x703   : > { %v9314_v54 = vsel %vm223_vm1, %v9144_v41, %v9168_v30 }
 0x70c   : > { %v9192_v3 = vpop.permute.xlu0 %9191  ;;  %v9216_v38 = vpop.permute.xlu1 %9215 }
 0x70d   : > { %v9316_v45 = vsel %vm9315_vm9, %v9314_v54, %v9192_v3 }
 0x70e   : > { %v9318_v57 = vsel %vm9317_vm10, %v9316_v45, %v9216_v38 }
 0x70f   : > { %v9320_v44 = vsel %vm9319_vm11, %v9318_v57, %v9240_v53 }
 0x714   : > { %v9264_v46 = vpop.permute.xlu0 %9263 }
 0x715   : > { %v9322_v13 = vsel %vm9321_vm12, %v9320_v44, %v9264_v46 }
 0x717   : > { %v9288_v10 = vpop.permute.xlu1 %9287 }
 0x718   : > { %v9324_v34 = vsel %vm9323_vm13, %v9322_v13, %v9288_v10  ;;  %v9312_v15 = vpop.permute.xlu0 %9311 }
 0x719   : > { %v9326_v6 = vsel %vm9325_vm14, %v9324_v34, %v9312_v15 }
 0x71a   : > { %9328 = vst.msk [vmem:[%s222_s6] sm:$0xff] %vm9327_vm15, %v9326_v6 }
 0x71b PF: > { %s15_s18 = sadd.s32 1, %s12163_s18  }
 0x71c   : > { %p12_p4 = scmp.ge.s32.totalorder %s15_s18, 4  }
 0x71e   :  { %14 = sbr.rel (!%p12_p4) target bundleno = 1 (0x1), region = 89 }

</bundles_post_ra>
